<compile_context>
chip_gen: v7x
topology: tpu7x:2x2x1
jax: 0.10.0
libtpu: 0.0.40
codegen_flags: <defaults>
</compile_context>

<pallas_src>
import jax
import jax.numpy as jnp
from jax.experimental import pallas as pl
from jax.experimental.pallas import tpu as pltpu

BN_EPS = 1e-5

# (in_features, out_features) per Linear layer — logical (PyTorch) and lane-padded.
LOGICAL_DIMS = [(28 * 28, 512), (512, 484), (484, 256), (256, 64), (64, 10)]
PADDED_DIMS = [(896, 512), (512, 512), (512, 256), (256, 128), (128, 128)]
IN_PAD = PADDED_DIMS[0][0]       # 896
OUT_PAD = PADDED_DIMS[-1][1]     # 128
N_CLASSES = LOGICAL_DIMS[-1][1]  # 10
BN_PAD = PADDED_DIMS[3][1]       # 128 (fc4 output width, padded)

TB = 128  # batch tile (rows per grid step); multiple of 8/16 for f32/bf16 sublane packing


def _mlp_kernel(x_ref,
                w1_ref, b1_ref,
                w2_ref, b2_ref,
                w3_ref, b3_ref,
                w4_ref, b4_ref,
                w5_ref, b5_ref,
                bn_scale_ref, bn_shift_ref,
                o_ref):
    def dense(h, w_ref, b_ref):
        # bf16 x bf16 MXU matmul with f32 accumulation (+ f32 bias).
        return jnp.dot(h.astype(jnp.bfloat16), w_ref[...],
                       preferred_element_type=jnp.float32) + b_ref[...]

    # fc1..fc3 + relu (x_ref is already bf16, so the first cast is a no-op)
    h = jnp.maximum(dense(x_ref[...], w1_ref, b1_ref), 0.0)
    h = jnp.maximum(dense(h, w2_ref, b2_ref), 0.0)
    h = jnp.maximum(dense(h, w3_ref, b3_ref), 0.0)
    # fc4
    h = dense(h, w4_ref, b4_ref)
    # BatchNorm1d (eval: running stats folded into per-feature affine), all f32.
    h = h * bn_scale_ref[...] + bn_shift_ref[...]
    # relu; Dropout(0.25) is identity in eval mode.
    h = jnp.maximum(h, 0.0)
    # fc5 + relu (lane-padded to 128 outputs; wrapper slices the real 10)
    o_ref[...] = jnp.maximum(dense(h, w5_ref, b5_ref), 0.0)


@jax.jit
def fashion_mnist_forward(x, padded_params):
    """x: (B, 784) f32.  padded_params: lane-padded bf16 weights + f32 biases / folded BN."""
    B, d_in = x.shape
    # Fuse feature-pad (784 -> 896) with the bf16 cast in the wrapper.
    x = jnp.pad(x, ((0, 0), (0, IN_PAD - d_in))).astype(jnp.bfloat16)
    # Pad the batch up to a multiple of the batch tile (zero rows are exact:
    # eval-mode BN has no cross-row coupling, and we slice them off below).
    Bp = pl.cdiv(B, TB) * TB
    if Bp != B:
        x = jnp.pad(x, ((0, Bp - B), (0, 0)))

    operands = [
        x,
        padded_params["w1"], padded_params["b1"],
        padded_params["w2"], padded_params["b2"],
        padded_params["w3"], padded_params["b3"],
        padded_params["w4"], padded_params["b4"],
        padded_params["w5"], padded_params["b5"],
        padded_params["bn_scale"], padded_params["bn_shift"],
    ]

    # x / out are tiled over the batch; every parameter is a single VMEM-resident
    # block with a constant index_map so it is fetched once, not once per tile.
    in_specs = [pl.BlockSpec((TB, IN_PAD), lambda i: (i, 0))]
    in_specs += [pl.BlockSpec(a.shape, lambda i: (0, 0)) for a in operands[1:]]
    out_specs = pl.BlockSpec((TB, OUT_PAD), lambda i: (i, 0))

    # Advisory cost estimate: small, memory-bound custom call.
    weight_elems = sum(k * n for k, n in PADDED_DIMS)
    flops = 2 * Bp * weight_elems
    bytes_accessed = (weight_elems * 2                       # bf16 weights
                      + sum(n for _, n in PADDED_DIMS) * 4   # f32 biases
                      + 2 * BN_PAD * 4                       # f32 folded BN scale/shift
                      + Bp * IN_PAD * 2                      # bf16 x in
                      + Bp * OUT_PAD * 4)                    # f32 out
    cost = pl.CostEstimate(flops=flops, transcendentals=0,
                           bytes_accessed=bytes_accessed)

    out = pl.pallas_call(
        _mlp_kernel,
        out_shape=jax.ShapeDtypeStruct((Bp, OUT_PAD), jnp.float32),
        grid=(Bp // TB,),
        in_specs=in_specs,
        out_specs=out_specs,
        compiler_params=pltpu.CompilerParams(
            dimension_semantics=("parallel",)),   # v7x: split batch tiles across both TCs
        cost_estimate=cost,
    )(*operands)
    return out[:B, :N_CLASSES]


def init_params(key):
    """PyTorch-style init: Linear U(-1/sqrt(fan_in), 1/sqrt(fan_in)); BN defaults."""
    params = {}
    keys = jax.random.split(key, 2 * len(LOGICAL_DIMS))
    for i, (fan_in, fan_out) in enumerate(LOGICAL_DIMS):
        bound = 1.0 / (fan_in ** 0.5)
        params[f"w{i + 1}"] = jax.random.uniform(
            keys[2 * i], (fan_in, fan_out), minval=-bound, maxval=bound, dtype=jnp.float32)
        params[f"b{i + 1}"] = jax.random.uniform(
            keys[2 * i + 1], (1, fan_out), minval=-bound, maxval=bound, dtype=jnp.float32)
    # BatchNorm1d(64) defaults: gamma=1, beta=0, running_mean=0, running_var=1.
    params["gamma"] = jnp.ones((1, 64), jnp.float32)
    params["beta"] = jnp.zeros((1, 64), jnp.float32)
    params["running_mean"] = jnp.zeros((1, 64), jnp.float32)
    params["running_var"] = jnp.ones((1, 64), jnp.float32)
    return params


def pad_params(params):
    """Zero-pad to lane-dense shapes, cast weights to bf16, fold BN running stats into affine."""
    pp = {}
    for i, ((k, n), (kp, np_)) in enumerate(zip(LOGICAL_DIMS, PADDED_DIMS), start=1):
        w = jnp.pad(params[f"w{i}"], ((0, kp - k), (0, np_ - n)))
        b = jnp.pad(params[f"b{i}"], ((0, 0), (0, np_ - n)))
        pp[f"w{i}"] = w.astype(jnp.bfloat16)
        pp[f"b{i}"] = b.astype(jnp.float32)
    # Fold (gamma, beta, running_mean, running_var) -> per-feature scale/shift (f32).
    scale = params["gamma"] * jax.lax.rsqrt(params["running_var"] + BN_EPS)
    shift = params["beta"] - params["running_mean"] * scale
    # Pad 64 -> 128; padded fc4 features are exactly 0, so the pad values are inert.
    pp["bn_scale"] = jnp.pad(scale, ((0, 0), (0, BN_PAD - 64)),
                             constant_values=1.0).astype(jnp.float32)
    pp["bn_shift"] = jnp.pad(shift, ((0, 0), (0, BN_PAD - 64))).astype(jnp.float32)
    return pp


def reference_forward(x, pp):
    """Pure-JAX reference computing the same bf16-weight / f32-accumulate math."""
    xp = jnp.pad(x, ((0, 0), (0, IN_PAD - x.shape[1]))).astype(jnp.bfloat16)

    def dense(h, w, b):
        return jnp.dot(h.astype(jnp.bfloat16), w, preferred_element_type=jnp.float32) + b

    h = jnp.maximum(dense(xp, pp["w1"], pp["b1"]), 0.0)
    h = jnp.maximum(dense(h, pp["w2"], pp["b2"]), 0.0)
    h = jnp.maximum(dense(h, pp["w3"], pp["b3"]), 0.0)
    h = dense(h, pp["w4"], pp["b4"])
    h = h * pp["bn_scale"] + pp["bn_shift"]
    h = jnp.maximum(h, 0.0)
    out = jnp.maximum(dense(h, pp["w5"], pp["b5"]), 0.0)
    return out[:, :N_CLASSES]


if __name__ == "__main__":
    key = jax.random.PRNGKey(0)
    k_x, k_p = jax.random.split(key)

    # Batch large enough to exercise the batch-tiled grid (2 tiles of TB=128)
    # and amortize the weight DMA, but still small/fast for a smoke test.
    B = 256
    x = jax.random.normal(k_x, (B, 28 * 28), dtype=jnp.float32)
    params = init_params(k_p)
    padded = pad_params(params)

    out = fashion_mnist_forward(x, padded)
    out = jax.block_until_ready(out)

    ref = reference_forward(x, padded)
    assert out.shape == (B, N_CLASSES)
    assert jnp.allclose(out, ref, atol=5e-3, rtol=5e-3), "mismatch vs reference"

    # Also check a batch that is not a multiple of the tile (exercises batch padding).
    out_small = jax.block_until_ready(fashion_mnist_forward(x[:13], padded))
    assert jnp.allclose(out_small, ref[:13], atol=5e-3, rtol=5e-3), "mismatch (padded batch)"

    print("KERNEL_OK")
</pallas_src>

<mosaic_0001>
module attributes {stable_mosaic.version = 11 : i64} {
  func.func @_mlp_kernel(%arg0: i32, %arg1: memref<128x896xbf16, #tpu.memory_space<vmem>>, %arg2: memref<896x512xbf16, #tpu.memory_space<vmem>>, %arg3: memref<1x512xf32, #tpu.memory_space<vmem>>, %arg4: memref<512x512xbf16, #tpu.memory_space<vmem>>, %arg5: memref<1x512xf32, #tpu.memory_space<vmem>>, %arg6: memref<512x256xbf16, #tpu.memory_space<vmem>>, %arg7: memref<1x256xf32, #tpu.memory_space<vmem>>, %arg8: memref<256x128xbf16, #tpu.memory_space<vmem>>, %arg9: memref<1x128xf32, #tpu.memory_space<vmem>>, %arg10: memref<128x128xbf16, #tpu.memory_space<vmem>>, %arg11: memref<1x128xf32, #tpu.memory_space<vmem>>, %arg12: memref<1x128xf32, #tpu.memory_space<vmem>>, %arg13: memref<1x128xf32, #tpu.memory_space<vmem>>, %arg14: memref<128x128xf32, #tpu.memory_space<vmem>>) attributes {dimension_semantics = [#tpu.dimension_semantics<parallel>], iteration_bounds = array<i64: 2>, scalar_prefetch = 0 : i64, scratch_operands = 0 : i64, tpu.core_type = #tpu.core_type<tc>, window_params = [{transform_indices = @transform_0, window_bounds = array<i64: 128, 896>}, {pipeline_mode = #tpu.pipeline_mode<synchronous>, transform_indices = @transform_1, window_bounds = array<i64: 896, 512>}, {pipeline_mode = #tpu.pipeline_mode<synchronous>, transform_indices = @transform_2, window_bounds = array<i64: 1, 512>}, {pipeline_mode = #tpu.pipeline_mode<synchronous>, transform_indices = @transform_3, window_bounds = array<i64: 512, 512>}, {pipeline_mode = #tpu.pipeline_mode<synchronous>, transform_indices = @transform_4, window_bounds = array<i64: 1, 512>}, {pipeline_mode = #tpu.pipeline_mode<synchronous>, transform_indices = @transform_5, window_bounds = array<i64: 512, 256>}, {pipeline_mode = #tpu.pipeline_mode<synchronous>, transform_indices = @transform_6, window_bounds = array<i64: 1, 256>}, {pipeline_mode = #tpu.pipeline_mode<synchronous>, transform_indices = @transform_7, window_bounds = array<i64: 256, 128>}, {pipeline_mode = #tpu.pipeline_mode<synchronous>, transform_indices = @transform_8, window_bounds = array<i64: 1, 128>}, {pipeline_mode = #tpu.pipeline_mode<synchronous>, transform_indices = @transform_9, window_bounds = array<i64: 128, 128>}, {pipeline_mode = #tpu.pipeline_mode<synchronous>, transform_indices = @transform_10, window_bounds = array<i64: 1, 128>}, {pipeline_mode = #tpu.pipeline_mode<synchronous>, transform_indices = @transform_11, window_bounds = array<i64: 1, 128>}, {pipeline_mode = #tpu.pipeline_mode<synchronous>, transform_indices = @transform_12, window_bounds = array<i64: 1, 128>}, {transform_indices = @transform_13, window_bounds = array<i64: 128, 128>}]} {
    %c0 = arith.constant 0 : index
    %c0_0 = arith.constant 0 : index
    %0 = vector.load %arg1[%c0, %c0_0] : memref<128x896xbf16, #tpu.memory_space<vmem>>, vector<128x896xbf16>
    %c0_1 = arith.constant 0 : index
    %c0_2 = arith.constant 0 : index
    %1 = vector.load %arg2[%c0_1, %c0_2] : memref<896x512xbf16, #tpu.memory_space<vmem>>, vector<896x512xbf16>
    %cst = arith.constant dense<0.000000e+00> : vector<128x512xf32>
    %2 = tpu.matmul %0, %1, %cst {dimension_numbers = #tpu.dot_dimension_numbers<[1], [0], [0], [1], [0, 0, 1, 1], [], []>} : vector<128x896xbf16>, vector<896x512xbf16>, vector<128x512xf32> -> vector<128x512xf32>
    %c0_3 = arith.constant 0 : index
    %c0_4 = arith.constant 0 : index
    %3 = vector.load %arg3[%c0_3, %c0_4] : memref<1x512xf32, #tpu.memory_space<vmem>>, vector<1x512xf32>
    %4 = vector.broadcast %3 : vector<1x512xf32> to vector<128x512xf32>
    %5 = arith.addf %2, %4 : vector<128x512xf32>
    %cst_5 = arith.constant 0.000000e+00 : f32
    %6 = vector.broadcast %cst_5 : f32 to vector<128x512xf32>
    %7 = arith.maximumf %5, %6 : vector<128x512xf32>
    %8 = arith.truncf %7 : vector<128x512xf32> to vector<128x512xbf16>
    %c0_6 = arith.constant 0 : index
    %c0_7 = arith.constant 0 : index
    %9 = vector.load %arg4[%c0_6, %c0_7] : memref<512x512xbf16, #tpu.memory_space<vmem>>, vector<512x512xbf16>
    %cst_8 = arith.constant dense<0.000000e+00> : vector<128x512xf32>
    %10 = tpu.matmul %8, %9, %cst_8 {dimension_numbers = #tpu.dot_dimension_numbers<[1], [0], [0], [1], [0, 0, 1, 1], [], []>} : vector<128x512xbf16>, vector<512x512xbf16>, vector<128x512xf32> -> vector<128x512xf32>
    %c0_9 = arith.constant 0 : index
    %c0_10 = arith.constant 0 : index
    %11 = vector.load %arg5[%c0_9, %c0_10] : memref<1x512xf32, #tpu.memory_space<vmem>>, vector<1x512xf32>
    %12 = vector.broadcast %11 : vector<1x512xf32> to vector<128x512xf32>
    %13 = arith.addf %10, %12 : vector<128x512xf32>
    %cst_11 = arith.constant 0.000000e+00 : f32
    %14 = vector.broadcast %cst_11 : f32 to vector<128x512xf32>
    %15 = arith.maximumf %13, %14 : vector<128x512xf32>
    %16 = arith.truncf %15 : vector<128x512xf32> to vector<128x512xbf16>
    %c0_12 = arith.constant 0 : index
    %c0_13 = arith.constant 0 : index
    %17 = vector.load %arg6[%c0_12, %c0_13] : memref<512x256xbf16, #tpu.memory_space<vmem>>, vector<512x256xbf16>
    %cst_14 = arith.constant dense<0.000000e+00> : vector<128x256xf32>
    %18 = tpu.matmul %16, %17, %cst_14 {dimension_numbers = #tpu.dot_dimension_numbers<[1], [0], [0], [1], [0, 0, 1, 1], [], []>} : vector<128x512xbf16>, vector<512x256xbf16>, vector<128x256xf32> -> vector<128x256xf32>
    %c0_15 = arith.constant 0 : index
    %c0_16 = arith.constant 0 : index
    %19 = vector.load %arg7[%c0_15, %c0_16] : memref<1x256xf32, #tpu.memory_space<vmem>>, vector<1x256xf32>
    %20 = vector.broadcast %19 : vector<1x256xf32> to vector<128x256xf32>
    %21 = arith.addf %18, %20 : vector<128x256xf32>
    %cst_17 = arith.constant 0.000000e+00 : f32
    %22 = vector.broadcast %cst_17 : f32 to vector<128x256xf32>
    %23 = arith.maximumf %21, %22 : vector<128x256xf32>
    %24 = arith.truncf %23 : vector<128x256xf32> to vector<128x256xbf16>
    %c0_18 = arith.constant 0 : index
    %c0_19 = arith.constant 0 : index
    %25 = vector.load %arg8[%c0_18, %c0_19] : memref<256x128xbf16, #tpu.memory_space<vmem>>, vector<256x128xbf16>
    %cst_20 = arith.constant dense<0.000000e+00> : vector<128x128xf32>
    %26 = tpu.matmul %24, %25, %cst_20 {dimension_numbers = #tpu.dot_dimension_numbers<[1], [0], [0], [1], [0, 0, 1, 1], [], []>} : vector<128x256xbf16>, vector<256x128xbf16>, vector<128x128xf32> -> vector<128x128xf32>
    %c0_21 = arith.constant 0 : index
    %c0_22 = arith.constant 0 : index
    %27 = vector.load %arg9[%c0_21, %c0_22] : memref<1x128xf32, #tpu.memory_space<vmem>>, vector<1x128xf32>
    %28 = vector.broadcast %27 : vector<1x128xf32> to vector<128x128xf32>
    %29 = arith.addf %26, %28 : vector<128x128xf32>
    %c0_23 = arith.constant 0 : index
    %c0_24 = arith.constant 0 : index
    %30 = vector.load %arg12[%c0_23, %c0_24] : memref<1x128xf32, #tpu.memory_space<vmem>>, vector<1x128xf32>
    %31 = vector.broadcast %30 : vector<1x128xf32> to vector<128x128xf32>
    %32 = arith.mulf %29, %31 : vector<128x128xf32>
    %c0_25 = arith.constant 0 : index
    %c0_26 = arith.constant 0 : index
    %33 = vector.load %arg13[%c0_25, %c0_26] : memref<1x128xf32, #tpu.memory_space<vmem>>, vector<1x128xf32>
    %34 = vector.broadcast %33 : vector<1x128xf32> to vector<128x128xf32>
    %35 = arith.addf %32, %34 : vector<128x128xf32>
    %cst_27 = arith.constant 0.000000e+00 : f32
    %36 = vector.broadcast %cst_27 : f32 to vector<128x128xf32>
    %37 = arith.maximumf %35, %36 : vector<128x128xf32>
    %38 = arith.truncf %37 : vector<128x128xf32> to vector<128x128xbf16>
    %c0_28 = arith.constant 0 : index
    %c0_29 = arith.constant 0 : index
    %39 = vector.load %arg10[%c0_28, %c0_29] : memref<128x128xbf16, #tpu.memory_space<vmem>>, vector<128x128xbf16>
    %cst_30 = arith.constant dense<0.000000e+00> : vector<128x128xf32>
    %40 = tpu.matmul %38, %39, %cst_30 {dimension_numbers = #tpu.dot_dimension_numbers<[1], [0], [0], [1], [0, 0, 1, 1], [], []>} : vector<128x128xbf16>, vector<128x128xbf16>, vector<128x128xf32> -> vector<128x128xf32>
    %c0_31 = arith.constant 0 : index
    %c0_32 = arith.constant 0 : index
    %41 = vector.load %arg11[%c0_31, %c0_32] : memref<1x128xf32, #tpu.memory_space<vmem>>, vector<1x128xf32>
    %42 = vector.broadcast %41 : vector<1x128xf32> to vector<128x128xf32>
    %43 = arith.addf %40, %42 : vector<128x128xf32>
    %cst_33 = arith.constant 0.000000e+00 : f32
    %44 = vector.broadcast %cst_33 : f32 to vector<128x128xf32>
    %45 = arith.maximumf %43, %44 : vector<128x128xf32>
    %c0_34 = arith.constant 0 : index
    %c0_35 = arith.constant 0 : index
    %46 = vector.load %arg14[%c0_34, %c0_35] : memref<128x128xf32, #tpu.memory_space<vmem>>, vector<128x128xf32>
    tpu.vector_store %arg14[%c0_34, %c0_35], %45 {strides = array<i32>} : memref<128x128xf32, #tpu.memory_space<vmem>>, vector<128x128xf32>,
    return
  }
  func.func @transform_0(%arg0: i32) -> (i32, i32) {
    %c0_i32 = arith.constant 0 : i32
    %c0_i32_0 = arith.constant 0 : i32
    return %arg0, %c0_i32 : i32, i32
  }
  func.func @transform_1(%arg0: i32) -> (i32, i32) {
    %c0_i32 = arith.constant 0 : i32
    %c0_i32_0 = arith.constant 0 : i32
    %c0_i32_1 = arith.constant 0 : i32
    return %c0_i32, %c0_i32_0 : i32, i32
  }
  func.func @transform_2(%arg0: i32) -> (i32, i32) {
    %c0_i32 = arith.constant 0 : i32
    %c0_i32_0 = arith.constant 0 : i32
    %c0_i32_1 = arith.constant 0 : i32
    return %c0_i32, %c0_i32_0 : i32, i32
  }
  func.func @transform_3(%arg0: i32) -> (i32, i32) {
    %c0_i32 = arith.constant 0 : i32
    %c0_i32_0 = arith.constant 0 : i32
    %c0_i32_1 = arith.constant 0 : i32
    return %c0_i32, %c0_i32_0 : i32, i32
  }
  func.func @transform_4(%arg0: i32) -> (i32, i32) {
    %c0_i32 = arith.constant 0 : i32
    %c0_i32_0 = arith.constant 0 : i32
    %c0_i32_1 = arith.constant 0 : i32
    return %c0_i32, %c0_i32_0 : i32, i32
  }
  func.func @transform_5(%arg0: i32) -> (i32, i32) {
    %c0_i32 = arith.constant 0 : i32
    %c0_i32_0 = arith.constant 0 : i32
    %c0_i32_1 = arith.constant 0 : i32
    return %c0_i32, %c0_i32_0 : i32, i32
  }
  func.func @transform_6(%arg0: i32) -> (i32, i32) {
    %c0_i32 = arith.constant 0 : i32
    %c0_i32_0 = arith.constant 0 : i32
    %c0_i32_1 = arith.constant 0 : i32
    return %c0_i32, %c0_i32_0 : i32, i32
  }
  func.func @transform_7(%arg0: i32) -> (i32, i32) {
    %c0_i32 = arith.constant 0 : i32
    %c0_i32_0 = arith.constant 0 : i32
    %c0_i32_1 = arith.constant 0 : i32
    return %c0_i32, %c0_i32_0 : i32, i32
  }
  func.func @transform_8(%arg0: i32) -> (i32, i32) {
    %c0_i32 = arith.constant 0 : i32
    %c0_i32_0 = arith.constant 0 : i32
    %c0_i32_1 = arith.constant 0 : i32
    return %c0_i32, %c0_i32_0 : i32, i32
  }
  func.func @transform_9(%arg0: i32) -> (i32, i32) {
    %c0_i32 = arith.constant 0 : i32
    %c0_i32_0 = arith.constant 0 : i32
    %c0_i32_1 = arith.constant 0 : i32
    return %c0_i32, %c0_i32_0 : i32, i32
  }
  func.func @transform_10(%arg0: i32) -> (i32, i32) {
    %c0_i32 = arith.constant 0 : i32
    %c0_i32_0 = arith.constant 0 : i32
    %c0_i32_1 = arith.constant 0 : i32
    return %c0_i32, %c0_i32_0 : i32, i32
  }
  func.func @transform_11(%arg0: i32) -> (i32, i32) {
    %c0_i32 = arith.constant 0 : i32
    %c0_i32_0 = arith.constant 0 : i32
    %c0_i32_1 = arith.constant 0 : i32
    return %c0_i32, %c0_i32_0 : i32, i32
  }
  func.func @transform_12(%arg0: i32) -> (i32, i32) {
    %c0_i32 = arith.constant 0 : i32
    %c0_i32_0 = arith.constant 0 : i32
    %c0_i32_1 = arith.constant 0 : i32
    return %c0_i32, %c0_i32_0 : i32, i32
  }
  func.func @transform_13(%arg0: i32) -> (i32, i32) {
    %c0_i32 = arith.constant 0 : i32
    %c0_i32_0 = arith.constant 0 : i32
    return %arg0, %c0_i32 : i32, i32
  }
}

</mosaic_0001>

<bundles_post_ra>
// kernel: fashion_mnist_forward.1
= control target key start
LH: loop header
LB: loop body
LE: loop exit
PB: predicated region body
PF: predicated region fallthrough
CT: control target
= control target key end

     0   :  { %s7620_s25 = smov 0   ;;  %s9437_s0 = inlined_call_operand.vmem [shape: bf16[256,896], index: 0, kind: input, shape index: {}]   ;;  %s9438_s1 = inlined_call_operand.vmem [shape: bf16[896,512], index: 1, kind: input, shape index: {}]   ;;  %s9439_s2 = inlined_call_operand.vmem [shape: f32[1,512], index: 2, kind: input, shape index: {}]   ;;  %s9440_s3 = inlined_call_operand.vmem [shape: bf16[512,512], index: 3, kind: input, shape index: {}]   ;;  %s9441_s4 = inlined_call_operand.vmem [shape: f32[1,512], index: 4, kind: input, shape index: {}]   ;;  %s9442_s5 = inlined_call_operand.vmem [shape: bf16[512,256], index: 5, kind: input, shape index: {}]   ;;  %s9443_s6 = inlined_call_operand.vmem [shape: f32[1,256], index: 6, kind: input, shape index: {}]   ;;  %s9444_s7 = inlined_call_operand.vmem [shape: bf16[256,128], index: 7, kind: input, shape index: {}]   ;;  %s9445_s8 = inlined_call_operand.vmem [shape: f32[1,128], index: 8, kind: input, shape index: {}]   ;;  %s9446_s9 = inlined_call_operand.vmem [shape: bf16[128,128], index: 9, kind: input, shape index: {}]   ;;  %s9447_s10 = inlined_call_operand.vmem [shape: f32[1,128], index: 10, kind: input, shape index: {}]   ;;  %s9448_s11 = inlined_call_operand.vmem [shape: f32[1,128], index: 11, kind: input, shape index: {}]   ;;  %s9449_s12 = inlined_call_operand.vmem [shape: f32[1,128], index: 12, kind: input, shape index: {}]   ;;  %s9450_s13 = inlined_call_operand.vmem [shape: f32[256,128], index: 13, kind: output, shape index: {}]  }
   0x1 LB: > { %s5732_s26 = sadd.s32 4294967295, %s7547_s25   ;;  %p5736_p0 = scmp.ge.s32.totalorder %s7547_s25, 1  ;;  %s7547_s25 = sphi %s7620_s25, %s23_s25  }
   0x2   : > { %p389_p1 = scmp.lt.s32.totalorder %s7547_s25, 3 }
   0x4   : > { %p390_p2 = pnand %p5736_p0, %p389_p1 }
   0x5   : > { %v6813_v0 = vld [vmem:[%s9438_s1 + $0x4] ss:$16 sps:$4 sm:$0xff] (!%p390_p2)   ;;  %v6815_v1 = vld [vmem:[%s9438_s1 + $0xc] ss:$16 sps:$4 sm:$0xff] (!%p390_p2)   ;;  %v6817_v2 = vld [vmem:[%s9438_s1] ss:$16 sps:$4 sm:$0xff] (!%p390_p2)  }
   0x6   : > { %393 = sbr.rel (%p390_p2) target bundleno = 1559 (0x617), region = 72  ;;  %2166 = vmatprep.subr.bf16.mxu0 (!%p390_p2), %v6813_v0  ;;  %v6818_v3 = vld [vmem:[%s9438_s1 + $0x8] ss:$16 sps:$4 sm:$0xff] (!%p390_p2)   ;;  %2618 = vmatprep.subr.bf16.mxu1 (!%p390_p2), %v6815_v1  ;;  %v6819_v4 = vld [vmem:[%s9438_s1 + $0x24] ss:$16 sps:$4 sm:$0xff] (!%p390_p2)   ;;  %s5737_s27 = sshll.u32 (!%p390_p2), %s5732_s26, 4 }
   0x7   : > { %2167 = vmatpush1.bf16.msra.mxu0 (!%p390_p2), %v6817_v2  ;;  %2619 = vmatpush1.bf16.msra.mxu1 (!%p390_p2), %v6818_v3  ;;  %v6821_v5 = vld [vmem:[%s9438_s1 + $0x2c] ss:$16 sps:$4 sm:$0xff] (!%p390_p2)   ;;  %v6823_v6 = vld [vmem:[%s9438_s1 + $0x20] ss:$16 sps:$4 sm:$0xff] (!%p390_p2)   ;;  %v6824_v7 = vld [vmem:[%s9438_s1 + $0x28] ss:$16 sps:$4 sm:$0xff] (!%p390_p2)  }
   0x8   : > { %2168 = vmatprep.subr.bf16.mxu0 (!%p390_p2), %v6819_v4  ;;  %2620 = vmatprep.subr.bf16.mxu1 (!%p390_p2), %v6821_v5  ;;  %v6825_v8 = vld [vmem:[%s9438_s1 + $0x44] ss:$16 sps:$4 sm:$0xff] (!%p390_p2)   ;;  %v6827_v9 = vld [vmem:[%s9438_s1 + $0x4c] ss:$16 sps:$4 sm:$0xff] (!%p390_p2)   ;;  %v6829_v10 = vld [vmem:[%s9438_s1 + $0x40] ss:$16 sps:$4 sm:$0xff] (!%p390_p2)  }
   0x9   : > { %v6830_v11 = vld [vmem:[%s9438_s1 + $0x48] ss:$16 sps:$4 sm:$0xff] (!%p390_p2)   ;;  %v6831_v12 = vld [vmem:[%s9438_s1 + $0x64] ss:$16 sps:$4 sm:$0xff] (!%p390_p2)   ;;  %v6833_v13 = vld [vmem:[%s9438_s1 + $0x6c] ss:$16 sps:$4 sm:$0xff] (!%p390_p2)  }
   0xa   : > { %v6835_v14 = vld [vmem:[%s9438_s1 + $0x60] ss:$16 sps:$4 sm:$0xff] (!%p390_p2)   ;;  %v6836_v15 = vld [vmem:[%s9438_s1 + $0x68] ss:$16 sps:$4 sm:$0xff] (!%p390_p2)   ;;  %v6837_v16 = vld [vmem:[%s9438_s1 + $0x84] ss:$16 sps:$4 sm:$0xff] (!%p390_p2)  }
   0xb   : > { %2169 = vmatpush1.bf16.msra.mxu0 (!%p390_p2), %v6823_v6  ;;  %2621 = vmatpush1.bf16.msra.mxu1 (!%p390_p2), %v6824_v7  ;;  %v6839_v17 = vld [vmem:[%s9438_s1 + $0x8c] ss:$16 sps:$4 sm:$0xff] (!%p390_p2)   ;;  %v6841_v18 = vld [vmem:[%s9438_s1 + $0x80] ss:$16 sps:$4 sm:$0xff] (!%p390_p2)   ;;  %v6842_v19 = vld [vmem:[%s9438_s1 + $0x88] ss:$16 sps:$4 sm:$0xff] (!%p390_p2)  }
   0xc   : > { %2170 = vmatprep.subr.bf16.mxu0 (!%p390_p2), %v6825_v8  ;;  %2622 = vmatprep.subr.bf16.mxu1 (!%p390_p2), %v6827_v9  ;;  %v6843_v20 = vld [vmem:[%s9438_s1 + $0xa4] ss:$16 sps:$4 sm:$0xff] (!%p390_p2)   ;;  %v6845_v21 = vld [vmem:[%s9438_s1 + $0xac] ss:$16 sps:$4 sm:$0xff] (!%p390_p2)   ;;  %v6847_v22 = vld [vmem:[%s9438_s1 + $0xa0] ss:$16 sps:$4 sm:$0xff] (!%p390_p2)  }
   0xd   : > { %v6848_v23 = vld [vmem:[%s9438_s1 + $0xa8] ss:$16 sps:$4 sm:$0xff]   ;;  %v6849_v24 = vld [vmem:[%s9438_s1 + $0xc4] ss:$16 sps:$4 sm:$0xff]   ;;  %v6851_v25 = vld [vmem:[%s9438_s1 + $0xcc] ss:$16 sps:$4 sm:$0xff]  }
   0xe   : > { %v6853_v26 = vld [vmem:[%s9438_s1 + $0xc0] ss:$16 sps:$4 sm:$0xff]   ;;  %v6854_v27 = vld [vmem:[%s9438_s1 + $0xc8] ss:$16 sps:$4 sm:$0xff]   ;;  %v6855_v28 = vld [vmem:[%s9438_s1 + $0xe4] ss:$16 sps:$4 sm:$0xff]  }
   0xf   : > { %2171 = vmatpush1.bf16.msra.mxu0 %v6829_v10  ;;  %2623 = vmatpush1.bf16.msra.mxu1 %v6830_v11  ;;  %v6857_v29 = vld [vmem:[%s9438_s1 + $0xec] ss:$16 sps:$4 sm:$0xff]   ;;  %v6859_v30 = vld [vmem:[%s9438_s1 + $0xe0] ss:$16 sps:$4 sm:$0xff]   ;;  %v6860_v31 = vld [vmem:[%s9438_s1 + $0xe8] ss:$16 sps:$4 sm:$0xff]  }
  0x10   : > { %2172 = vmatprep.subr.bf16.mxu0 %v6831_v12  ;;  %2624 = vmatprep.subr.bf16.mxu1 %v6833_v13  ;;  %v6861_v32 = vld [vmem:[%s9438_s1 + $0x104] ss:$16 sps:$4 sm:$0xff]   ;;  %p435_p3 = scmp.lt.s32.totalorder %s5737_s27, 31  ;;  %v6863_v33 = vld [vmem:[%s9438_s1 + $0x10c] ss:$16 sps:$4 sm:$0xff]  }
  0x11   : > { %v6865_v34 = vld [vmem:[%s9438_s1 + $0x100] ss:$16 sps:$4 sm:$0xff]   ;;  %v6866_v35 = vld [vmem:[%s9438_s1 + $0x108] ss:$16 sps:$4 sm:$0xff]   ;;  %v6867_v36 = vld [vmem:[%s9438_s1 + $0x124] ss:$16 sps:$4 sm:$0xff]  }
  0x12   : > { %s9452_s27 = smov (!%p435_p3, %s5737_s27), 31  ;;  %v6869_v37 = vld [vmem:[%s9438_s1 + $0x12c] ss:$16 sps:$4 sm:$0xff]   ;;  %v6871_v38 = vld [vmem:[%s9438_s1 + $0x120] ss:$16 sps:$4 sm:$0xff]  }
  0x13   : > { %2173 = vmatpush1.bf16.msra.mxu0 %v6835_v14  ;;  %2625 = vmatpush1.bf16.msra.mxu1 %v6836_v15  ;;  %v6872_v39 = vld [vmem:[%s9438_s1 + $0x128] ss:$16 sps:$4 sm:$0xff]   ;;  %v6873_v40 = vld [vmem:[%s9438_s1 + $0x144] ss:$16 sps:$4 sm:$0xff]   ;;  %s6803_s18 = smul.u32 28, %s9452_s27  ;;  %s5740_s29 = sshll.u32 %s9452_s27, 3 }
  0x14   : > { %2174 = vmatprep.subr.bf16.mxu0 %v6837_v16  ;;  %2626 = vmatprep.subr.bf16.mxu1 %v6839_v17  ;;  %v6875_v41 = vld [vmem:[%s9438_s1 + $0x14c] ss:$16 sps:$4 sm:$0xff]   ;;  %v6877_v42 = vld [vmem:[%s9438_s1 + $0x140] ss:$16 sps:$4 sm:$0xff]   ;;  %v6878_v43 = vld [vmem:[%s9438_s1 + $0x148] ss:$16 sps:$4 sm:$0xff]   ;;  %s9416_s16 = scalar_lea.vmem %s9450_s13, %s5740_s29 }
  0x15   : > { %v6879_v44 = vld [vmem:[%s9438_s1 + $0x164] ss:$16 sps:$4 sm:$0xff]   ;;  %s7771_s14 = scalar_lea.vmem %s9437_s0, %s6803_s18  ;;  %v6881_v45 = vld [vmem:[%s9438_s1 + $0x16c] ss:$16 sps:$4 sm:$0xff]   ;;  %v6883_v46 = vld [vmem:[%s9438_s1 + $0x160] ss:$16 sps:$4 sm:$0xff]  }
  0x16   : > { %v6884_v47 = vld [vmem:[%s9438_s1 + $0x168] ss:$16 sps:$4 sm:$0xff]   ;;  %v6911_v48 = vld [vmem:[%s7771_s14 + $0x4] ss:$28 sps:$4 sm:$0xff]   ;;  %v6887_v50 = vld [vmem:[%s9438_s1 + $0x18c] ss:$16 sps:$4 sm:$0xff]  }
  0x17   : > { %2175 = vmatpush1.bf16.msra.mxu0 %v6841_v18  ;;  %2627 = vmatpush1.bf16.msra.mxu1 %v6842_v19  ;;  %v6885_v49 = vld [vmem:[%s9438_s1 + $0x184] ss:$16 sps:$4 sm:$0xff]   ;;  %v6889_v51 = vld [vmem:[%s9438_s1 + $0x180] ss:$16 sps:$4 sm:$0xff]   ;;  %v6890_v52 = vld [vmem:[%s9438_s1 + $0x188] ss:$16 sps:$4 sm:$0xff]  }
  0x18   : > { %2176 = vmatprep.subr.bf16.mxu0 %v6843_v20  ;;  %2628 = vmatprep.subr.bf16.mxu1 %v6845_v21  ;;  %v6891_v53 = vld [vmem:[%s9438_s1 + $0x1a4] ss:$16 sps:$4 sm:$0xff]   ;;  %v6893_v54 = vld [vmem:[%s9438_s1 + $0x1ac] ss:$16 sps:$4 sm:$0xff]   ;;  %v6895_v55 = vld [vmem:[%s9438_s1 + $0x1a0] ss:$16 sps:$4 sm:$0xff]  }
  0x19   : > { %2198 = vmatprep.mubr.bf16.mxu0 %v6911_v48  ;;  %2650 = vmatprep.mubr.bf16.mxu1 %v6911_v48  ;;  %v6896_v56 = vld [vmem:[%s9438_s1 + $0x1a8] ss:$16 sps:$4 sm:$0xff]   ;;  %v6897_v57 = vld [vmem:[%s9438_s1 + $0x1c4] ss:$16 sps:$4 sm:$0xff]   ;;  %v6899_v58 = vld [vmem:[%s9438_s1 + $0x1cc] ss:$16 sps:$4 sm:$0xff]  }
  0x1a   : > { %v6901_v59 = vld [vmem:[%s9438_s1 + $0x1c0] ss:$16 sps:$4 sm:$0xff]   ;;  %v6902_v60 = vld [vmem:[%s9438_s1 + $0x1c8] ss:$16 sps:$4 sm:$0xff]   ;;  %v6903_v61 = vld [vmem:[%s9438_s1 + $0x1e4] ss:$16 sps:$4 sm:$0xff]  }
  0x1b   : > { %2177 = vmatpush1.bf16.msra.mxu0 %v6847_v22  ;;  %2629 = vmatpush1.bf16.msra.mxu1 %v6848_v23  ;;  %v6905_v62 = vld [vmem:[%s9438_s1 + $0x1ec] ss:$16 sps:$4 sm:$0xff]   ;;  %v6907_v63 = vld [vmem:[%s9438_s1 + $0x1e0] ss:$16 sps:$4 sm:$0xff]   ;;  %v6908_v0 = vld [vmem:[%s9438_s1 + $0x1e8] ss:$16 sps:$4 sm:$0xff]  }
  0x1c   : > { %2178 = vmatprep.subr.bf16.mxu0 %v6849_v24  ;;  %2630 = vmatprep.subr.bf16.mxu1 %v6851_v25  ;;  %v6914_v1 = vld [vmem:[%s9438_s1 + $0x204] ss:$16 sps:$4 sm:$0xff]   ;;  %v6917_v2 = vld [vmem:[%s9438_s1 + $0x20c] ss:$16 sps:$4 sm:$0xff]   ;;  %v6912_v4 = vld [vmem:[%s9438_s1 + $0x200] ss:$16 sps:$4 sm:$0xff]  }
  0x1d   : > { %v6909_v3 = vld [vmem:[%s7771_s14] ss:$28 sps:$4 sm:$0xff]   ;;  %v6915_v5 = vld [vmem:[%s9438_s1 + $0x208] ss:$16 sps:$4 sm:$0xff]   ;;  %v6920_v6 = vld [vmem:[%s9438_s1 + $0x224] ss:$16 sps:$4 sm:$0xff]  }
  0x1e   : > { %v6923_v7 = vld [vmem:[%s9438_s1 + $0x22c] ss:$16 sps:$4 sm:$0xff]   ;;  %v6918_v9 = vld [vmem:[%s9438_s1 + $0x220] ss:$16 sps:$4 sm:$0xff]   ;;  %v6921_v10 = vld [vmem:[%s9438_s1 + $0x228] ss:$16 sps:$4 sm:$0xff]  }
  0x1f   : > { %2179 = vmatpush1.bf16.msra.mxu0 %v6853_v26  ;;  %2631 = vmatpush1.bf16.msra.mxu1 %v6854_v27  ;;  %v6924_v8 = vld [vmem:[%s7771_s14 + $0x3c] ss:$28 sps:$4 sm:$0xff]   ;;  %v6929_v11 = vld [vmem:[%s9438_s1 + $0x244] ss:$16 sps:$4 sm:$0xff]   ;;  %v6927_v14 = vld [vmem:[%s9438_s1 + $0x240] ss:$16 sps:$4 sm:$0xff]  }
  0x20   : > { %2180 = vmatprep.subr.bf16.mxu0 %v6855_v28  ;;  %2632 = vmatprep.subr.bf16.mxu1 %v6857_v29  ;;  %v6932_v12 = vld [vmem:[%s9438_s1 + $0x24c] ss:$16 sps:$4 sm:$0xff]   ;;  %v6926_v13 = vld [vmem:[%s7771_s14 + $0x38] ss:$28 sps:$4 sm:$0xff]   ;;  %v6933_v19 = vld [vmem:[%s9438_s1 + $0x260] ss:$16 sps:$4 sm:$0xff]  }
  0x21   : > { %v6930_v15 = vld [vmem:[%s9438_s1 + $0x248] ss:$16 sps:$4 sm:$0xff]   ;;  %v6935_v16 = vld [vmem:[%s9438_s1 + $0x264] ss:$16 sps:$4 sm:$0xff]   ;;  %v6938_v17 = vld [vmem:[%s9438_s1 + $0x26c] ss:$16 sps:$4 sm:$0xff]  }
  0x22   : > { %v6939_v18 = vld [vmem:[%s7771_s14 + $0x74] ss:$28 sps:$4 sm:$0xff]   ;;  %v6936_v20 = vld [vmem:[%s9438_s1 + $0x268] ss:$16 sps:$4 sm:$0xff]   ;;  %v6947_v22 = vld [vmem:[%s9438_s1 + $0x28c] ss:$16 sps:$4 sm:$0xff]  }
  0x23   : > { %2181 = vmatpush1.bf16.msra.mxu0 %v6859_v30  ;;  %2633 = vmatpush1.bf16.msra.mxu1 %v6860_v31  ;;  %v6944_v21 = vld [vmem:[%s9438_s1 + $0x284] ss:$16 sps:$4 sm:$0xff]   ;;  %v6941_v23 = vld [vmem:[%s7771_s14 + $0x70] ss:$28 sps:$4 sm:$0xff]   ;;  %v6945_v25 = vld [vmem:[%s9438_s1 + $0x288] ss:$16 sps:$4 sm:$0xff]  }
  0x24   : > { %2182 = vmatprep.subr.bf16.mxu0 %v6861_v32  ;;  %2634 = vmatprep.subr.bf16.mxu1 %v6863_v33  ;;  %v6942_v24 = vld [vmem:[%s9438_s1 + $0x280] ss:$16 sps:$4 sm:$0xff]   ;;  %v6950_v26 = vld [vmem:[%s9438_s1 + $0x2a4] ss:$16 sps:$4 sm:$0xff]   ;;  %v6953_v27 = vld [vmem:[%s9438_s1 + $0x2ac] ss:$16 sps:$4 sm:$0xff]  }
  0x25   : > { %v6954_v28 = vld [vmem:[%s7771_s14 + $0xac] ss:$28 sps:$4 sm:$0xff]   ;;  %v6948_v29 = vld [vmem:[%s9438_s1 + $0x2a0] ss:$16 sps:$4 sm:$0xff]   ;;  %v6959_v31 = vld [vmem:[%s9438_s1 + $0x2c4] ss:$16 sps:$4 sm:$0xff]  }
  0x26   : > { %v6951_v30 = vld [vmem:[%s9438_s1 + $0x2a8] ss:$16 sps:$4 sm:$0xff]   ;;  %v6962_v32 = vld [vmem:[%s9438_s1 + $0x2cc] ss:$16 sps:$4 sm:$0xff]  }
  0x27   : > { %2183 = vmatpush1.bf16.msra.mxu0 %v6865_v34  ;;  %2635 = vmatpush1.bf16.msra.mxu1 %v6866_v35  ;;  %v6956_v33 = vld [vmem:[%s7771_s14 + $0xa8] ss:$28 sps:$4 sm:$0xff]   ;;  %v6957_v34 = vld [vmem:[%s9438_s1 + $0x2c0] ss:$16 sps:$4 sm:$0xff]   ;;  %v6984_v48 = vld [vmem:[%s7771_s14 + $0x11c] ss:$28 sps:$4 sm:$0xff]  }
  0x28   : > { %2184 = vmatprep.subr.bf16.mxu0 %v6867_v36  ;;  %2636 = vmatprep.subr.bf16.mxu1 %v6869_v37  ;;  %v6960_v35 = vld [vmem:[%s9438_s1 + $0x2c8] ss:$16 sps:$4 sm:$0xff]   ;;  %v6965_v36 = vld [vmem:[%s9438_s1 + $0x2e4] ss:$16 sps:$4 sm:$0xff]   ;;  %v6968_v37 = vld [vmem:[%s9438_s1 + $0x2ec] ss:$16 sps:$4 sm:$0xff]  }
  0x2b   : > { %2185 = vmatpush1.bf16.msra.mxu0 %v6871_v38  ;;  %2637 = vmatpush1.bf16.msra.mxu1 %v6872_v39  ;;  %v6969_v38 = vld [vmem:[%s7771_s14 + $0xe4] ss:$28 sps:$4 sm:$0xff]  }
  0x2c   : > { %2186 = vmatprep.subr.bf16.mxu0 %v6873_v40  ;;  %2638 = vmatprep.subr.bf16.mxu1 %v6875_v41  ;;  %v6963_v39 = vld [vmem:[%s9438_s1 + $0x2e0] ss:$16 sps:$4 sm:$0xff]   ;;  %v6966_v40 = vld [vmem:[%s9438_s1 + $0x2e8] ss:$16 sps:$4 sm:$0xff]   ;;  %v6974_v41 = vld [vmem:[%s9438_s1 + $0x304] ss:$16 sps:$4 sm:$0xff]  }
  0x2f   : > { %2187 = vmatpush1.bf16.msra.mxu0 %v6877_v42  ;;  %2639 = vmatpush1.bf16.msra.mxu1 %v6878_v43  ;;  %v6977_v42 = vld [vmem:[%s9438_s1 + $0x30c] ss:$16 sps:$4 sm:$0xff]  }
  0x30   : > { %2188 = vmatprep.subr.bf16.mxu0 %v6879_v44  ;;  %2640 = vmatprep.subr.bf16.mxu1 %v6881_v45  ;;  %v6971_v43 = vld [vmem:[%s7771_s14 + $0xe0] ss:$28 sps:$4 sm:$0xff]   ;;  %v6975_v45 = vld [vmem:[%s9438_s1 + $0x308] ss:$16 sps:$4 sm:$0xff]  }
  0x31   : > { %v6972_v44 = vld [vmem:[%s9438_s1 + $0x300] ss:$16 sps:$4 sm:$0xff]  }
  0x33   : > { %2189 = vmatpush1.bf16.msra.mxu0 %v6883_v46  ;;  %2641 = vmatpush1.bf16.msra.mxu1 %v6884_v47  ;;  %v6980_v46 = vld [vmem:[%s9438_s1 + $0x324] ss:$16 sps:$4 sm:$0xff]   ;;  %v6983_v47 = vld [vmem:[%s9438_s1 + $0x32c] ss:$16 sps:$4 sm:$0xff]  }
  0x34   : > { %2190 = vmatprep.subr.bf16.mxu0 %v6885_v49  ;;  %2642 = vmatprep.subr.bf16.mxu1 %v6887_v50  ;;  %v6978_v49 = vld [vmem:[%s9438_s1 + $0x320] ss:$16 sps:$4 sm:$0xff]   ;;  %v6981_v50 = vld [vmem:[%s9438_s1 + $0x328] ss:$16 sps:$4 sm:$0xff]  }
  0x37   : > { %2191 = vmatpush1.bf16.msra.mxu0 %v6889_v51  ;;  %2643 = vmatpush1.bf16.msra.mxu1 %v6890_v52  ;;  %v6989_v51 = vld [vmem:[%s9438_s1 + $0x344] ss:$16 sps:$4 sm:$0xff]   ;;  %v6992_v52 = vld [vmem:[%s9438_s1 + $0x34c] ss:$16 sps:$4 sm:$0xff]  }
  0x38   : > { %2192 = vmatprep.subr.bf16.mxu0 %v6891_v53  ;;  %2644 = vmatprep.subr.bf16.mxu1 %v6893_v54  ;;  %v6986_v53 = vld [vmem:[%s7771_s14 + $0x118] ss:$28 sps:$4 sm:$0xff]   ;;  %v6987_v54 = vld [vmem:[%s9438_s1 + $0x340] ss:$16 sps:$4 sm:$0xff]  }
  0x3b   : > { %2193 = vmatpush1.bf16.msra.mxu0 %v6895_v55  ;;  %2645 = vmatpush1.bf16.msra.mxu1 %v6896_v56  ;;  %v6990_v55 = vld [vmem:[%s9438_s1 + $0x348] ss:$16 sps:$4 sm:$0xff]   ;;  %v6995_v56 = vld [vmem:[%s9438_s1 + $0x364] ss:$16 sps:$4 sm:$0xff]  }
  0x3c   : > { %2194 = vmatprep.subr.bf16.mxu0 %v6897_v57  ;;  %2646 = vmatprep.subr.bf16.mxu1 %v6899_v58  ;;  %v6998_v57 = vld [vmem:[%s9438_s1 + $0x36c] ss:$16 sps:$4 sm:$0xff]   ;;  %v6999_v58 = vld [vmem:[%s7771_s14 + $0x154] ss:$28 sps:$4 sm:$0xff]  }
  0x3f   : > { %2195 = vmatpush1.bf16.msra.mxu0 %v6901_v59  ;;  %2647 = vmatpush1.bf16.msra.mxu1 %v6902_v60  ;;  %v6993_v59 = vld [vmem:[%s9438_s1 + $0x360] ss:$16 sps:$4 sm:$0xff]   ;;  %v6996_v60 = vld [vmem:[%s9438_s1 + $0x368] ss:$16 sps:$4 sm:$0xff]  }
  0x40   : > { %2196 = vmatprep.subr.bf16.mxu0 %v6903_v61  ;;  %2648 = vmatprep.subr.bf16.mxu1 %v6905_v62  ;;  %v7004_v61 = vld [vmem:[%s9438_s1 + $0x384] ss:$16 sps:$4 sm:$0xff]   ;;  %v7007_v62 = vld [vmem:[%s9438_s1 + $0x38c] ss:$16 sps:$4 sm:$0xff]  }
  0x43   : > { %2197 = vmatpush1.bf16.msra.mxu0 %v6907_v63  ;;  %2649 = vmatpush1.bf16.msra.mxu1 %v6908_v0  ;;  %v7001_v63 = vld [vmem:[%s7771_s14 + $0x150] ss:$28 sps:$4 sm:$0xff]  }
  0x44   : > { %2279 = vmatprep.subr.bf16.mxu0 %v6914_v1  ;;  %2731 = vmatprep.subr.bf16.mxu1 %v6917_v2  ;;  %v7002_v0 = vld [vmem:[%s9438_s1 + $0x380] ss:$16 sps:$4 sm:$0xff]   ;;  %v7005_v1 = vld [vmem:[%s9438_s1 + $0x388] ss:$16 sps:$4 sm:$0xff]   ;;  %v7010_v2 = vld [vmem:[%s9438_s1 + $0x3a4] ss:$16 sps:$4 sm:$0xff]  }
  0x46   : > { %2199 = vmatmul.mubr.bf16.vlgmr.msra.gmra.mrb[0].mxu0 %v6909_v3  ;;  %2651 = vmatmul.mubr.bf16.vlgmr.msra.gmra.mrb[0].mxu1 %v6909_v3  ;;  %v7013_v3 = vld [vmem:[%s9438_s1 + $0x3ac] ss:$16 sps:$4 sm:$0xff]  }
  0x47   : > { %2280 = vmatpush1.bf16.msra.mxu0 %v6912_v4  ;;  %2732 = vmatpush1.bf16.msra.mxu1 %v6915_v5  ;;  %v7014_v4 = vld [vmem:[%s7771_s14 + $0x18c] ss:$28 sps:$4 sm:$0xff]   ;;  %v7008_v5 = vld [vmem:[%s9438_s1 + $0x3a0] ss:$16 sps:$4 sm:$0xff]  }
  0x48   : > { %2281 = vmatprep.subr.bf16.mxu0 %v6920_v6  ;;  %2733 = vmatprep.subr.bf16.mxu1 %v6923_v7  ;;  %v7011_v6 = vld [vmem:[%s9438_s1 + $0x3a8] ss:$16 sps:$4 sm:$0xff]   ;;  %v7019_v7 = vld [vmem:[%s9438_s1 + $0x3c4] ss:$16 sps:$4 sm:$0xff]  }
  0x49   : > { %2208 = vmatprep.mubr.bf16.mxu0 %v6924_v8  ;;  %2660 = vmatprep.mubr.bf16.mxu1 %v6924_v8  ;;  %v7022_v8 = vld [vmem:[%s9438_s1 + $0x3cc] ss:$16 sps:$4 sm:$0xff]  }
  0x4b   : > { %2282 = vmatpush1.bf16.msra.mxu0 %v6918_v9  ;;  %2734 = vmatpush1.bf16.msra.mxu1 %v6921_v10  ;;  %v7016_v9 = vld [vmem:[%s7771_s14 + $0x188] ss:$28 sps:$4 sm:$0xff]   ;;  %v7017_v10 = vld [vmem:[%s9438_s1 + $0x3c0] ss:$16 sps:$4 sm:$0xff]  }
  0x4c   : > { %2283 = vmatprep.subr.bf16.mxu0 %v6929_v11  ;;  %2735 = vmatprep.subr.bf16.mxu1 %v6932_v12  ;;  %v7020_v11 = vld [vmem:[%s9438_s1 + $0x3c8] ss:$16 sps:$4 sm:$0xff]   ;;  %v7025_v12 = vld [vmem:[%s9438_s1 + $0x3e4] ss:$16 sps:$4 sm:$0xff]  }
  0x4e   : > { %2209 = vmatmul.mubr.bf16.gmra.mrb[4].mxu0 %v6926_v13  ;;  %2661 = vmatmul.mubr.bf16.gmra.mrb[4].mxu1 %v6926_v13  ;;  %v7028_v13 = vld [vmem:[%s9438_s1 + $0x3ec] ss:$16 sps:$4 sm:$0xff]  }
  0x4f   : > { %2284 = vmatpush1.bf16.msra.mxu0 %v6927_v14  ;;  %2736 = vmatpush1.bf16.msra.mxu1 %v6930_v15  ;;  %v7031_v14 = vld [vmem:[%s7771_s14 + $0xc] ss:$28 sps:$4 sm:$0xff]   ;;  %v7023_v15 = vld [vmem:[%s9438_s1 + $0x3e0] ss:$16 sps:$4 sm:$0xff]  }
  0x50   : > { %2285 = vmatprep.subr.bf16.mxu0 %v6935_v16  ;;  %2737 = vmatprep.subr.bf16.mxu1 %v6938_v17  ;;  %v7026_v16 = vld [vmem:[%s9438_s1 + $0x3e8] ss:$16 sps:$4 sm:$0xff]   ;;  %v7034_v17 = vld [vmem:[%s9438_s1 + $0x404] ss:$16 sps:$4 sm:$0xff]  }
  0x51   : > { %2218 = vmatprep.mubr.bf16.mxu0 %v6939_v18  ;;  %2670 = vmatprep.mubr.bf16.mxu1 %v6939_v18  ;;  %v7037_v18 = vld [vmem:[%s9438_s1 + $0x40c] ss:$16 sps:$4 sm:$0xff]  }
  0x53   : > { %2286 = vmatpush1.bf16.msra.mxu0 %v6933_v19  ;;  %2738 = vmatpush1.bf16.msra.mxu1 %v6936_v20  ;;  %v7029_v19 = vld [vmem:[%s7771_s14 + $0x8] ss:$28 sps:$4 sm:$0xff]   ;;  %v7032_v20 = vld [vmem:[%s9438_s1 + $0x400] ss:$16 sps:$4 sm:$0xff]  }
  0x54   : > { %2287 = vmatprep.subr.bf16.mxu0 %v6944_v21  ;;  %2739 = vmatprep.subr.bf16.mxu1 %v6947_v22  ;;  %v7035_v21 = vld [vmem:[%s9438_s1 + $0x408] ss:$16 sps:$4 sm:$0xff]   ;;  %v7040_v22 = vld [vmem:[%s9438_s1 + $0x424] ss:$16 sps:$4 sm:$0xff]  }
  0x56   : > { %2219 = vmatmul.mubr.bf16.gmra.mrb[8].mxu0 %v6941_v23  ;;  %2671 = vmatmul.mubr.bf16.gmra.mrb[8].mxu1 %v6941_v23  ;;  %v7043_v23 = vld [vmem:[%s9438_s1 + $0x42c] ss:$16 sps:$4 sm:$0xff]  }
  0x57   : > { %2288 = vmatpush1.bf16.msra.mxu0 %v6942_v24  ;;  %2740 = vmatpush1.bf16.msra.mxu1 %v6945_v25  ;;  %v7044_v24 = vld [vmem:[%s7771_s14 + $0x44] ss:$28 sps:$4 sm:$0xff]  }
  0x58   : > { %2289 = vmatprep.subr.bf16.mxu0 %v6950_v26  ;;  %2741 = vmatprep.subr.bf16.mxu1 %v6953_v27  ;;  %v7038_v25 = vld [vmem:[%s9438_s1 + $0x420] ss:$16 sps:$4 sm:$0xff]   ;;  %v7041_v26 = vld [vmem:[%s9438_s1 + $0x428] ss:$16 sps:$4 sm:$0xff]   ;;  %v7049_v27 = vld [vmem:[%s9438_s1 + $0x444] ss:$16 sps:$4 sm:$0xff]  }
  0x59   : > { %2228 = vmatprep.mubr.bf16.mxu0 %v6954_v28  ;;  %2680 = vmatprep.mubr.bf16.mxu1 %v6954_v28  ;;  %v7052_v28 = vld [vmem:[%s9438_s1 + $0x44c] ss:$16 sps:$4 sm:$0xff]  }
  0x5b   : > { %2290 = vmatpush1.bf16.msra.mxu0 %v6948_v29  ;;  %2742 = vmatpush1.bf16.msra.mxu1 %v6951_v30  ;;  %v7046_v29 = vld [vmem:[%s7771_s14 + $0x40] ss:$28 sps:$4 sm:$0xff]  }
  0x5c   : > { %2291 = vmatprep.subr.bf16.mxu0 %v6959_v31  ;;  %2743 = vmatprep.subr.bf16.mxu1 %v6962_v32  ;;  %v7047_v30 = vld [vmem:[%s9438_s1 + $0x440] ss:$16 sps:$4 sm:$0xff]   ;;  %v7050_v31 = vld [vmem:[%s9438_s1 + $0x448] ss:$16 sps:$4 sm:$0xff]   ;;  %v7055_v32 = vld [vmem:[%s9438_s1 + $0x464] ss:$16 sps:$4 sm:$0xff]  }
  0x5e   : > { %2229 = vmatmul.mubr.bf16.gmra.mrb[12].mxu0 %v6956_v33  ;;  %2681 = vmatmul.mubr.bf16.gmra.mrb[12].mxu1 %v6956_v33  ;;  %v7058_v33 = vld [vmem:[%s9438_s1 + $0x46c] ss:$16 sps:$4 sm:$0xff]  }
  0x5f   : > { %2292 = vmatpush1.bf16.msra.mxu0 %v6957_v34  ;;  %2744 = vmatpush1.bf16.msra.mxu1 %v6960_v35  ;;  %v7059_v34 = vld [vmem:[%s7771_s14 + $0x7c] ss:$28 sps:$4 sm:$0xff]   ;;  %v7053_v35 = vld [vmem:[%s9438_s1 + $0x460] ss:$16 sps:$4 sm:$0xff]  }
  0x60   : > { %2293 = vmatprep.subr.bf16.mxu0 %v6965_v36  ;;  %2745 = vmatprep.subr.bf16.mxu1 %v6968_v37  ;;  %v7056_v36 = vld [vmem:[%s9438_s1 + $0x468] ss:$16 sps:$4 sm:$0xff]   ;;  %v7064_v37 = vld [vmem:[%s9438_s1 + $0x484] ss:$16 sps:$4 sm:$0xff]  }
  0x61   : > { %2238 = vmatprep.mubr.bf16.mxu0 %v6969_v38  ;;  %2690 = vmatprep.mubr.bf16.mxu1 %v6969_v38  ;;  %v7067_v38 = vld [vmem:[%s9438_s1 + $0x48c] ss:$16 sps:$4 sm:$0xff]  }
  0x63   : > { %2294 = vmatpush1.bf16.msra.mxu0 %v6963_v39  ;;  %2746 = vmatpush1.bf16.msra.mxu1 %v6966_v40  ;;  %v7061_v39 = vld [vmem:[%s7771_s14 + $0x78] ss:$28 sps:$4 sm:$0xff]   ;;  %v7062_v40 = vld [vmem:[%s9438_s1 + $0x480] ss:$16 sps:$4 sm:$0xff]  }
  0x64   : > { %2295 = vmatprep.subr.bf16.mxu0 %v6974_v41  ;;  %2747 = vmatprep.subr.bf16.mxu1 %v6977_v42  ;;  %v7065_v41 = vld [vmem:[%s9438_s1 + $0x488] ss:$16 sps:$4 sm:$0xff]   ;;  %v7070_v42 = vld [vmem:[%s9438_s1 + $0x4a4] ss:$16 sps:$4 sm:$0xff]  }
  0x66   : > { %2239 = vmatmul.mubr.bf16.gmra.mrb[16].mxu0 %v6971_v43  ;;  %2691 = vmatmul.mubr.bf16.gmra.mrb[16].mxu1 %v6971_v43  ;;  %v7073_v43 = vld [vmem:[%s9438_s1 + $0x4ac] ss:$16 sps:$4 sm:$0xff]  }
  0x67   : > { %2296 = vmatpush1.bf16.msra.mxu0 %v6972_v44  ;;  %2748 = vmatpush1.bf16.msra.mxu1 %v6975_v45  ;;  %v7074_v44 = vld [vmem:[%s7771_s14 + $0xb4] ss:$28 sps:$4 sm:$0xff]  }
  0x68   : > { %2297 = vmatprep.subr.bf16.mxu0 %v6980_v46  ;;  %2749 = vmatprep.subr.bf16.mxu1 %v6983_v47  ;;  %v7068_v45 = vld [vmem:[%s9438_s1 + $0x4a0] ss:$16 sps:$4 sm:$0xff]   ;;  %v7071_v46 = vld [vmem:[%s9438_s1 + $0x4a8] ss:$16 sps:$4 sm:$0xff]   ;;  %v7079_v47 = vld [vmem:[%s9438_s1 + $0x4c4] ss:$16 sps:$4 sm:$0xff]  }
  0x69   : > { %2248 = vmatprep.mubr.bf16.mxu0 %v6984_v48  ;;  %2700 = vmatprep.mubr.bf16.mxu1 %v6984_v48  ;;  %v7082_v48 = vld [vmem:[%s9438_s1 + $0x4cc] ss:$16 sps:$4 sm:$0xff]  }
  0x6b   : > { %2298 = vmatpush1.bf16.msra.mxu0 %v6978_v49  ;;  %2750 = vmatpush1.bf16.msra.mxu1 %v6981_v50  ;;  %v7076_v49 = vld [vmem:[%s7771_s14 + $0xb0] ss:$28 sps:$4 sm:$0xff]  }
  0x6c   : > { %2299 = vmatprep.subr.bf16.mxu0 %v6989_v51  ;;  %2751 = vmatprep.subr.bf16.mxu1 %v6992_v52  ;;  %v7077_v50 = vld [vmem:[%s9438_s1 + $0x4c0] ss:$16 sps:$4 sm:$0xff]   ;;  %v7080_v51 = vld [vmem:[%s9438_s1 + $0x4c8] ss:$16 sps:$4 sm:$0xff]   ;;  %v7085_v52 = vld [vmem:[%s9438_s1 + $0x4e4] ss:$16 sps:$4 sm:$0xff]  }
  0x6e   : > { %2249 = vmatmul.mubr.bf16.gmra.mrb[20].mxu0 %v6986_v53  ;;  %2701 = vmatmul.mubr.bf16.gmra.mrb[20].mxu1 %v6986_v53  ;;  %v7088_v53 = vld [vmem:[%s9438_s1 + $0x4ec] ss:$16 sps:$4 sm:$0xff]  }
  0x6f   : > { %2300 = vmatpush1.bf16.msra.mxu0 %v6987_v54  ;;  %2752 = vmatpush1.bf16.msra.mxu1 %v6990_v55  ;;  %v7089_v54 = vld [vmem:[%s7771_s14 + $0xec] ss:$28 sps:$4 sm:$0xff]   ;;  %v7083_v55 = vld [vmem:[%s9438_s1 + $0x4e0] ss:$16 sps:$4 sm:$0xff]  }
  0x70   : > { %2301 = vmatprep.subr.bf16.mxu0 %v6995_v56  ;;  %2753 = vmatprep.subr.bf16.mxu1 %v6998_v57  ;;  %v7086_v56 = vld [vmem:[%s9438_s1 + $0x4e8] ss:$16 sps:$4 sm:$0xff]   ;;  %v7094_v57 = vld [vmem:[%s9438_s1 + $0x504] ss:$16 sps:$4 sm:$0xff]  }
  0x71   : > { %2258 = vmatprep.mubr.bf16.mxu0 %v6999_v58  ;;  %2710 = vmatprep.mubr.bf16.mxu1 %v6999_v58  ;;  %v7097_v58 = vld [vmem:[%s9438_s1 + $0x50c] ss:$16 sps:$4 sm:$0xff]  }
  0x73   : > { %2302 = vmatpush1.bf16.msra.mxu0 %v6993_v59  ;;  %2754 = vmatpush1.bf16.msra.mxu1 %v6996_v60  ;;  %v7091_v59 = vld [vmem:[%s7771_s14 + $0xe8] ss:$28 sps:$4 sm:$0xff]   ;;  %v7092_v60 = vld [vmem:[%s9438_s1 + $0x500] ss:$16 sps:$4 sm:$0xff]  }
  0x74   : > { %2303 = vmatprep.subr.bf16.mxu0 %v7004_v61  ;;  %2755 = vmatprep.subr.bf16.mxu1 %v7007_v62  ;;  %v7095_v61 = vld [vmem:[%s9438_s1 + $0x508] ss:$16 sps:$4 sm:$0xff]   ;;  %v7100_v62 = vld [vmem:[%s9438_s1 + $0x524] ss:$16 sps:$4 sm:$0xff]  }
  0x76   : > { %2259 = vmatmul.mubr.bf16.gmra.mrb[24].mxu0 %v7001_v63  ;;  %2711 = vmatmul.mubr.bf16.gmra.mrb[24].mxu1 %v7001_v63  ;;  %v7103_v63 = vld [vmem:[%s9438_s1 + $0x52c] ss:$16 sps:$4 sm:$0xff]  }
  0x77   : > { %2304 = vmatpush1.bf16.msra.mxu0 %v7002_v0  ;;  %2756 = vmatpush1.bf16.msra.mxu1 %v7005_v1  ;;  %v7104_v0 = vld [vmem:[%s7771_s14 + $0x124] ss:$28 sps:$4 sm:$0xff]  }
  0x78   : > { %2305 = vmatprep.subr.bf16.mxu0 %v7010_v2  ;;  %2757 = vmatprep.subr.bf16.mxu1 %v7013_v3  ;;  %v7098_v1 = vld [vmem:[%s9438_s1 + $0x520] ss:$16 sps:$4 sm:$0xff]   ;;  %v7101_v2 = vld [vmem:[%s9438_s1 + $0x528] ss:$16 sps:$4 sm:$0xff]   ;;  %v7109_v3 = vld [vmem:[%s9438_s1 + $0x544] ss:$16 sps:$4 sm:$0xff]  }
  0x79   : > { %2268 = vmatprep.mubr.bf16.mxu0 %v7014_v4  ;;  %2720 = vmatprep.mubr.bf16.mxu1 %v7014_v4  ;;  %v7112_v4 = vld [vmem:[%s9438_s1 + $0x54c] ss:$16 sps:$4 sm:$0xff]  }
  0x7b   : > { %2306 = vmatpush1.bf16.msra.mxu0 %v7008_v5  ;;  %2758 = vmatpush1.bf16.msra.mxu1 %v7011_v6  ;;  %v7106_v5 = vld [vmem:[%s7771_s14 + $0x120] ss:$28 sps:$4 sm:$0xff]  }
  0x7c   : > { %2307 = vmatprep.subr.bf16.mxu0 %v7019_v7  ;;  %2759 = vmatprep.subr.bf16.mxu1 %v7022_v8  ;;  %v7107_v6 = vld [vmem:[%s9438_s1 + $0x540] ss:$16 sps:$4 sm:$0xff]   ;;  %v7110_v7 = vld [vmem:[%s9438_s1 + $0x548] ss:$16 sps:$4 sm:$0xff]   ;;  %v7115_v8 = vld [vmem:[%s9438_s1 + $0x564] ss:$16 sps:$4 sm:$0xff]  }
  0x7e   : > { %2269 = vmatmul.mubr.bf16.gmra.mrb[28].mxu0 %v7016_v9  ;;  %2721 = vmatmul.mubr.bf16.gmra.mrb[28].mxu1 %v7016_v9  ;;  %v7118_v9 = vld [vmem:[%s9438_s1 + $0x56c] ss:$16 sps:$4 sm:$0xff]  }
  0x7f   : > { %2308 = vmatpush1.bf16.msra.mxu0 %v7017_v10  ;;  %2760 = vmatpush1.bf16.msra.mxu1 %v7020_v11  ;;  %v7119_v10 = vld [vmem:[%s7771_s14 + $0x15c] ss:$28 sps:$4 sm:$0xff]   ;;  %v7113_v11 = vld [vmem:[%s9438_s1 + $0x560] ss:$16 sps:$4 sm:$0xff]  }
  0x80   : > { %2309 = vmatprep.subr.bf16.mxu0 %v7025_v12  ;;  %2761 = vmatprep.subr.bf16.mxu1 %v7028_v13  ;;  %v7116_v12 = vld [vmem:[%s9438_s1 + $0x568] ss:$16 sps:$4 sm:$0xff]   ;;  %v7124_v13 = vld [vmem:[%s9438_s1 + $0x584] ss:$16 sps:$4 sm:$0xff]  }
  0x81   : > { %2311 = vmatprep.mubr.bf16.mxu0 %v7031_v14  ;;  %2763 = vmatprep.mubr.bf16.mxu1 %v7031_v14  ;;  %v7127_v14 = vld [vmem:[%s9438_s1 + $0x58c] ss:$16 sps:$4 sm:$0xff]  }
  0x83   : > { %2310 = vmatpush1.bf16.msra.mxu0 %v7023_v15  ;;  %2762 = vmatpush1.bf16.msra.mxu1 %v7026_v16  ;;  %v7121_v15 = vld [vmem:[%s7771_s14 + $0x158] ss:$28 sps:$4 sm:$0xff]   ;;  %v7122_v16 = vld [vmem:[%s9438_s1 + $0x580] ss:$16 sps:$4 sm:$0xff]  }
  0x84   : > { %2392 = vmatprep.subr.bf16.mxu0 %v7034_v17  ;;  %2844 = vmatprep.subr.bf16.mxu1 %v7037_v18  ;;  %v7125_v17 = vld [vmem:[%s9438_s1 + $0x588] ss:$16 sps:$4 sm:$0xff]   ;;  %v7130_v18 = vld [vmem:[%s9438_s1 + $0x5a4] ss:$16 sps:$4 sm:$0xff]  }
  0x86   : > { %2312 = vmatmul.mubr.bf16.vlgmr.msra.gmra.mrb[0].mxu0 %v7029_v19  ;;  %2764 = vmatmul.mubr.bf16.vlgmr.msra.gmra.mrb[0].mxu1 %v7029_v19  ;;  %v7133_v19 = vld [vmem:[%s9438_s1 + $0x5ac] ss:$16 sps:$4 sm:$0xff]  }
  0x87   : > { %2393 = vmatpush1.bf16.msra.mxu0 %v7032_v20  ;;  %2845 = vmatpush1.bf16.msra.mxu1 %v7035_v21  ;;  %v7134_v20 = vld [vmem:[%s7771_s14 + $0x194] ss:$28 sps:$4 sm:$0xff]  }
  0x88   : > { %2394 = vmatprep.subr.bf16.mxu0 %v7040_v22  ;;  %2846 = vmatprep.subr.bf16.mxu1 %v7043_v23  ;;  %v7128_v21 = vld [vmem:[%s9438_s1 + $0x5a0] ss:$16 sps:$4 sm:$0xff]   ;;  %v7131_v22 = vld [vmem:[%s9438_s1 + $0x5a8] ss:$16 sps:$4 sm:$0xff]   ;;  %v7139_v23 = vld [vmem:[%s9438_s1 + $0x5c4] ss:$16 sps:$4 sm:$0xff]  }
  0x89   : > { %2321 = vmatprep.mubr.bf16.mxu0 %v7044_v24  ;;  %2773 = vmatprep.mubr.bf16.mxu1 %v7044_v24  ;;  %v7136_v24 = vld [vmem:[%s7771_s14 + $0x190] ss:$28 sps:$4 sm:$0xff]  }
  0x8b   : > { %2395 = vmatpush1.bf16.msra.mxu0 %v7038_v25  ;;  %2847 = vmatpush1.bf16.msra.mxu1 %v7041_v26  ;;  %v7142_v25 = vld [vmem:[%s9438_s1 + $0x5cc] ss:$16 sps:$4 sm:$0xff]   ;;  %v7137_v26 = vld [vmem:[%s9438_s1 + $0x5c0] ss:$16 sps:$4 sm:$0xff]  }
  0x8c   : > { %2396 = vmatprep.subr.bf16.mxu0 %v7049_v27  ;;  %2848 = vmatprep.subr.bf16.mxu1 %v7052_v28  ;;  %v7140_v27 = vld [vmem:[%s9438_s1 + $0x5c8] ss:$16 sps:$4 sm:$0xff]   ;;  %v7145_v28 = vld [vmem:[%s9438_s1 + $0x5e4] ss:$16 sps:$4 sm:$0xff]  }
  0x8e   : > { %2322 = vmatmul.mubr.bf16.gmra.mrb[4].mxu0 %v7046_v29  ;;  %2774 = vmatmul.mubr.bf16.gmra.mrb[4].mxu1 %v7046_v29  ;;  %v7148_v29 = vld [vmem:[%s9438_s1 + $0x5ec] ss:$16 sps:$4 sm:$0xff]  }
  0x8f   : > { %2397 = vmatpush1.bf16.msra.mxu0 %v7047_v30  ;;  %2849 = vmatpush1.bf16.msra.mxu1 %v7050_v31  ;;  %v7143_v30 = vld [vmem:[%s9438_s1 + $0x5e0] ss:$16 sps:$4 sm:$0xff]  }
  0x90   : > { %2398 = vmatprep.subr.bf16.mxu0 %v7055_v32  ;;  %2850 = vmatprep.subr.bf16.mxu1 %v7058_v33  ;;  %v7151_v31 = vld [vmem:[%s7771_s14 + $0x14] ss:$28 sps:$4 sm:$0xff]   ;;  %v7146_v32 = vld [vmem:[%s9438_s1 + $0x5e8] ss:$16 sps:$4 sm:$0xff]  }
  0x91   : > { %2331 = vmatprep.mubr.bf16.mxu0 %v7059_v34  ;;  %2783 = vmatprep.mubr.bf16.mxu1 %v7059_v34  ;;  %v7154_v33 = vld [vmem:[%s9438_s1 + $0x604] ss:$16 sps:$4 sm:$0xff]   ;;  %v7181_v34 = vld [vmem:[%s9438_s1 + $0x60c] ss:$16 sps:$4 sm:$0xff]  }
  0x93   : > { %2399 = vmatpush1.bf16.msra.mxu0 %v7053_v35  ;;  %2851 = vmatpush1.bf16.msra.mxu1 %v7056_v36  ;;  %v7149_v35 = vld [vmem:[%s7771_s14 + $0x10] ss:$28 sps:$4 sm:$0xff]  }
  0x94   : > { %2400 = vmatprep.subr.bf16.mxu0 %v7064_v37  ;;  %2852 = vmatprep.subr.bf16.mxu1 %v7067_v38  ;;  %v7152_v36 = vld [vmem:[%s9438_s1 + $0x600] ss:$16 sps:$4 sm:$0xff]   ;;  %v7155_v37 = vld [vmem:[%s7771_s14 + $0x4c] ss:$28 sps:$4 sm:$0xff]   ;;  %v7160_v38 = vld [vmem:[%s9438_s1 + $0x624] ss:$16 sps:$4 sm:$0xff]  }
  0x96   : > { %2332 = vmatmul.mubr.bf16.gmra.mrb[8].mxu0 %v7061_v39  ;;  %2784 = vmatmul.mubr.bf16.gmra.mrb[8].mxu1 %v7061_v39  ;;  %v7179_v39 = vld [vmem:[%s9438_s1 + $0x608] ss:$16 sps:$4 sm:$0xff]  }
  0x97   : > { %2401 = vmatpush1.bf16.msra.mxu0 %v7062_v40  ;;  %2853 = vmatpush1.bf16.msra.mxu1 %v7065_v41  ;;  %v7184_v40 = vld [vmem:[%s9438_s1 + $0x62c] ss:$16 sps:$4 sm:$0xff]   ;;  %v7158_v41 = vld [vmem:[%s9438_s1 + $0x620] ss:$16 sps:$4 sm:$0xff]  }
  0x98   : > { %2402 = vmatprep.subr.bf16.mxu0 %v7070_v42  ;;  %2854 = vmatprep.subr.bf16.mxu1 %v7073_v43  ;;  %v7166_v42 = vld [vmem:[%s9438_s1 + $0x644] ss:$16 sps:$4 sm:$0xff]   ;;  %v7182_v43 = vld [vmem:[%s9438_s1 + $0x628] ss:$16 sps:$4 sm:$0xff]  }
  0x99   : > { %2341 = vmatprep.mubr.bf16.mxu0 %v7074_v44  ;;  %2793 = vmatprep.mubr.bf16.mxu1 %v7074_v44  ;;  %v7157_v44 = vld [vmem:[%s7771_s14 + $0x48] ss:$28 sps:$4 sm:$0xff]  }
  0x9b   : > { %2403 = vmatpush1.bf16.msra.mxu0 %v7068_v45  ;;  %2855 = vmatpush1.bf16.msra.mxu1 %v7071_v46  ;;  %v7161_v45 = vld [vmem:[%s7771_s14 + $0x84] ss:$28 sps:$4 sm:$0xff]  }
  0x9c   : > { %2404 = vmatprep.subr.bf16.mxu0 %v7079_v47  ;;  %2856 = vmatprep.subr.bf16.mxu1 %v7082_v48  ;;  %v7164_v46 = vld [vmem:[%s9438_s1 + $0x640] ss:$16 sps:$4 sm:$0xff]   ;;  %v7193_v47 = vld [vmem:[%s9438_s1 + $0x64c] ss:$16 sps:$4 sm:$0xff]   ;;  %v7172_v48 = vld [vmem:[%s9438_s1 + $0x664] ss:$16 sps:$4 sm:$0xff]  }
  0x9e   : > { %2342 = vmatmul.mubr.bf16.gmra.mrb[12].mxu0 %v7076_v49  ;;  %2794 = vmatmul.mubr.bf16.gmra.mrb[12].mxu1 %v7076_v49  ;;  %v7191_v49 = vld [vmem:[%s9438_s1 + $0x648] ss:$16 sps:$4 sm:$0xff]  }
  0x9f   : > { %2405 = vmatpush1.bf16.msra.mxu0 %v7077_v50  ;;  %2857 = vmatpush1.bf16.msra.mxu1 %v7080_v51  ;;  %v7196_v50 = vld [vmem:[%s9438_s1 + $0x66c] ss:$16 sps:$4 sm:$0xff]   ;;  %v7170_v51 = vld [vmem:[%s9438_s1 + $0x660] ss:$16 sps:$4 sm:$0xff]  }
  0xa0   : > { %2406 = vmatprep.subr.bf16.mxu0 %v7085_v52  ;;  %2858 = vmatprep.subr.bf16.mxu1 %v7088_v53  ;;  %v7178_v52 = vld [vmem:[%s9438_s1 + $0x684] ss:$16 sps:$4 sm:$0xff]   ;;  %v7194_v53 = vld [vmem:[%s9438_s1 + $0x668] ss:$16 sps:$4 sm:$0xff]  }
  0xa1   : > { %2351 = vmatprep.mubr.bf16.mxu0 %v7089_v54  ;;  %2803 = vmatprep.mubr.bf16.mxu1 %v7089_v54  ;;  %v7163_v54 = vld [vmem:[%s7771_s14 + $0x80] ss:$28 sps:$4 sm:$0xff]  }
  0xa3   : > { %2407 = vmatpush1.bf16.msra.mxu0 %v7083_v55  ;;  %2859 = vmatpush1.bf16.msra.mxu1 %v7086_v56  ;;  %v7167_v55 = vld [vmem:[%s7771_s14 + $0xbc] ss:$28 sps:$4 sm:$0xff]   ;;  %v7176_v56 = vld [vmem:[%s9438_s1 + $0x680] ss:$16 sps:$4 sm:$0xff]  }
  0xa4   : > { %2408 = vmatprep.subr.bf16.mxu0 %v7094_v57  ;;  %2860 = vmatprep.subr.bf16.mxu1 %v7097_v58  ;;  %v7205_v57 = vld [vmem:[%s9438_s1 + $0x68c] ss:$16 sps:$4 sm:$0xff]   ;;  %v7190_v58 = vld [vmem:[%s9438_s1 + $0x6a4] ss:$16 sps:$4 sm:$0xff]  }
  0xa6   : > { %2352 = vmatmul.mubr.bf16.gmra.mrb[16].mxu0 %v7091_v59  ;;  %2804 = vmatmul.mubr.bf16.gmra.mrb[16].mxu1 %v7091_v59  ;;  %v7203_v59 = vld [vmem:[%s9438_s1 + $0x688] ss:$16 sps:$4 sm:$0xff]  }
  0xa7   : > { %2409 = vmatpush1.bf16.msra.mxu0 %v7092_v60  ;;  %2861 = vmatpush1.bf16.msra.mxu1 %v7095_v61  ;;  %v7208_v60 = vld [vmem:[%s9438_s1 + $0x6ac] ss:$16 sps:$4 sm:$0xff]   ;;  %v7188_v61 = vld [vmem:[%s9438_s1 + $0x6a0] ss:$16 sps:$4 sm:$0xff]  }
  0xa8   : > { %2410 = vmatprep.subr.bf16.mxu0 %v7100_v62  ;;  %2862 = vmatprep.subr.bf16.mxu1 %v7103_v63  ;;  %v7202_v62 = vld [vmem:[%s9438_s1 + $0x6c4] ss:$16 sps:$4 sm:$0xff]   ;;  %v7206_v63 = vld [vmem:[%s9438_s1 + $0x6a8] ss:$16 sps:$4 sm:$0xff]  }
  0xa9   : > { %2361 = vmatprep.mubr.bf16.mxu0 %v7104_v0  ;;  %2813 = vmatprep.mubr.bf16.mxu1 %v7104_v0  ;;  %v7169_v0 = vld [vmem:[%s7771_s14 + $0xb8] ss:$28 sps:$4 sm:$0xff]  }
  0xab   : > { %2411 = vmatpush1.bf16.msra.mxu0 %v7098_v1  ;;  %2863 = vmatpush1.bf16.msra.mxu1 %v7101_v2  ;;  %v7173_v1 = vld [vmem:[%s7771_s14 + $0xf4] ss:$28 sps:$4 sm:$0xff]  }
  0xac   : > { %2412 = vmatprep.subr.bf16.mxu0 %v7109_v3  ;;  %2864 = vmatprep.subr.bf16.mxu1 %v7112_v4  ;;  %v7200_v2 = vld [vmem:[%s9438_s1 + $0x6c0] ss:$16 sps:$4 sm:$0xff]   ;;  %v7217_v3 = vld [vmem:[%s9438_s1 + $0x6cc] ss:$16 sps:$4 sm:$0xff]   ;;  %v7214_v4 = vld [vmem:[%s9438_s1 + $0x6e4] ss:$16 sps:$4 sm:$0xff]  }
  0xae   : > { %2362 = vmatmul.mubr.bf16.gmra.mrb[20].mxu0 %v7106_v5  ;;  %2814 = vmatmul.mubr.bf16.gmra.mrb[20].mxu1 %v7106_v5  ;;  %v7215_v5 = vld [vmem:[%s9438_s1 + $0x6c8] ss:$16 sps:$4 sm:$0xff]  }
  0xaf   : > { %2413 = vmatpush1.bf16.msra.mxu0 %v7107_v6  ;;  %2865 = vmatpush1.bf16.msra.mxu1 %v7110_v7  ;;  %v7220_v6 = vld [vmem:[%s9438_s1 + $0x6ec] ss:$16 sps:$4 sm:$0xff]   ;;  %v7212_v7 = vld [vmem:[%s9438_s1 + $0x6e0] ss:$16 sps:$4 sm:$0xff]  }
  0xb0   : > { %2414 = vmatprep.subr.bf16.mxu0 %v7115_v8  ;;  %2866 = vmatprep.subr.bf16.mxu1 %v7118_v9  ;;  %v7218_v8 = vld [vmem:[%s9438_s1 + $0x6e8] ss:$16 sps:$4 sm:$0xff]   ;;  %v7231_v9 = vld [vmem:[%s9440_s3 + $0x4] ss:$16 sps:$4 sm:$0xff]  }
  0xb1   : > { %2371 = vmatprep.mubr.bf16.mxu0 %v7119_v10  ;;  %2823 = vmatprep.mubr.bf16.mxu1 %v7119_v10  ;;  %v7175_v10 = vld [vmem:[%s7771_s14 + $0xf0] ss:$28 sps:$4 sm:$0xff]  }
  0xb3   : > { %2415 = vmatpush1.bf16.msra.mxu0 %v7113_v11  ;;  %2867 = vmatpush1.bf16.msra.mxu1 %v7116_v12  ;;  %v7185_v11 = vld [vmem:[%s7771_s14 + $0x12c] ss:$28 sps:$4 sm:$0xff]  }
  0xb4   : > { %2416 = vmatprep.subr.bf16.mxu0 %v7124_v13  ;;  %2868 = vmatprep.subr.bf16.mxu1 %v7127_v14  ;;  %v7234_v12 = vld [vmem:[%s9440_s3 + $0xc] ss:$16 sps:$4 sm:$0xff]   ;;  %v7187_v13 = vld [vmem:[%s7771_s14 + $0x128] ss:$28 sps:$4 sm:$0xff]  }
  0xb5   : > { %v7197_v14 = vld [vmem:[%s7771_s14 + $0x164] ss:$28 sps:$4 sm:$0xff]  }
  0xb6   : > { %2372 = vmatmul.mubr.bf16.gmra.mrb[24].mxu0 %v7121_v15  ;;  %2824 = vmatmul.mubr.bf16.gmra.mrb[24].mxu1 %v7121_v15  ;;  %v7199_v15 = vld [vmem:[%s7771_s14 + $0x160] ss:$28 sps:$4 sm:$0xff]  }
  0xb7   : > { %2417 = vmatpush1.bf16.msra.mxu0 %v7122_v16  ;;  %2869 = vmatpush1.bf16.msra.mxu1 %v7125_v17  ;;  %v7209_v16 = vld [vmem:[%s7771_s14 + $0x19c] ss:$28 sps:$4 sm:$0xff]  }
  0xb8   : > { %2418 = vmatprep.subr.bf16.mxu0 %v7130_v18  ;;  %2870 = vmatprep.subr.bf16.mxu1 %v7133_v19  ;;  %v7211_v17 = vld [vmem:[%s7771_s14 + $0x198] ss:$28 sps:$4 sm:$0xff]   ;;  %v7549_v18 = vmov 0  }
  0xb9   : > { %2381 = vmatprep.mubr.bf16.mxu0 %v7134_v20  ;;  %2833 = vmatprep.mubr.bf16.mxu1 %v7134_v20  ;;  %v7221_v19 = vld [vmem:[%s7771_s14 + $0x18] ss:$28 sps:$4 sm:$0xff]   ;;  %v7229_v20 = vld [vmem:[%s9440_s3] ss:$16 sps:$4 sm:$0xff]  }
  0xbb   : > { %2419 = vmatpush1.bf16.msra.mxu0 %v7128_v21  ;;  %2871 = vmatpush1.bf16.msra.mxu1 %v7131_v22  ;;  %v7232_v21 = vld [vmem:[%s9440_s3 + $0x8] ss:$16 sps:$4 sm:$0xff]   ;;  %v7237_v22 = vld [vmem:[%s9440_s3 + $0x24] ss:$16 sps:$4 sm:$0xff]  }
  0xbc   : > { %2420 = vmatprep.subr.bf16.mxu0 %v7139_v23  ;;  %2872 = vmatprep.subr.bf16.mxu1 %v7142_v25  ;;  %v7240_v23 = vld [vmem:[%s9440_s3 + $0x2c] ss:$16 sps:$4 sm:$0xff]   ;;  %v7238_v25 = vld [vmem:[%s9440_s3 + $0x28] ss:$16 sps:$4 sm:$0xff]  }
  0xbe   : > { %2382 = vmatmul.mubr.bf16.gmra.mrb[28].mxu0 %v7136_v24  ;;  %2834 = vmatmul.mubr.bf16.gmra.mrb[28].mxu1 %v7136_v24  ;;  %v7235_v24 = vld [vmem:[%s9440_s3 + $0x20] ss:$16 sps:$4 sm:$0xff]  }
  0xbf   : > { %2421 = vmatpush1.bf16.msra.mxu0 %v7137_v26  ;;  %2873 = vmatpush1.bf16.msra.mxu1 %v7140_v27  ;;  %v7243_v26 = vld [vmem:[%s9440_s3 + $0x44] ss:$16 sps:$4 sm:$0xff]   ;;  %v7246_v27 = vld [vmem:[%s9440_s3 + $0x4c] ss:$16 sps:$4 sm:$0xff]  }
  0xc0   : > { %2422 = vmatprep.subr.bf16.mxu0 %v7145_v28  ;;  %2874 = vmatprep.subr.bf16.mxu1 %v7148_v29  ;;  %v7222_v28 = vld [vmem:[%s7771_s14 + $0x50] ss:$28 sps:$4 sm:$0xff]  }
  0xc1   : > { %2424 = vmatprep.mubr.bf16.mxu0 %v7151_v31  ;;  %2876 = vmatprep.mubr.bf16.mxu1 %v7151_v31  ;;  %v7241_v29 = vld [vmem:[%s9440_s3 + $0x40] ss:$16 sps:$4 sm:$0xff]   ;;  %v7249_v31 = vld [vmem:[%s9440_s3 + $0x64] ss:$16 sps:$4 sm:$0xff]  }
  0xc3   : > { %2423 = vmatpush1.bf16.msra.mxu0 %v7143_v30  ;;  %2875 = vmatpush1.bf16.msra.mxu1 %v7146_v32  ;;  %v7244_v30 = vld [vmem:[%s9440_s3 + $0x48] ss:$16 sps:$4 sm:$0xff]   ;;  %v7252_v32 = vld [vmem:[%s9440_s3 + $0x6c] ss:$16 sps:$4 sm:$0xff]  }
  0xc4   : > { %2505 = vmatprep.subr.bf16.mxu0 %v7154_v33  ;;  %2957 = vmatprep.subr.bf16.mxu1 %v7181_v34  ;;  %v7247_v33 = vld [vmem:[%s9440_s3 + $0x60] ss:$16 sps:$4 sm:$0xff]   ;;  %v7250_v34 = vld [vmem:[%s9440_s3 + $0x68] ss:$16 sps:$4 sm:$0xff]  }
  0xc6   : > { %2425 = vmatmul.mubr.bf16.vlgmr.msra.gmra.mrb[0].mxu0 %v7149_v35  ;;  %2877 = vmatmul.mubr.bf16.vlgmr.msra.gmra.mrb[0].mxu1 %v7149_v35  ;;  %v7255_v35 = vld [vmem:[%s9440_s3 + $0x84] ss:$16 sps:$4 sm:$0xff]  }
  0xc7   : > { %2506 = vmatpush1.bf16.msra.mxu0 %v7152_v36  ;;  %2434 = vmatprep.mubr.bf16.mxu0 %v7155_v37  ;;  %v7258_v36 = vld [vmem:[%s9440_s3 + $0x8c] ss:$16 sps:$4 sm:$0xff]  }
  0xc8   : > { %2886 = vmatprep.mubr.bf16.mxu1 %v7155_v37  ;;  %2507 = vmatprep.subr.bf16.mxu0 %v7160_v38  ;;  %v7223_v37 = vld [vmem:[%s7771_s14 + $0x88] ss:$28 sps:$4 sm:$0xff]   ;;  %v7253_v38 = vld [vmem:[%s9440_s3 + $0x80] ss:$16 sps:$4 sm:$0xff]  }
  0xc9   : > { %2958 = vmatpush1.bf16.msra.mxu1 %v7179_v39  ;;  %v7256_v39 = vld [vmem:[%s9440_s3 + $0x88] ss:$16 sps:$4 sm:$0xff]  }
  0xca   : > { %2959 = vmatprep.subr.bf16.mxu1 %v7184_v40  ;;  %v7261_v40 = vld [vmem:[%s9440_s3 + $0xa4] ss:$16 sps:$4 sm:$0xff]  }
  0xcb   : > { %2508 = vmatpush1.bf16.msra.mxu0 %v7158_v41  ;;  %v7264_v41 = vld [vmem:[%s9440_s3 + $0xac] ss:$16 sps:$4 sm:$0xff]  }
  0xcc   : > { %2509 = vmatprep.subr.bf16.mxu0 %v7166_v42  ;;  %v7259_v42 = vld [vmem:[%s9440_s3 + $0xa0] ss:$16 sps:$4 sm:$0xff]  }
  0xcd   : > { %2960 = vmatpush1.bf16.msra.mxu1 %v7182_v43  ;;  %v7262_v43 = vld [vmem:[%s9440_s3 + $0xa8] ss:$16 sps:$4 sm:$0xff]  }
  0xce   : > { %2435 = vmatmul.mubr.bf16.gmra.mrb[4].mxu0 %v7157_v44  ;;  %2887 = vmatmul.mubr.bf16.gmra.mrb[4].mxu1 %v7157_v44  ;;  %v7267_v44 = vld [vmem:[%s9440_s3 + $0xc4] ss:$16 sps:$4 sm:$0xff]  }
  0xcf   : > { %2444 = vmatprep.mubr.bf16.mxu0 %v7161_v45  ;;  %2896 = vmatprep.mubr.bf16.mxu1 %v7161_v45  ;;  %v7270_v45 = vld [vmem:[%s9440_s3 + $0xcc] ss:$16 sps:$4 sm:$0xff]  }
  0xd0   : > { %2510 = vmatpush1.bf16.msra.mxu0 %v7164_v46  ;;  %2961 = vmatprep.subr.bf16.mxu1 %v7193_v47  ;;  %v7224_v46 = vld [vmem:[%s7771_s14 + $0xc0] ss:$28 sps:$4 sm:$0xff]  }
  0xd1   : > { %2511 = vmatprep.subr.bf16.mxu0 %v7172_v48  ;;  %2962 = vmatpush1.bf16.msra.mxu1 %v7191_v49  ;;  %v7265_v47 = vld [vmem:[%s9440_s3 + $0xc0] ss:$16 sps:$4 sm:$0xff]   ;;  %v7268_v48 = vld [vmem:[%s9440_s3 + $0xc8] ss:$16 sps:$4 sm:$0xff]   ;;  %v7273_v49 = vld [vmem:[%s9440_s3 + $0xe4] ss:$16 sps:$4 sm:$0xff]  }
  0xd2   : > { %2963 = vmatprep.subr.bf16.mxu1 %v7196_v50  ;;  %v7276_v50 = vld [vmem:[%s9440_s3 + $0xec] ss:$16 sps:$4 sm:$0xff]  }
  0xd4   : > { %2512 = vmatpush1.bf16.msra.mxu0 %v7170_v51  ;;  %v7271_v51 = vld [vmem:[%s9440_s3 + $0xe0] ss:$16 sps:$4 sm:$0xff]  }
  0xd5   : > { %2513 = vmatprep.subr.bf16.mxu0 %v7178_v52  ;;  %2964 = vmatpush1.bf16.msra.mxu1 %v7194_v53  ;;  %v7274_v52 = vld [vmem:[%s9440_s3 + $0xe8] ss:$16 sps:$4 sm:$0xff]   ;;  %v7279_v53 = vld [vmem:[%s9440_s3 + $0x104] ss:$16 sps:$4 sm:$0xff]  }
  0xd6   : > { %2445 = vmatmul.mubr.bf16.gmra.mrb[8].mxu0 %v7163_v54  ;;  %2897 = vmatmul.mubr.bf16.gmra.mrb[8].mxu1 %v7163_v54  ;;  %v7282_v54 = vld [vmem:[%s9440_s3 + $0x10c] ss:$16 sps:$4 sm:$0xff]  }
  0xd7   : > { %2454 = vmatprep.mubr.bf16.mxu0 %v7167_v55  ;;  %2906 = vmatprep.mubr.bf16.mxu1 %v7167_v55  ;;  %v7225_v55 = vld [vmem:[%s7771_s14 + $0xf8] ss:$28 sps:$4 sm:$0xff]  }
  0xd8   : > { %2514 = vmatpush1.bf16.msra.mxu0 %v7176_v56  ;;  %2965 = vmatprep.subr.bf16.mxu1 %v7205_v57  ;;  %v7277_v56 = vld [vmem:[%s9440_s3 + $0x100] ss:$16 sps:$4 sm:$0xff]   ;;  %v7280_v57 = vld [vmem:[%s9440_s3 + $0x108] ss:$16 sps:$4 sm:$0xff]  }
  0xd9   : > { %2515 = vmatprep.subr.bf16.mxu0 %v7190_v58  ;;  %2966 = vmatpush1.bf16.msra.mxu1 %v7203_v59  ;;  %v7285_v58 = vld [vmem:[%s9440_s3 + $0x124] ss:$16 sps:$4 sm:$0xff]   ;;  %v7288_v59 = vld [vmem:[%s9440_s3 + $0x12c] ss:$16 sps:$4 sm:$0xff]  }
  0xda   : > { %2967 = vmatprep.subr.bf16.mxu1 %v7208_v60  ;;  %v7283_v60 = vld [vmem:[%s9440_s3 + $0x120] ss:$16 sps:$4 sm:$0xff]  }
  0xdc   : > { %2516 = vmatpush1.bf16.msra.mxu0 %v7188_v61  ;;  %v7286_v61 = vld [vmem:[%s9440_s3 + $0x128] ss:$16 sps:$4 sm:$0xff]  }
  0xdd   : > { %2517 = vmatprep.subr.bf16.mxu0 %v7202_v62  ;;  %2968 = vmatpush1.bf16.msra.mxu1 %v7206_v63  ;;  %v7291_v62 = vld [vmem:[%s9440_s3 + $0x144] ss:$16 sps:$4 sm:$0xff]   ;;  %v7294_v63 = vld [vmem:[%s9440_s3 + $0x14c] ss:$16 sps:$4 sm:$0xff]  }
  0xde   : > { %2455 = vmatmul.mubr.bf16.gmra.mrb[12].mxu0 %v7169_v0  ;;  %2907 = vmatmul.mubr.bf16.gmra.mrb[12].mxu1 %v7169_v0  ;;  %v7226_v0 = vld [vmem:[%s7771_s14 + $0x130] ss:$28 sps:$4 sm:$0xff]  }
  0xdf   : > { %2464 = vmatprep.mubr.bf16.mxu0 %v7173_v1  ;;  %2916 = vmatprep.mubr.bf16.mxu1 %v7173_v1  ;;  %v7289_v1 = vld [vmem:[%s9440_s3 + $0x140] ss:$16 sps:$4 sm:$0xff]  }
  0xe0   : > { %2518 = vmatpush1.bf16.msra.mxu0 %v7200_v2  ;;  %2969 = vmatprep.subr.bf16.mxu1 %v7217_v3  ;;  %v7292_v2 = vld [vmem:[%s9440_s3 + $0x148] ss:$16 sps:$4 sm:$0xff]   ;;  %v7297_v3 = vld [vmem:[%s9440_s3 + $0x164] ss:$16 sps:$4 sm:$0xff]  }
  0xe1   : > { %2519 = vmatprep.subr.bf16.mxu0 %v7214_v4  ;;  %2970 = vmatpush1.bf16.msra.mxu1 %v7215_v5  ;;  %v7300_v4 = vld [vmem:[%s9440_s3 + $0x16c] ss:$16 sps:$4 sm:$0xff]   ;;  %v7295_v5 = vld [vmem:[%s9440_s3 + $0x160] ss:$16 sps:$4 sm:$0xff]  }
  0xe2   : > { %2971 = vmatprep.subr.bf16.mxu1 %v7220_v6  ;;  %v7298_v6 = vld [vmem:[%s9440_s3 + $0x168] ss:$16 sps:$4 sm:$0xff]  }
  0xe4   : > { %2520 = vmatpush1.bf16.msra.mxu0 %v7212_v7  ;;  %v7303_v7 = vld [vmem:[%s9440_s3 + $0x184] ss:$16 sps:$4 sm:$0xff]  }
  0xe5   : > { %2972 = vmatpush1.bf16.msra.mxu1 %v7218_v8  ;;  %3956 = vmatprep.subr.bf16.mxu0 %v7231_v9  ;;  %v7306_v8 = vld [vmem:[%s9440_s3 + $0x18c] ss:$16 sps:$4 sm:$0xff]   ;;  %v7227_v9 = vld [vmem:[%s7771_s14 + $0x168] ss:$28 sps:$4 sm:$0xff]  }
  0xe6   : > { %2465 = vmatmul.mubr.bf16.gmra.mrb[16].mxu0 %v7175_v10  ;;  %2917 = vmatmul.mubr.bf16.gmra.mrb[16].mxu1 %v7175_v10  ;;  %v7301_v10 = vld [vmem:[%s9440_s3 + $0x180] ss:$16 sps:$4 sm:$0xff]  }
  0xe7   : > { %2474 = vmatprep.mubr.bf16.mxu0 %v7185_v11  ;;  %2926 = vmatprep.mubr.bf16.mxu1 %v7185_v11  ;;  %v7304_v11 = vld [vmem:[%s9440_s3 + $0x188] ss:$16 sps:$4 sm:$0xff]  }
  0xe8   : > { %4182 = vmatprep.subr.bf16.mxu1 %v7234_v12  ;;  %v7309_v12 = vld [vmem:[%s9440_s3 + $0x1a4] ss:$16 sps:$4 sm:$0xff]  }
  0xee   : > { %2475 = vmatmul.mubr.bf16.gmra.mrb[20].mxu0 %v7187_v13  ;;  %2927 = vmatmul.mubr.bf16.gmra.mrb[20].mxu1 %v7187_v13  ;;  %v7312_v13 = vld [vmem:[%s9440_s3 + $0x1ac] ss:$16 sps:$4 sm:$0xff]  }
  0xef   : > { %2484 = vmatprep.mubr.bf16.mxu0 %v7197_v14  ;;  %2936 = vmatprep.mubr.bf16.mxu1 %v7197_v14  ;;  %v7307_v14 = vld [vmem:[%s9440_s3 + $0x1a0] ss:$16 sps:$4 sm:$0xff]  }
  0xf6   : > { %2485 = vmatmul.mubr.bf16.gmra.mrb[24].mxu0 %v7199_v15  ;;  %2937 = vmatmul.mubr.bf16.gmra.mrb[24].mxu1 %v7199_v15  ;;  %v7310_v15 = vld [vmem:[%s9440_s3 + $0x1a8] ss:$16 sps:$4 sm:$0xff]  }
  0xf7   : > { %2494 = vmatprep.mubr.bf16.mxu0 %v7209_v16  ;;  %2946 = vmatprep.mubr.bf16.mxu1 %v7209_v16  ;;  %v7228_v16 = vld [vmem:[%s7771_s14 + $0x1a0] ss:$28 sps:$4 sm:$0xff]  }
  0xfe   : > { %2495 = vmatmul.mubr.bf16.gmra.mrb[28].mxu0 %v7211_v17  ;;  %2947 = vmatmul.mubr.bf16.gmra.mrb[28].mxu1 %v7211_v17  ;;  %v7315_v17 = vld [vmem:[%s9440_s3 + $0x1c4] ss:$16 sps:$4 sm:$0xff]  }
  0xff   : > { %2537 = vmatprep.mubr.bf16.mxu0 %v7549_v18  ;;  %2989 = vmatprep.mubr.bf16.mxu1 %v7549_v18 }
 0x106   : > { %2538 = vmatmul.mubr.bf16.vlgmr.msra.gmra.mrb[0].mxu0 %v7221_v19  ;;  %2990 = vmatmul.mubr.bf16.vlgmr.msra.gmra.mrb[0].mxu1 %v7221_v19  ;;  %v7313_v19 = vld [vmem:[%s9440_s3 + $0x1c0] ss:$16 sps:$4 sm:$0xff]  }
 0x107   : > { %2547 = vmatprep.mubr.bf16.mxu0 %v7549_v18  ;;  %2999 = vmatprep.mubr.bf16.mxu1 %v7549_v18 }
 0x108   : > { %3957 = vmatpush1.bf16.msra.mxu0 %v7229_v20  ;;  %4183 = vmatpush1.bf16.msra.mxu1 %v7232_v21  ;;  %v7316_v20 = vld [vmem:[%s9440_s3 + $0x1c8] ss:$16 sps:$4 sm:$0xff]   ;;  %v7321_v21 = vld [vmem:[%s9440_s3 + $0x1e4] ss:$16 sps:$4 sm:$0xff]  }
 0x109   : > { %3958 = vmatprep.subr.bf16.mxu0 %v7237_v22  ;;  %4184 = vmatprep.subr.bf16.mxu1 %v7240_v23  ;;  %v7324_v22 = vld [vmem:[%s9440_s3 + $0x1ec] ss:$16 sps:$4 sm:$0xff]   ;;  %v7319_v23 = vld [vmem:[%s9440_s3 + $0x1e0] ss:$16 sps:$4 sm:$0xff]  }
 0x10c   : > { %3959 = vmatpush1.bf16.msra.mxu0 %v7235_v24  ;;  %4185 = vmatpush1.bf16.msra.mxu1 %v7238_v25  ;;  %v7322_v24 = vld [vmem:[%s9440_s3 + $0x1e8] ss:$16 sps:$4 sm:$0xff]   ;;  %v7327_v25 = vld [vmem:[%s9440_s3 + $0x204] ss:$16 sps:$4 sm:$0xff]  }
 0x10d   : > { %3960 = vmatprep.subr.bf16.mxu0 %v7243_v26  ;;  %4186 = vmatprep.subr.bf16.mxu1 %v7246_v27  ;;  %v7330_v26 = vld [vmem:[%s9440_s3 + $0x20c] ss:$16 sps:$4 sm:$0xff]   ;;  %v738_v27 = vlaneseq }
 0x10e   : > { %2548 = vmatmul.mubr.bf16.gmra.mrb[4].mxu0 %v7222_v28  ;;  %3000 = vmatmul.mubr.bf16.gmra.mrb[4].mxu1 %v7222_v28 }
 0x10f   : > { %2557 = vmatprep.mubr.bf16.mxu0 %v7549_v18  ;;  %3009 = vmatprep.mubr.bf16.mxu1 %v7549_v18  ;;  %v8580_v28 = vshrl.u32 %v738_v27, 7 }
 0x110   : > { %3961 = vmatpush1.bf16.msra.mxu0 %v7241_v29  ;;  %4187 = vmatpush1.bf16.msra.mxu1 %v7244_v30 }
 0x111   : > { %3962 = vmatprep.subr.bf16.mxu0 %v7249_v31  ;;  %4188 = vmatprep.subr.bf16.mxu1 %v7252_v32  ;;  %v8583_v29 = vsub.s32 0, %v8580_v28  ;;  %v748_v30 = vsub.s32 2, %v8580_v28  ;;  %v736_v31 = vld [vmem:[%s9439_s2] sm:$0xf]  ;;  %v8590_v32 = vsub.s32 1, %v8580_v28 }
 0x114   : > { %3963 = vmatpush1.bf16.msra.mxu0 %v7247_v33  ;;  %4189 = vmatpush1.bf16.msra.mxu1 %v7250_v34  ;;  %v752_v33 = vsub.s32 3, %v8580_v28  ;;  %v8594_v34 = vrot.slane %v736_v31, %v8583_v29  ;;  %v7517_v28 = vld [vmem:[%s9444_s7 + $0x40] sm:$0xff]  }
 0x115   : > { %3964 = vmatprep.subr.bf16.mxu0 %v7255_v35  ;;  %4190 = vmatprep.subr.bf16.mxu1 %v7258_v36  ;;  %v8598_v35 = vrot.slane %v736_v31, %v748_v30  ;;  %v8601_v36 = vrot.slane %v736_v31, %v8590_v32 }
 0x116   : > { %2558 = vmatmul.mubr.bf16.gmra.mrb[8].mxu0 %v7223_v37  ;;  %3010 = vmatmul.mubr.bf16.gmra.mrb[8].mxu1 %v7223_v37  ;;  %v8605_v37 = vrot.slane %v736_v31, %v752_v33 }
 0x117   : > { %2567 = vmatprep.mubr.bf16.mxu0 %v7549_v18  ;;  %3019 = vmatprep.mubr.bf16.mxu1 %v7549_v18 }
 0x118   : > { %3965 = vmatpush1.bf16.msra.mxu0 %v7253_v38  ;;  %4191 = vmatpush1.bf16.msra.mxu1 %v7256_v39 }
 0x119   : > { %3966 = vmatprep.subr.bf16.mxu0 %v7261_v40  ;;  %4192 = vmatprep.subr.bf16.mxu1 %v7264_v41 }
 0x11c   : > { %3967 = vmatpush1.bf16.msra.mxu0 %v7259_v42  ;;  %4193 = vmatpush1.bf16.msra.mxu1 %v7262_v43 }
 0x11d   : > { %3968 = vmatprep.subr.bf16.mxu0 %v7267_v44  ;;  %4194 = vmatprep.subr.bf16.mxu1 %v7270_v45 }
 0x11e   : > { %2568 = vmatmul.mubr.bf16.gmra.mrb[12].mxu0 %v7224_v46  ;;  %3020 = vmatmul.mubr.bf16.gmra.mrb[12].mxu1 %v7224_v46 }
 0x11f   : > { %2577 = vmatprep.mubr.bf16.mxu0 %v7549_v18  ;;  %3029 = vmatprep.mubr.bf16.mxu1 %v7549_v18 }
 0x120   : > { %3969 = vmatpush1.bf16.msra.mxu0 %v7265_v47  ;;  %4195 = vmatpush1.bf16.msra.mxu1 %v7268_v48 }
 0x121   : > { %3970 = vmatprep.subr.bf16.mxu0 %v7273_v49  ;;  %4196 = vmatprep.subr.bf16.mxu1 %v7276_v50 }
 0x124   : > { %3971 = vmatpush1.bf16.msra.mxu0 %v7271_v51  ;;  %4197 = vmatpush1.bf16.msra.mxu1 %v7274_v52 }
 0x125   : > { %3972 = vmatprep.subr.bf16.mxu0 %v7279_v53  ;;  %4198 = vmatprep.subr.bf16.mxu1 %v7282_v54 }
 0x126   : > { %2578 = vmatmul.mubr.bf16.gmra.mrb[16].mxu0 %v7225_v55  ;;  %3030 = vmatmul.mubr.bf16.gmra.mrb[16].mxu1 %v7225_v55 }
 0x127   : > { %2587 = vmatprep.mubr.bf16.mxu0 %v7549_v18  ;;  %3039 = vmatprep.mubr.bf16.mxu1 %v7549_v18 }
 0x128   : > { %3973 = vmatpush1.bf16.msra.mxu0 %v7277_v56  ;;  %4199 = vmatpush1.bf16.msra.mxu1 %v7280_v57 }
 0x129   : > { %3974 = vmatprep.subr.bf16.mxu0 %v7285_v58  ;;  %4200 = vmatprep.subr.bf16.mxu1 %v7288_v59 }
 0x12c   : > { %3975 = vmatpush1.bf16.msra.mxu0 %v7283_v60  ;;  %4201 = vmatpush1.bf16.msra.mxu1 %v7286_v61 }
 0x12d   : > { %3976 = vmatprep.subr.bf16.mxu0 %v7291_v62  ;;  %4202 = vmatprep.subr.bf16.mxu1 %v7294_v63 }
 0x12e   : > { %2588 = vmatmul.mubr.bf16.gmra.mrb[20].mxu0 %v7226_v0  ;;  %3040 = vmatmul.mubr.bf16.gmra.mrb[20].mxu1 %v7226_v0 }
 0x12f   : > { %2597 = vmatprep.mubr.bf16.mxu0 %v7549_v18  ;;  %3049 = vmatprep.mubr.bf16.mxu1 %v7549_v18 }
 0x130   : > { %3977 = vmatpush1.bf16.msra.mxu0 %v7289_v1  ;;  %4203 = vmatpush1.bf16.msra.mxu1 %v7292_v2 }
 0x131   : > { %3978 = vmatprep.subr.bf16.mxu0 %v7297_v3  ;;  %4204 = vmatprep.subr.bf16.mxu1 %v7300_v4  ;;  %v7325_v4 = vld [vmem:[%s9440_s3 + $0x200] ss:$16 sps:$4 sm:$0xff]  }
 0x134   : > { %3979 = vmatpush1.bf16.msra.mxu0 %v7295_v5  ;;  %4205 = vmatpush1.bf16.msra.mxu1 %v7298_v6  ;;  %v7328_v5 = vld [vmem:[%s9440_s3 + $0x208] ss:$16 sps:$4 sm:$0xff]  }
 0x135   : > { %3980 = vmatprep.subr.bf16.mxu0 %v7303_v7  ;;  %4206 = vmatprep.subr.bf16.mxu1 %v7306_v8 }
 0x136   : > { %2598 = vmatmul.mubr.bf16.gmra.mrb[24].mxu0 %v7227_v9  ;;  %3050 = vmatmul.mubr.bf16.gmra.mrb[24].mxu1 %v7227_v9 }
 0x137   : > { %2607 = vmatprep.mubr.bf16.mxu0 %v7549_v18  ;;  %3059 = vmatprep.mubr.bf16.mxu1 %v7549_v18  ;;  %v7318_v18 = vld [vmem:[%s9440_s3 + $0x1cc] ss:$16 sps:$4 sm:$0xff]  }
 0x138   : > { %3981 = vmatpush1.bf16.msra.mxu0 %v7301_v10  ;;  %4207 = vmatpush1.bf16.msra.mxu1 %v7304_v11  ;;  %v7333_v10 = vld [vmem:[%s9440_s3 + $0x224] ss:$16 sps:$4 sm:$0xff]   ;;  %v7336_v11 = vld [vmem:[%s9440_s3 + $0x22c] ss:$16 sps:$4 sm:$0xff]  }
 0x139   : > { %3982 = vmatprep.subr.bf16.mxu0 %v7309_v12  ;;  %4208 = vmatprep.subr.bf16.mxu1 %v7312_v13 }
 0x13c   : > { %3983 = vmatpush1.bf16.msra.mxu0 %v7307_v14  ;;  %4209 = vmatpush1.bf16.msra.mxu1 %v7310_v15 }
 0x13d   : > { %3984 = vmatprep.subr.bf16.mxu0 %v7315_v17  ;;  %4210 = vmatprep.subr.bf16.mxu1 %v7318_v18 }
 0x13e   : > { %2608 = vmatmul.mubr.bf16.gmra.mrb[28].mxu0 %v7228_v16  ;;  %3060 = vmatmul.mubr.bf16.gmra.mrb[28].mxu1 %v7228_v16 }
 0x140   : > { %3985 = vmatpush1.bf16.msra.mxu0 %v7313_v19  ;;  %4211 = vmatpush1.bf16.msra.mxu1 %v7316_v20 }
 0x141   : > { %3986 = vmatprep.subr.bf16.mxu0 %v7321_v21  ;;  %4212 = vmatprep.subr.bf16.mxu1 %v7324_v22  ;;  %v7331_v22 = vld [vmem:[%s9440_s3 + $0x220] ss:$16 sps:$4 sm:$0xff]  }
 0x144   : > { %3987 = vmatpush1.bf16.msra.mxu0 %v7319_v23  ;;  %4213 = vmatpush1.bf16.msra.mxu1 %v7322_v24  ;;  %v7334_v23 = vld [vmem:[%s9440_s3 + $0x228] ss:$16 sps:$4 sm:$0xff]   ;;  %v7339_v24 = vld [vmem:[%s9440_s3 + $0x244] ss:$16 sps:$4 sm:$0xff]  }
 0x145   : > { %4069 = vmatprep.subr.bf16.mxu0 %v7327_v25  ;;  %4295 = vmatprep.subr.bf16.mxu1 %v7330_v26 }
 0x1d9   : > { %v2539_v38 = vpop.f32.mrb[0].mxu0  ;;  %v2991_v39 = vpop.f32.mrb[0].mxu1 }
 0x1da   : > { %v6355_v40 = vadd.f32 %v2539_v38, %v8594_v34  ;;  %v6387_v41 = vadd.f32 %v2991_v39, %v8598_v35  ;;  %v2541_v42 = vpop.f32.mrb[1].mxu0  ;;  %v2993_v43 = vpop.f32.mrb[1].mxu1  ;;  %v7342_v38 = vld [vmem:[%s9440_s3 + $0x24c] ss:$16 sps:$4 sm:$0xff]  }
 0x1db   : > { %v6356_v44 = vadd.f32 %v2541_v42, %v8601_v36  ;;  %v6388_v45 = vadd.f32 %v2993_v43, %v8605_v37  ;;  %v2543_v46 = vpop.f32.mrb[2].mxu0  ;;  %v2995_v47 = vpop.f32.mrb[2].mxu1 }
 0x1dc   : > { %v6357_v48 = vadd.f32 %v2543_v46, %v8594_v34  ;;  %v6389_v49 = vadd.f32 %v2995_v47, %v8598_v35  ;;  %v2545_v50 = vpop.f32.mrb[3].mxu0  ;;  %v2997_v51 = vpop.f32.mrb[3].mxu1  ;;  %v3070_v54 = vmax.f32 %v6355_v40, 0.0  ;;  %v3072_v55 = vmax.f32 %v6387_v41, 0.0 }
 0x1dd   : > { %v6358_v52 = vadd.f32 %v2545_v50, %v8601_v36  ;;  %v6390_v53 = vadd.f32 %v2997_v51, %v8605_v37  ;;  %v3071_v58 = vmax.f32 %v6356_v44, 0.0  ;;  %v3073_v59 = vmax.f32 %v6388_v45, 0.0  ;;  %v7340_v50 = vld [vmem:[%s9440_s3 + $0x248] ss:$16 sps:$4 sm:$0xff]  }
 0x1de   : > { %v3074_v56 = vmax.f32 %v6357_v48, 0.0  ;;  %v3076_v57 = vmax.f32 %v6389_v49, 0.0  ;;  %v7337_v49 = vld [vmem:[%s9440_s3 + $0x240] ss:$16 sps:$4 sm:$0xff]  }
 0x1df   : > { %v3075_v60 = vmax.f32 %v6358_v52, 0.0  ;;  %v3077_v61 = vmax.f32 %v6390_v53, 0.0 }
 0x1e0   : > { %v3134_v62 = vpack.c.bf16 %v3074_v56, %v3070_v54  ;;  %v8615_v63 = vpack.c.bf16 %v3076_v57, %v3072_v55  ;;  %v7345_v55 = vld [vmem:[%s9440_s3 + $0x264] ss:$16 sps:$4 sm:$0xff]   ;;  %v7348_v56 = vld [vmem:[%s9440_s3 + $0x26c] ss:$16 sps:$4 sm:$0xff]  }
 0x1e1   : > { %v3135_v0 = vpack.c.bf16 %v3075_v60, %v3071_v58  ;;  %v8617_v1 = vpack.c.bf16 %v3077_v61, %v3073_v59  ;;  %v2549_v2 = vpop.f32.mrb[4].mxu0  ;;  %v3001_v3 = vpop.f32.mrb[4].mxu1 }
 0x1e2   : > { %v6359_v6 = vadd.f32 %v2549_v2, %v8594_v34  ;;  %v6391_v7 = vadd.f32 %v3001_v3, %v8598_v35  ;;  %v2551_v8 = vpop.f32.mrb[5].mxu0  ;;  %v3003_v9 = vpop.f32.mrb[5].mxu1 }
 0x1e3   : > { %v6360_v12 = vadd.f32 %v2551_v8, %v8601_v36  ;;  %v6392_v13 = vadd.f32 %v3003_v9, %v8605_v37  ;;  %v2553_v14 = vpop.f32.mrb[6].mxu0  ;;  %v3005_v15 = vpop.f32.mrb[6].mxu1  ;;  %3988 = vmatprep.mubr.bf16.mxu0 %v3135_v0  ;;  %4214 = vmatprep.mubr.bf16.mxu1 %v3135_v0 }
 0x1e4   : > { %v6361_v16 = vadd.f32 %v2553_v14, %v8594_v34  ;;  %v6393_v17 = vadd.f32 %v3005_v15, %v8598_v35  ;;  %v2555_v18 = vpop.f32.mrb[7].mxu0  ;;  %v3007_v19 = vpop.f32.mrb[7].mxu1  ;;  %3989 = vmatmul.mubr.bf16.vlgmr.msra.gmra.mrb[32].mxu0 %v3134_v62  ;;  %4215 = vmatmul.mubr.bf16.vlgmr.msra.gmra.mrb[32].mxu1 %v3134_v62  ;;  %v3078_v25 = vmax.f32 %v6359_v6, 0.0  ;;  %v3080_v26 = vmax.f32 %v6391_v7, 0.0  ;;  %v7346_v6 = vld [vmem:[%s9440_s3 + $0x268] ss:$16 sps:$4 sm:$0xff]  }
 0x1e5   : > { %v6362_v20 = vadd.f32 %v2555_v18, %v8601_v36  ;;  %v6394_v21 = vadd.f32 %v3007_v19, %v8605_v37  ;;  %4070 = vmatpush1.bf16.msra.mxu0 %v7325_v4  ;;  %4296 = vmatpush1.bf16.msra.mxu1 %v7328_v5  ;;  %v3079_v39 = vmax.f32 %v6360_v12, 0.0  ;;  %v3081_v40 = vmax.f32 %v6392_v13, 0.0  ;;  %v7343_v5 = vld [vmem:[%s9440_s3 + $0x260] ss:$16 sps:$4 sm:$0xff]   ;;  %v7351_v7 = vld [vmem:[%s9440_s3 + $0x284] ss:$16 sps:$4 sm:$0xff]  }
 0x1e6   : > { %v3082_v27 = vmax.f32 %v6361_v16, 0.0  ;;  %v3084_v31 = vmax.f32 %v6393_v17, 0.0  ;;  %4071 = vmatprep.subr.bf16.mxu0 %v7333_v10  ;;  %4297 = vmatprep.subr.bf16.mxu1 %v7336_v11  ;;  %v7354_v12 = vld [vmem:[%s9440_s3 + $0x28c] ss:$16 sps:$4 sm:$0xff]  }
 0x1e7   : > { %v3083_v41 = vmax.f32 %v6362_v20, 0.0  ;;  %v3085_v42 = vmax.f32 %v6394_v21, 0.0 }
 0x1e8   : > { %v3138_v43 = vpack.c.bf16 %v3082_v27, %v3078_v25  ;;  %v8651_v44 = vpack.c.bf16 %v3084_v31, %v3080_v26 }
 0x1e9   : > { %v3139_v45 = vpack.c.bf16 %v3083_v41, %v3079_v39  ;;  %v8653_v46 = vpack.c.bf16 %v3085_v42, %v3081_v40  ;;  %v2559_v47 = vpop.f32.mrb[8].mxu0  ;;  %v3011_v48 = vpop.f32.mrb[8].mxu1  ;;  %4072 = vmatpush1.bf16.msra.mxu0 %v7331_v22  ;;  %4298 = vmatpush1.bf16.msra.mxu1 %v7334_v23  ;;  %v7349_v23 = vld [vmem:[%s9440_s3 + $0x280] ss:$16 sps:$4 sm:$0xff]   ;;  %v7360_v39 = vld [vmem:[%s9440_s3 + $0x2ac] ss:$16 sps:$4 sm:$0xff]  }
 0x1ea   : > { %v6363_v51 = vadd.f32 %v2559_v47, %v8594_v34  ;;  %v6395_v52 = vadd.f32 %v3011_v48, %v8598_v35  ;;  %v2561_v53 = vpop.f32.mrb[9].mxu0  ;;  %v3013_v54 = vpop.f32.mrb[9].mxu1  ;;  %4073 = vmatprep.subr.bf16.mxu0 %v7339_v24  ;;  %4299 = vmatprep.subr.bf16.mxu1 %v7342_v38  ;;  %v7352_v24 = vld [vmem:[%s9440_s3 + $0x288] ss:$16 sps:$4 sm:$0xff]   ;;  %v7357_v38 = vld [vmem:[%s9440_s3 + $0x2a4] ss:$16 sps:$4 sm:$0xff]  }
 0x1eb   : > { %v6364_v57 = vadd.f32 %v2561_v53, %v8601_v36  ;;  %v6396_v58 = vadd.f32 %v3013_v54, %v8605_v37  ;;  %v2563_v59 = vpop.f32.mrb[10].mxu0  ;;  %v3015_v60 = vpop.f32.mrb[10].mxu1  ;;  %3998 = vmatprep.mubr.bf16.mxu0 %v3139_v45  ;;  %4224 = vmatprep.mubr.bf16.mxu1 %v3139_v45  ;;  %v7358_v53 = vld [vmem:[%s9440_s3 + $0x2a8] ss:$16 sps:$4 sm:$0xff]   ;;  %v7363_v54 = vld [vmem:[%s9440_s3 + $0x2c4] ss:$16 sps:$4 sm:$0xff]  }
 0x1ec   : > { %v6365_v61 = vadd.f32 %v2563_v59, %v8594_v34  ;;  %v6397_v62 = vadd.f32 %v3015_v60, %v8598_v35  ;;  %v2565_v0 = vpop.f32.mrb[11].mxu0  ;;  %v3017_v2 = vpop.f32.mrb[11].mxu1  ;;  %3999 = vmatmul.mubr.bf16.gmra.mrb[36].mxu0 %v3138_v43  ;;  %4225 = vmatmul.mubr.bf16.gmra.mrb[36].mxu1 %v3138_v43  ;;  %v3086_v8 = vmax.f32 %v6363_v51, 0.0  ;;  %v3088_v9 = vmax.f32 %v6395_v52, 0.0  ;;  %v7355_v52 = vld [vmem:[%s9440_s3 + $0x2a0] ss:$16 sps:$4 sm:$0xff]  }
 0x1ed   : > { %v6366_v3 = vadd.f32 %v2565_v0, %v8601_v36  ;;  %v6398_v4 = vadd.f32 %v3017_v2, %v8605_v37  ;;  %4074 = vmatpush1.bf16.msra.mxu0 %v7337_v49  ;;  %4300 = vmatpush1.bf16.msra.mxu1 %v7340_v50  ;;  %v3087_v13 = vmax.f32 %v6364_v57, 0.0  ;;  %v3089_v14 = vmax.f32 %v6396_v58, 0.0  ;;  %v7366_v59 = vld [vmem:[%s9440_s3 + $0x2cc] ss:$16 sps:$4 sm:$0xff]  }
 0x1ee   : > { %v3090_v10 = vmax.f32 %v6365_v61, 0.0  ;;  %v3092_v11 = vmax.f32 %v6397_v62, 0.0  ;;  %4075 = vmatprep.subr.bf16.mxu0 %v7345_v55  ;;  %4301 = vmatprep.subr.bf16.mxu1 %v7348_v56 }
 0x1ef   : > { %v3091_v15 = vmax.f32 %v6366_v3, 0.0  ;;  %v3093_v16 = vmax.f32 %v6398_v4, 0.0 }
 0x1f0   : > { %v3142_v17 = vpack.c.bf16 %v3090_v10, %v3086_v8  ;;  %v8687_v18 = vpack.c.bf16 %v3092_v11, %v3088_v9  ;;  %v7361_v8 = vld [vmem:[%s9440_s3 + $0x2c0] ss:$16 sps:$4 sm:$0xff]   ;;  %v7364_v9 = vld [vmem:[%s9440_s3 + $0x2c8] ss:$16 sps:$4 sm:$0xff]  }
 0x1f1   : > { %v3143_v19 = vpack.c.bf16 %v3091_v15, %v3087_v13  ;;  %v8689_v20 = vpack.c.bf16 %v3093_v16, %v3089_v14  ;;  %v2569_v21 = vpop.f32.mrb[12].mxu0  ;;  %v3021_v22 = vpop.f32.mrb[12].mxu1  ;;  %4076 = vmatpush1.bf16.msra.mxu0 %v7343_v5  ;;  %4302 = vmatpush1.bf16.msra.mxu1 %v7346_v6  ;;  %v7369_v14 = vld [vmem:[%s9440_s3 + $0x2e4] ss:$16 sps:$4 sm:$0xff]   ;;  %v7372_v15 = vld [vmem:[%s9440_s3 + $0x2ec] ss:$16 sps:$4 sm:$0xff]  }
 0x1f2   : > { %v6367_v25 = vadd.f32 %v2569_v21, %v8594_v34  ;;  %v6399_v26 = vadd.f32 %v3021_v22, %v8598_v35  ;;  %v2571_v27 = vpop.f32.mrb[13].mxu0  ;;  %v3023_v31 = vpop.f32.mrb[13].mxu1  ;;  %4077 = vmatprep.subr.bf16.mxu0 %v7351_v7  ;;  %4303 = vmatprep.subr.bf16.mxu1 %v7354_v12 }
 0x1f3   : > { %v6368_v40 = vadd.f32 %v2571_v27, %v8601_v36  ;;  %v6400_v41 = vadd.f32 %v3023_v31, %v8605_v37  ;;  %v2573_v42 = vpop.f32.mrb[14].mxu0  ;;  %v3025_v43 = vpop.f32.mrb[14].mxu1  ;;  %4008 = vmatprep.mubr.bf16.mxu0 %v3143_v19  ;;  %4234 = vmatprep.mubr.bf16.mxu1 %v3143_v19  ;;  %v7367_v31 = vld [vmem:[%s9440_s3 + $0x2e0] ss:$16 sps:$4 sm:$0xff]  }
 0x1f4   : > { %v6369_v45 = vadd.f32 %v2573_v42, %v8594_v34  ;;  %v6401_v47 = vadd.f32 %v3025_v43, %v8598_v35  ;;  %v2575_v48 = vpop.f32.mrb[15].mxu0  ;;  %v3027_v49 = vpop.f32.mrb[15].mxu1  ;;  %4009 = vmatmul.mubr.bf16.gmra.mrb[40].mxu0 %v3142_v17  ;;  %4235 = vmatmul.mubr.bf16.gmra.mrb[40].mxu1 %v3142_v17  ;;  %v3094_v55 = vmax.f32 %v6367_v25, 0.0  ;;  %v3096_v56 = vmax.f32 %v6399_v26, 0.0 }
 0x1f5   : > { %v6370_v50 = vadd.f32 %v2575_v48, %v8601_v36  ;;  %v6402_v51 = vadd.f32 %v3027_v49, %v8605_v37  ;;  %4078 = vmatpush1.bf16.msra.mxu0 %v7349_v23  ;;  %4304 = vmatpush1.bf16.msra.mxu1 %v7352_v24  ;;  %v3095_v60 = vmax.f32 %v6368_v40, 0.0  ;;  %v3097_v61 = vmax.f32 %v6400_v41, 0.0 }
 0x1f6   : > { %v3098_v57 = vmax.f32 %v6369_v45, 0.0  ;;  %v3100_v58 = vmax.f32 %v6401_v47, 0.0  ;;  %4079 = vmatprep.subr.bf16.mxu0 %v7357_v38  ;;  %4305 = vmatprep.subr.bf16.mxu1 %v7360_v39  ;;  %v7370_v38 = vld [vmem:[%s9440_s3 + $0x2e8] ss:$16 sps:$4 sm:$0xff]   ;;  %v7375_v39 = vld [vmem:[%s9440_s3 + $0x304] ss:$16 sps:$4 sm:$0xff]  }
 0x1f7   : > { %v3099_v62 = vmax.f32 %v6370_v50, 0.0  ;;  %v3101_v0 = vmax.f32 %v6402_v51, 0.0  ;;  %v7378_v45 = vld [vmem:[%s9440_s3 + $0x30c] ss:$16 sps:$4 sm:$0xff]  }
 0x1f8   : > { %v3146_v2 = vpack.c.bf16 %v3098_v57, %v3094_v55  ;;  %v8723_v3 = vpack.c.bf16 %v3100_v58, %v3096_v56  ;;  %v7373_v57 = vld [vmem:[%s9440_s3 + $0x300] ss:$16 sps:$4 sm:$0xff]   ;;  %v7376_v58 = vld [vmem:[%s9440_s3 + $0x308] ss:$16 sps:$4 sm:$0xff]  }
 0x1f9   : > { %v3147_v4 = vpack.c.bf16 %v3099_v62, %v3095_v60  ;;  %v8725_v5 = vpack.c.bf16 %v3101_v0, %v3097_v61  ;;  %v2579_v6 = vpop.f32.mrb[16].mxu0  ;;  %v3031_v7 = vpop.f32.mrb[16].mxu1  ;;  %4080 = vmatpush1.bf16.msra.mxu0 %v7355_v52  ;;  %4306 = vmatpush1.bf16.msra.mxu1 %v7358_v53  ;;  %v7381_v0 = vld [vmem:[%s9440_s3 + $0x324] ss:$16 sps:$4 sm:$0xff]  }
 0x1fa   : > { %v6371_v10 = vadd.f32 %v2579_v6, %v8594_v34  ;;  %v6403_v11 = vadd.f32 %v3031_v7, %v8598_v35  ;;  %v2581_v12 = vpop.f32.mrb[17].mxu0  ;;  %v3033_v13 = vpop.f32.mrb[17].mxu1  ;;  %4081 = vmatprep.subr.bf16.mxu0 %v7363_v54  ;;  %4307 = vmatprep.subr.bf16.mxu1 %v7366_v59 }
 0x1fb   : > { %v6372_v16 = vadd.f32 %v2581_v12, %v8601_v36  ;;  %v6404_v17 = vadd.f32 %v3033_v13, %v8605_v37  ;;  %v2583_v19 = vpop.f32.mrb[18].mxu0  ;;  %v3035_v21 = vpop.f32.mrb[18].mxu1  ;;  %4018 = vmatprep.mubr.bf16.mxu0 %v3147_v4  ;;  %4244 = vmatprep.mubr.bf16.mxu1 %v3147_v4 }
 0x1fc   : > { %v6373_v22 = vadd.f32 %v2583_v19, %v8594_v34  ;;  %v6405_v23 = vadd.f32 %v3035_v21, %v8598_v35  ;;  %v2585_v24 = vpop.f32.mrb[19].mxu0  ;;  %v3037_v25 = vpop.f32.mrb[19].mxu1  ;;  %4019 = vmatmul.mubr.bf16.gmra.mrb[44].mxu0 %v3146_v2  ;;  %4245 = vmatmul.mubr.bf16.gmra.mrb[44].mxu1 %v3146_v2  ;;  %v3102_v40 = vmax.f32 %v6371_v10, 0.0  ;;  %v3104_v41 = vmax.f32 %v6403_v11, 0.0  ;;  %v7384_v2 = vld [vmem:[%s9440_s3 + $0x32c] ss:$16 sps:$4 sm:$0xff]  }
 0x1fd   : > { %v6374_v26 = vadd.f32 %v2585_v24, %v8601_v36  ;;  %v6406_v27 = vadd.f32 %v3037_v25, %v8605_v37  ;;  %4082 = vmatpush1.bf16.msra.mxu0 %v7361_v8  ;;  %4308 = vmatpush1.bf16.msra.mxu1 %v7364_v9  ;;  %v3103_v47 = vmax.f32 %v6372_v16, 0.0  ;;  %v3105_v48 = vmax.f32 %v6404_v17, 0.0  ;;  %v7382_v16 = vld [vmem:[%s9440_s3 + $0x328] ss:$16 sps:$4 sm:$0xff]   ;;  %v7387_v17 = vld [vmem:[%s9440_s3 + $0x344] ss:$16 sps:$4 sm:$0xff]  }
 0x1fe   : > { %v3106_v42 = vmax.f32 %v6373_v22, 0.0  ;;  %v3108_v43 = vmax.f32 %v6405_v23, 0.0  ;;  %4083 = vmatprep.subr.bf16.mxu0 %v7369_v14  ;;  %4309 = vmatprep.subr.bf16.mxu1 %v7372_v15  ;;  %v7379_v15 = vld [vmem:[%s9440_s3 + $0x320] ss:$16 sps:$4 sm:$0xff]   ;;  %v7390_v24 = vld [vmem:[%s9440_s3 + $0x34c] ss:$16 sps:$4 sm:$0xff]  }
 0x1ff   : > { %v3107_v49 = vmax.f32 %v6374_v26, 0.0  ;;  %v3109_v50 = vmax.f32 %v6406_v27, 0.0 }
 0x200   : > { %v3150_v51 = vpack.c.bf16 %v3106_v42, %v3102_v40  ;;  %v8759_v52 = vpack.c.bf16 %v3108_v43, %v3104_v41 }
 0x201   : > { %v3151_v53 = vpack.c.bf16 %v3107_v49, %v3103_v47  ;;  %v8761_v54 = vpack.c.bf16 %v3109_v50, %v3105_v48  ;;  %v2589_v55 = vpop.f32.mrb[20].mxu0  ;;  %v3041_v56 = vpop.f32.mrb[20].mxu1  ;;  %4084 = vmatpush1.bf16.msra.mxu0 %v7367_v31  ;;  %4310 = vmatpush1.bf16.msra.mxu1 %v7370_v38  ;;  %v7388_v47 = vld [vmem:[%s9440_s3 + $0x348] ss:$16 sps:$4 sm:$0xff]  }
 0x202   : > { %v6375_v59 = vadd.f32 %v2589_v55, %v8594_v34  ;;  %v6407_v60 = vadd.f32 %v3041_v56, %v8598_v35  ;;  %v2591_v61 = vpop.f32.mrb[21].mxu0  ;;  %v3043_v62 = vpop.f32.mrb[21].mxu1  ;;  %4085 = vmatprep.subr.bf16.mxu0 %v7375_v39  ;;  %4311 = vmatprep.subr.bf16.mxu1 %v7378_v45  ;;  %v7385_v45 = vld [vmem:[%s9440_s3 + $0x340] ss:$16 sps:$4 sm:$0xff]   ;;  %v7396_v55 = vld [vmem:[%s9440_s3 + $0x36c] ss:$16 sps:$4 sm:$0xff]  }
 0x203   : > { %v6376_v4 = vadd.f32 %v2591_v61, %v8601_v36  ;;  %v6408_v6 = vadd.f32 %v3043_v62, %v8605_v37  ;;  %v2593_v7 = vpop.f32.mrb[22].mxu0  ;;  %v3045_v8 = vpop.f32.mrb[22].mxu1  ;;  %4028 = vmatprep.mubr.bf16.mxu0 %v3151_v53  ;;  %4254 = vmatprep.mubr.bf16.mxu1 %v3151_v53  ;;  %v7393_v53 = vld [vmem:[%s9440_s3 + $0x364] ss:$16 sps:$4 sm:$0xff]  }
 0x204   : > { %v6377_v9 = vadd.f32 %v2593_v7, %v8594_v34  ;;  %v6409_v10 = vadd.f32 %v3045_v8, %v8598_v35  ;;  %v2595_v11 = vpop.f32.mrb[23].mxu0  ;;  %v3047_v12 = vpop.f32.mrb[23].mxu1  ;;  %4029 = vmatmul.mubr.bf16.gmra.mrb[48].mxu0 %v3150_v51  ;;  %4255 = vmatmul.mubr.bf16.gmra.mrb[48].mxu1 %v3150_v51  ;;  %v3110_v19 = vmax.f32 %v6375_v59, 0.0  ;;  %v3112_v21 = vmax.f32 %v6407_v60, 0.0  ;;  %v7394_v7 = vld [vmem:[%s9440_s3 + $0x368] ss:$16 sps:$4 sm:$0xff]  }
 0x205   : > { %v6378_v13 = vadd.f32 %v2595_v11, %v8601_v36  ;;  %v6410_v14 = vadd.f32 %v3047_v12, %v8605_v37  ;;  %4086 = vmatpush1.bf16.msra.mxu0 %v7373_v57  ;;  %4312 = vmatpush1.bf16.msra.mxu1 %v7376_v58  ;;  %v3111_v25 = vmax.f32 %v6376_v4, 0.0  ;;  %v3113_v26 = vmax.f32 %v6408_v6, 0.0  ;;  %v7391_v6 = vld [vmem:[%s9440_s3 + $0x360] ss:$16 sps:$4 sm:$0xff]   ;;  %v7399_v8 = vld [vmem:[%s9440_s3 + $0x384] ss:$16 sps:$4 sm:$0xff]  }
 0x206   : > { %v3114_v22 = vmax.f32 %v6377_v9, 0.0  ;;  %v3116_v23 = vmax.f32 %v6409_v10, 0.0  ;;  %4087 = vmatprep.subr.bf16.mxu0 %v7381_v0  ;;  %4313 = vmatprep.subr.bf16.mxu1 %v7384_v2 }
 0x207   : > { %v3115_v27 = vmax.f32 %v6378_v13, 0.0  ;;  %v3117_v31 = vmax.f32 %v6410_v14, 0.0  ;;  %v7402_v13 = vld [vmem:[%s9440_s3 + $0x38c] ss:$16 sps:$4 sm:$0xff]  }
 0x208   : > { %v3154_v38 = vpack.c.bf16 %v3114_v22, %v3110_v19  ;;  %v8795_v39 = vpack.c.bf16 %v3116_v23, %v3112_v21 }
 0x209   : > { %v3155_v40 = vpack.c.bf16 %v3115_v27, %v3111_v25  ;;  %v8797_v41 = vpack.c.bf16 %v3117_v31, %v3113_v26  ;;  %v2599_v42 = vpop.f32.mrb[24].mxu0  ;;  %v3051_v43 = vpop.f32.mrb[24].mxu1  ;;  %4088 = vmatpush1.bf16.msra.mxu0 %v7379_v15  ;;  %4314 = vmatpush1.bf16.msra.mxu1 %v7382_v16  ;;  %v7397_v26 = vld [vmem:[%s9440_s3 + $0x380] ss:$16 sps:$4 sm:$0xff]   ;;  %v7400_v27 = vld [vmem:[%s9440_s3 + $0x388] ss:$16 sps:$4 sm:$0xff]  }
 0x20a   : > { %v6379_v48 = vadd.f32 %v2599_v42, %v8594_v34  ;;  %v6411_v49 = vadd.f32 %v3051_v43, %v8598_v35  ;;  %v2601_v50 = vpop.f32.mrb[25].mxu0  ;;  %v3053_v51 = vpop.f32.mrb[25].mxu1  ;;  %4089 = vmatprep.subr.bf16.mxu0 %v7387_v17  ;;  %4315 = vmatprep.subr.bf16.mxu1 %v7390_v24  ;;  %v7405_v43 = vld [vmem:[%s9440_s3 + $0x3a4] ss:$16 sps:$4 sm:$0xff]  }
 0x20b   : > { %v6380_v56 = vadd.f32 %v2601_v50, %v8601_v36  ;;  %v6412_v57 = vadd.f32 %v3053_v51, %v8605_v37  ;;  %v2603_v58 = vpop.f32.mrb[26].mxu0  ;;  %v3055_v59 = vpop.f32.mrb[26].mxu1  ;;  %4038 = vmatprep.mubr.bf16.mxu0 %v3155_v40  ;;  %4264 = vmatprep.mubr.bf16.mxu1 %v3155_v40 }
 0x20c   : > { %v6381_v60 = vadd.f32 %v2603_v58, %v8594_v34  ;;  %v6413_v61 = vadd.f32 %v3055_v59, %v8598_v35  ;;  %v2605_v62 = vpop.f32.mrb[27].mxu0  ;;  %v3057_v0 = vpop.f32.mrb[27].mxu1  ;;  %4039 = vmatmul.mubr.bf16.gmra.mrb[52].mxu0 %v3154_v38  ;;  %4265 = vmatmul.mubr.bf16.gmra.mrb[52].mxu1 %v3154_v38  ;;  %v3118_v9 = vmax.f32 %v6379_v48, 0.0  ;;  %v3120_v10 = vmax.f32 %v6411_v49, 0.0  ;;  %v7403_v59 = vld [vmem:[%s9440_s3 + $0x3a0] ss:$16 sps:$4 sm:$0xff]  }
 0x20d   : > { %v6382_v2 = vadd.f32 %v2605_v62, %v8601_v36  ;;  %v6414_v4 = vadd.f32 %v3057_v0, %v8605_v37  ;;  %4090 = vmatpush1.bf16.msra.mxu0 %v7385_v45  ;;  %4316 = vmatpush1.bf16.msra.mxu1 %v7388_v47  ;;  %v3119_v14 = vmax.f32 %v6380_v56, 0.0  ;;  %v3121_v15 = vmax.f32 %v6412_v57, 0.0  ;;  %v7408_v45 = vld [vmem:[%s9440_s3 + $0x3ac] ss:$16 sps:$4 sm:$0xff]  }
 0x20e   : > { %v3122_v11 = vmax.f32 %v6381_v60, 0.0  ;;  %v3124_v12 = vmax.f32 %v6413_v61, 0.0  ;;  %4091 = vmatprep.subr.bf16.mxu0 %v7393_v53  ;;  %4317 = vmatprep.subr.bf16.mxu1 %v7396_v55 }
 0x20f   : > { %v3123_v16 = vmax.f32 %v6382_v2, 0.0  ;;  %v3125_v17 = vmax.f32 %v6414_v4, 0.0 }
 0x210   : > { %v3158_v19 = vpack.c.bf16 %v3122_v11, %v3118_v9  ;;  %v8831_v21 = vpack.c.bf16 %v3124_v12, %v3120_v10  ;;  %v7409_v11 = vld [vmem:[%s9440_s3 + $0x3c0] ss:$16 sps:$4 sm:$0xff]   ;;  %v7412_v12 = vld [vmem:[%s9440_s3 + $0x3c8] ss:$16 sps:$4 sm:$0xff]  }
 0x211   : > { %v3159_v22 = vpack.c.bf16 %v3123_v16, %v3119_v14  ;;  %v8833_v23 = vpack.c.bf16 %v3125_v17, %v3121_v15  ;;  %v2609_v24 = vpop.f32.mrb[28].mxu0  ;;  %v3061_v25 = vpop.f32.mrb[28].mxu1  ;;  %4092 = vmatpush1.bf16.msra.mxu0 %v7391_v6  ;;  %4318 = vmatpush1.bf16.msra.mxu1 %v7394_v7  ;;  %v7420_v14 = vld [vmem:[%s9440_s3 + $0x3ec] ss:$16 sps:$4 sm:$0xff]   ;;  %v7415_v15 = vld [vmem:[%s9440_s3 + $0x3e0] ss:$16 sps:$4 sm:$0xff]  }
 0x212   : > { %v6383_v31 = vadd.f32 %v2609_v24, %v8594_v34  ;;  %v6415_v38 = vadd.f32 %v3061_v25, %v8598_v35  ;;  %v2611_v40 = vpop.f32.mrb[29].mxu0  ;;  %v3063_v42 = vpop.f32.mrb[29].mxu1  ;;  %4093 = vmatprep.subr.bf16.mxu0 %v7399_v8  ;;  %4319 = vmatprep.subr.bf16.mxu1 %v7402_v13  ;;  %v7417_v13 = vld [vmem:[%s9440_s3 + $0x3e4] ss:$16 sps:$4 sm:$0xff]   ;;  %v7418_v16 = vld [vmem:[%s9440_s3 + $0x3e8] ss:$16 sps:$4 sm:$0xff]  }
 0x213   : > { %v6384_v47 = vadd.f32 %v2611_v40, %v8601_v36  ;;  %v6416_v48 = vadd.f32 %v3063_v42, %v8605_v37  ;;  %v2613_v49 = vpop.f32.mrb[30].mxu0  ;;  %v3065_v50 = vpop.f32.mrb[30].mxu1  ;;  %4048 = vmatprep.mubr.bf16.mxu0 %v3159_v22  ;;  %4274 = vmatprep.mubr.bf16.mxu1 %v3159_v22  ;;  %v7423_v17 = vld [vmem:[%s9442_s5 + $0x4] ss:$8 sps:$4 sm:$0xff]   ;;  %v7424_v22 = vld [vmem:[%s9442_s5 + $0x10] ss:$8 sps:$4 sm:$0xff]  }
 0x214   : > { %v6385_v51 = vadd.f32 %v2613_v49, %v8594_v34  ;;  %v6417_v53 = vadd.f32 %v3065_v50, %v8598_v35  ;;  %v2615_v55 = vpop.f32.mrb[31].mxu0  ;;  %v3067_v56 = vpop.f32.mrb[31].mxu1  ;;  %4049 = vmatmul.mubr.bf16.gmra.mrb[56].mxu0 %v3158_v19  ;;  %4275 = vmatmul.mubr.bf16.gmra.mrb[56].mxu1 %v3158_v19  ;;  %v7406_v34 = vld [vmem:[%s9440_s3 + $0x3a8] ss:$16 sps:$4 sm:$0xff]   ;;  %v7411_v35 = vld [vmem:[%s9440_s3 + $0x3c4] ss:$16 sps:$4 sm:$0xff]  }
 0x215   : > { %v6386_v57 = vadd.f32 %v2615_v55, %v8601_v36  ;;  %v6418_v58 = vadd.f32 %v3067_v56, %v8605_v37  ;;  %4094 = vmatpush1.bf16.msra.mxu0 %v7397_v26  ;;  %4320 = vmatpush1.bf16.msra.mxu1 %v7400_v27  ;;  %v3126_v60 = vmax.f32 %v6383_v31, 0.0  ;;  %v3128_v61 = vmax.f32 %v6415_v38, 0.0  ;;  %v7414_v37 = vld [vmem:[%s9440_s3 + $0x3cc] ss:$16 sps:$4 sm:$0xff]   ;;  %v7421_v19 = vld [vmem:[%s9442_s5] ss:$8 sps:$4 sm:$0xff]  }
 0x216   : > { %v3130_v62 = vmax.f32 %v6385_v51, 0.0  ;;  %v3132_v36 = vmax.f32 %v6417_v53, 0.0  ;;  %4095 = vmatprep.subr.bf16.mxu0 %v7405_v43  ;;  %4321 = vmatprep.subr.bf16.mxu1 %v7408_v45  ;;  %v3127_v0 = vmax.f32 %v6384_v47, 0.0  ;;  %v3129_v2 = vmax.f32 %v6416_v48, 0.0  ;;  %v7429_v24 = vld [vmem:[%s9442_s5 + $0x24] ss:$8 sps:$4 sm:$0xff]  }
 0x217   : > { %v3131_v4 = vmax.f32 %v6386_v57, 0.0  ;;  %v3133_v6 = vmax.f32 %v6418_v58, 0.0  ;;  %v7427_v25 = vld [vmem:[%s9442_s5 + $0x20] ss:$8 sps:$4 sm:$0xff]   ;;  %v7435_v26 = vld [vmem:[%s9442_s5 + $0x44] ss:$8 sps:$4 sm:$0xff]  }
 0x218   : > { %v3162_v7 = vpack.c.bf16 %v3130_v62, %v3126_v60  ;;  %v8867_v8 = vpack.c.bf16 %v3132_v36, %v3128_v61  ;;  %v7433_v27 = vld [vmem:[%s9442_s5 + $0x40] ss:$8 sps:$4 sm:$0xff]   ;;  %v7441_v31 = vld [vmem:[%s9442_s5 + $0x64] ss:$8 sps:$4 sm:$0xff]   ;;  %v7468_v50 = vld [vmem:[%s9442_s5 + $0xf4] ss:$8 sps:$4 sm:$0xff]  }
 0x219   : > { %v3163_v9 = vpack.c.bf16 %v3131_v4, %v3127_v0  ;;  %v8869_v10 = vpack.c.bf16 %v3133_v6, %v3129_v2  ;;  %4096 = vmatpush1.bf16.msra.mxu0 %v7403_v59  ;;  %4322 = vmatpush1.bf16.msra.mxu1 %v7406_v34  ;;  %v7439_v38 = vld [vmem:[%s9442_s5 + $0x60] ss:$8 sps:$4 sm:$0xff]   ;;  %v7447_v40 = vld [vmem:[%s9442_s5 + $0x84] ss:$8 sps:$4 sm:$0xff]   ;;  %v7466_v51 = vld [vmem:[%s9442_s5 + $0xf0] ss:$8 sps:$4 sm:$0xff]  }
 0x21a   : > { %4097 = vmatprep.subr.bf16.mxu0 %v7411_v35  ;;  %4323 = vmatprep.subr.bf16.mxu1 %v7414_v37  ;;  %v7445_v42 = vld [vmem:[%s9442_s5 + $0x80] ss:$8 sps:$4 sm:$0xff]   ;;  %v7453_v43 = vld [vmem:[%s9442_s5 + $0xa4] ss:$8 sps:$4 sm:$0xff]  }
 0x21b   : > { %4058 = vmatprep.mubr.bf16.mxu0 %v3163_v9  ;;  %4284 = vmatprep.mubr.bf16.mxu1 %v3163_v9  ;;  %v7451_v45 = vld [vmem:[%s9442_s5 + $0xa0] ss:$8 sps:$4 sm:$0xff]   ;;  %v7459_v47 = vld [vmem:[%s9442_s5 + $0xc4] ss:$8 sps:$4 sm:$0xff]  }
 0x21c   : > { %4059 = vmatmul.mubr.bf16.gmra.mrb[60].mxu0 %v3162_v7  ;;  %4285 = vmatmul.mubr.bf16.gmra.mrb[60].mxu1 %v3162_v7  ;;  %v7457_v48 = vld [vmem:[%s9442_s5 + $0xc0] ss:$8 sps:$4 sm:$0xff]   ;;  %v7465_v49 = vld [vmem:[%s9442_s5 + $0xe4] ss:$8 sps:$4 sm:$0xff]  }
 0x21d   : > { %4098 = vmatpush1.bf16.msra.mxu0 %v7409_v11  ;;  %4101 = vmatprep.mubr.bf16.mxu0 %v8617_v1  ;;  %v7471_v53 = vld [vmem:[%s9442_s5 + $0x104] ss:$8 sps:$4 sm:$0xff]   ;;  %v3294_v55 = vld [vmem:[%s9441_s4] sm:$0xf] }
 0x21e   : > { %4324 = vmatpush1.bf16.msra.mxu1 %v7412_v12  ;;  %4327 = vmatprep.mubr.bf16.mxu1 %v8617_v1  ;;  %v7426_v1 = vld [vmem:[%s9442_s5 + $0x14] ss:$8 sps:$4 sm:$0xff]   ;;  %v9024_v56 = vrot.slane %v3294_v55, %v8583_v29  ;;  %v9028_v57 = vrot.slane %v3294_v55, %v748_v30  ;;  %v9031_v58 = vrot.slane %v3294_v55, %v8590_v32  ;;  %v7519_v7 = vld [vmem:[%s9444_s7 + $0x48] sm:$0xff]  }
 0x21f   : > { %4099 = vmatprep.subr.bf16.mxu0 %v7417_v13  ;;  %4325 = vmatprep.subr.bf16.mxu1 %v7420_v14  ;;  %v9035_v59 = vrot.slane %v3294_v55, %v752_v33  ;;  %v7518_v33 = vld [vmem:[%s9444_s7] sm:$0xff]  }
 0x221   : > { %4100 = vmatpush1.bf16.msra.mxu0 %v7415_v15 }
 0x222   : > { %4326 = vmatpush1.bf16.msra.mxu1 %v7418_v16  ;;  %4900 = vmatprep.subr.bf16.mxu0 %v7423_v17 }
 0x223   : > { %6243 = vmatprep.subr.bf16.mxu1 %v7517_v28 }
 0x224   : > { %4102 = vmatmul.mubr.bf16.vlgmr.msra.gmra.mrb[32].mxu0 %v8615_v63 }
 0x225   : > { %4328 = vmatmul.mubr.bf16.vlgmr.msra.gmra.mrb[32].mxu1 %v8615_v63  ;;  %4111 = vmatprep.mubr.bf16.mxu0 %v8653_v46  ;;  %v7432_v63 = vld [vmem:[%s9442_s5 + $0x34] ss:$8 sps:$4 sm:$0xff]  }
 0x226   : > { %4337 = vmatprep.mubr.bf16.mxu1 %v8653_v46  ;;  %4901 = vmatpush1.bf16.msra.mxu0 %v7421_v19  ;;  %v7430_v46 = vld [vmem:[%s9442_s5 + $0x30] ss:$8 sps:$4 sm:$0xff]   ;;  %v7520_v19 = vld [vmem:[%s9444_s7 + $0x8] sm:$0xff]  }
 0x227   : > { %4902 = vmatprep.subr.bf16.mxu0 %v7426_v1  ;;  %6244 = vmatpush3.bf16.msra.mxu1 %v7518_v33 }
 0x228   : > { %6245 = vmatprep.subr.bf16.mxu1 %v7519_v7 }
 0x22a   : > { %4903 = vmatpush1.bf16.msra.mxu0 %v7424_v22 }
 0x22b   : > { %4904 = vmatprep.subr.bf16.mxu0 %v7429_v24  ;;  %6246 = vmatpush3.bf16.msra.mxu1 %v7520_v19 }
 0x22c   : > { %4112 = vmatmul.mubr.bf16.gmra.mrb[36].mxu0 %v8651_v44 }
 0x22d   : > { %4338 = vmatmul.mubr.bf16.gmra.mrb[36].mxu1 %v8651_v44  ;;  %4121 = vmatprep.mubr.bf16.mxu0 %v8689_v20  ;;  %v7438_v44 = vld [vmem:[%s9442_s5 + $0x54] ss:$8 sps:$4 sm:$0xff]  }
 0x22e   : > { %4347 = vmatprep.mubr.bf16.mxu1 %v8689_v20  ;;  %4905 = vmatpush1.bf16.msra.mxu0 %v7427_v25  ;;  %v7436_v20 = vld [vmem:[%s9442_s5 + $0x50] ss:$8 sps:$4 sm:$0xff]  }
 0x22f   : > { %4906 = vmatprep.subr.bf16.mxu0 %v7432_v63  ;;  %v7521_v25 = vld [vmem:[%s9444_s7 + $0x50] sm:$0xff]  }
 0x230   : > { %6247 = vmatprep.subr.bf16.mxu1 %v7521_v25 }
 0x232   : > { %4907 = vmatpush1.bf16.msra.mxu0 %v7430_v46 }
 0x233   : > { %4908 = vmatprep.subr.bf16.mxu0 %v7435_v26 }
 0x234   : > { %4122 = vmatmul.mubr.bf16.gmra.mrb[40].mxu0 %v8687_v18 }
 0x235   : > { %4348 = vmatmul.mubr.bf16.gmra.mrb[40].mxu1 %v8687_v18  ;;  %4131 = vmatprep.mubr.bf16.mxu0 %v8725_v5  ;;  %v7444_v18 = vld [vmem:[%s9442_s5 + $0x74] ss:$8 sps:$4 sm:$0xff]  }
 0x236   : > { %4357 = vmatprep.mubr.bf16.mxu1 %v8725_v5  ;;  %4909 = vmatpush1.bf16.msra.mxu0 %v7433_v27  ;;  %v7442_v5 = vld [vmem:[%s9442_s5 + $0x70] ss:$8 sps:$4 sm:$0xff]   ;;  %v7469_v27 = vld [vmem:[%s9442_s5 + $0x100] ss:$8 sps:$4 sm:$0xff]  }
 0x237   : > { %4910 = vmatprep.subr.bf16.mxu0 %v7438_v44 }
 0x23a   : > { %4911 = vmatpush1.bf16.msra.mxu0 %v7436_v20 }
 0x23b   : > { %4912 = vmatprep.subr.bf16.mxu0 %v7441_v31 }
 0x23c   : > { %4132 = vmatmul.mubr.bf16.gmra.mrb[44].mxu0 %v8723_v3 }
 0x23d   : > { %4358 = vmatmul.mubr.bf16.gmra.mrb[44].mxu1 %v8723_v3  ;;  %4141 = vmatprep.mubr.bf16.mxu0 %v8761_v54  ;;  %v7450_v3 = vld [vmem:[%s9442_s5 + $0x94] ss:$8 sps:$4 sm:$0xff]  }
 0x23e   : > { %4367 = vmatprep.mubr.bf16.mxu1 %v8761_v54  ;;  %4913 = vmatpush1.bf16.msra.mxu0 %v7439_v38  ;;  %v7448_v54 = vld [vmem:[%s9442_s5 + $0x90] ss:$8 sps:$4 sm:$0xff]  }
 0x23f   : > { %4914 = vmatprep.subr.bf16.mxu0 %v7444_v18  ;;  %v7474_v18 = vld [vmem:[%s9442_s5 + $0x114] ss:$8 sps:$4 sm:$0xff]  }
 0x242   : > { %4915 = vmatpush1.bf16.msra.mxu0 %v7442_v5 }
 0x243   : > { %4916 = vmatprep.subr.bf16.mxu0 %v7447_v40 }
 0x244   : > { %4142 = vmatmul.mubr.bf16.gmra.mrb[48].mxu0 %v8759_v52 }
 0x245   : > { %4368 = vmatmul.mubr.bf16.gmra.mrb[48].mxu1 %v8759_v52  ;;  %4151 = vmatprep.mubr.bf16.mxu0 %v8797_v41  ;;  %v7456_v52 = vld [vmem:[%s9442_s5 + $0xb4] ss:$8 sps:$4 sm:$0xff]  }
 0x246   : > { %4377 = vmatprep.mubr.bf16.mxu1 %v8797_v41  ;;  %4917 = vmatpush1.bf16.msra.mxu0 %v7445_v42  ;;  %v7454_v41 = vld [vmem:[%s9442_s5 + $0xb0] ss:$8 sps:$4 sm:$0xff]  }
 0x247   : > { %4918 = vmatprep.subr.bf16.mxu0 %v7450_v3 }
 0x24a   : > { %4919 = vmatpush1.bf16.msra.mxu0 %v7448_v54  ;;  %v7522_v54 = vld [vmem:[%s9444_s7 + $0x10] sm:$0xff]  }
 0x24b   : > { %4920 = vmatprep.subr.bf16.mxu0 %v7453_v43  ;;  %6248 = vmatpush3.bf16.msra.mxu1 %v7522_v54 }
 0x24c   : > { %4152 = vmatmul.mubr.bf16.gmra.mrb[52].mxu0 %v8795_v39 }
 0x24d   : > { %4378 = vmatmul.mubr.bf16.gmra.mrb[52].mxu1 %v8795_v39  ;;  %4161 = vmatprep.mubr.bf16.mxu0 %v8833_v23  ;;  %v7462_v39 = vld [vmem:[%s9442_s5 + $0xd4] ss:$8 sps:$4 sm:$0xff]  }
 0x24e   : > { %4387 = vmatprep.mubr.bf16.mxu1 %v8833_v23  ;;  %4921 = vmatpush1.bf16.msra.mxu0 %v7451_v45  ;;  %v7460_v23 = vld [vmem:[%s9442_s5 + $0xd0] ss:$8 sps:$4 sm:$0xff]  }
 0x24f   : > { %4922 = vmatprep.subr.bf16.mxu0 %v7456_v52 }
 0x252   : > { %4923 = vmatpush1.bf16.msra.mxu0 %v7454_v41 }
 0x253   : > { %4924 = vmatprep.subr.bf16.mxu0 %v7459_v47  ;;  %v7523_v47 = vld [vmem:[%s9444_s7 + $0x58] sm:$0xff]  }
 0x254   : > { %4162 = vmatmul.mubr.bf16.gmra.mrb[56].mxu0 %v8831_v21  ;;  %6249 = vmatprep.subr.bf16.mxu1 %v7523_v47 }
 0x255   : > { %4388 = vmatmul.mubr.bf16.gmra.mrb[56].mxu1 %v8831_v21  ;;  %4171 = vmatprep.mubr.bf16.mxu0 %v8869_v10  ;;  %v7463_v21 = vld [vmem:[%s9442_s5 + $0xe0] ss:$8 sps:$4 sm:$0xff]  }
 0x256   : > { %4397 = vmatprep.mubr.bf16.mxu1 %v8869_v10  ;;  %4925 = vmatpush1.bf16.msra.mxu0 %v7457_v48 }
 0x257   : > { %4926 = vmatprep.subr.bf16.mxu0 %v7462_v39 }
 0x25a   : > { %4927 = vmatpush1.bf16.msra.mxu0 %v7460_v23 }
 0x25b   : > { %4928 = vmatprep.subr.bf16.mxu0 %v7465_v49  ;;  %v7472_v49 = vld [vmem:[%s9442_s5 + $0x110] ss:$8 sps:$4 sm:$0xff]  }
 0x25c   : > { %4172 = vmatmul.mubr.bf16.gmra.mrb[60].mxu0 %v8867_v8 }
 0x25d   : > { %4398 = vmatmul.mubr.bf16.gmra.mrb[60].mxu1 %v8867_v8 }
 0x25e   : > { %4929 = vmatpush1.bf16.msra.mxu0 %v7463_v21 }
 0x25f   : > { %4930 = vmatprep.subr.bf16.mxu0 %v7468_v50 }
 0x262   : > { %4931 = vmatpush1.bf16.msra.mxu0 %v7466_v51 }
 0x263   : > { %5013 = vmatprep.subr.bf16.mxu0 %v7471_v53  ;;  %v7477_v53 = vld [vmem:[%s9442_s5 + $0x124] ss:$8 sps:$4 sm:$0xff]  }
 0x2f7   : > { %v4103_v34 = vpop.f32.mrb[32].mxu0 }
 0x2f8   : > { %v6419_v35 = vadd.f32 %v4103_v34, %v9024_v56  ;;  %v4329_v60 = vpop.f32.mrb[32].mxu1  ;;  %v4105_v61 = vpop.f32.mrb[33].mxu0 }
 0x2f9   : > { %v6451_v62 = vadd.f32 %v4329_v60, %v9028_v57  ;;  %v6420_v36 = vadd.f32 %v4105_v61, %v9031_v58  ;;  %v4331_v37 = vpop.f32.mrb[33].mxu1  ;;  %v4107_v0 = vpop.f32.mrb[34].mxu0  ;;  %v7524_v61 = vld [vmem:[%s9444_s7 + $0x18] sm:$0xff]  }
 0x2fa   : > { %v6452_v30 = vadd.f32 %v4331_v37, %v9035_v59  ;;  %v6421_v2 = vadd.f32 %v4107_v0, %v9024_v56  ;;  %v4333_v4 = vpop.f32.mrb[34].mxu1  ;;  %v4109_v6 = vpop.f32.mrb[35].mxu0  ;;  %v4408_v11 = vmax.f32 %v6419_v35, 0.0  ;;  %v7525_v0 = vld [vmem:[%s9444_s7 + $0x60] sm:$0xff]   ;;  %6250 = vmatpush3.bf16.msra.mxu1 %v7524_v61 }
 0x2fb   : > { %v6453_v8 = vadd.f32 %v4333_v4, %v9028_v57  ;;  %v6422_v9 = vadd.f32 %v4109_v6, %v9031_v58  ;;  %v4335_v10 = vpop.f32.mrb[35].mxu1  ;;  %v4410_v14 = vmax.f32 %v6451_v62, 0.0  ;;  %v4409_v15 = vmax.f32 %v6420_v36, 0.0  ;;  %v7475_v6 = vld [vmem:[%s9442_s5 + $0x120] ss:$8 sps:$4 sm:$0xff]   ;;  %6251 = vmatprep.subr.bf16.mxu1 %v7525_v0 }
 0x2fc   : > { %v4412_v12 = vmax.f32 %v6421_v2, 0.0  ;;  %v6454_v13 = vadd.f32 %v4335_v10, %v9035_v59  ;;  %v4411_v1 = vmax.f32 %v6452_v30, 0.0 }
 0x2fd   : > { %v4414_v16 = vmax.f32 %v6453_v8, 0.0  ;;  %v4413_v17 = vmax.f32 %v6422_v9, 0.0  ;;  %v7480_v9 = vld [vmem:[%s9442_s5 + $0x134] ss:$8 sps:$4 sm:$0xff]  }
 0x2fe   : > { %v4472_v22 = vpack.c.bf16 %v4412_v12, %v4408_v11  ;;  %v4415_v24 = vmax.f32 %v6454_v13, 0.0 }
 0x2ff   : > { %v9060_v63 = vpack.c.bf16 %v4414_v16, %v4410_v14  ;;  %v4473_v46 = vpack.c.bf16 %v4413_v17, %v4409_v15  ;;  %v4113_v26 = vpop.f32.mrb[36].mxu0  ;;  %v7526_v14 = vld [vmem:[%s9444_s7 + $0x20] sm:$0xff]  }
 0x300   : > { %v9065_v44 = vpack.c.bf16 %v4415_v24, %v4411_v1  ;;  %v6423_v20 = vadd.f32 %v4113_v26, %v9024_v56  ;;  %v4339_v31 = vpop.f32.mrb[36].mxu1  ;;  %v4115_v38 = vpop.f32.mrb[37].mxu0  ;;  %v7527_v1 = vld [vmem:[%s9444_s7 + $0x68] sm:$0xff]   ;;  %6252 = vmatpush3.bf16.msra.mxu1 %v7526_v14 }
 0x301   : > { %v6455_v5 = vadd.f32 %v4339_v31, %v9028_v57  ;;  %v6424_v40 = vadd.f32 %v4115_v38, %v9031_v58  ;;  %v4341_v42 = vpop.f32.mrb[37].mxu1  ;;  %v4117_v3 = vpop.f32.mrb[38].mxu0  ;;  %4932 = vmatprep.mubr.bf16.mxu0 %v4473_v46  ;;  %v7478_v46 = vld [vmem:[%s9442_s5 + $0x130] ss:$8 sps:$4 sm:$0xff]   ;;  %v7483_v31 = vld [vmem:[%s9442_s5 + $0x144] ss:$8 sps:$4 sm:$0xff]   ;;  %6253 = vmatprep.subr.bf16.mxu1 %v7527_v1 }
 0x302   : > { %v6456_v43 = vadd.f32 %v4341_v42, %v9035_v59  ;;  %v6425_v45 = vadd.f32 %v4117_v3, %v9024_v56  ;;  %v4343_v52 = vpop.f32.mrb[38].mxu1  ;;  %v4119_v41 = vpop.f32.mrb[39].mxu0  ;;  %4933 = vmatmul.mubr.bf16.vlgmr.msra.gmra.mrb[64].mxu0 %v4472_v22  ;;  %v4416_v21 = vmax.f32 %v6423_v20, 0.0  ;;  %v7528_v42 = vld [vmem:[%s9444_s7 + $0x28] sm:$0xff]  }
 0x303   : > { %v6457_v48 = vadd.f32 %v4343_v52, %v9028_v57  ;;  %v6426_v39 = vadd.f32 %v4119_v41, %v9031_v58  ;;  %v4345_v23 = vpop.f32.mrb[39].mxu1  ;;  %5014 = vmatpush1.bf16.msra.mxu0 %v7469_v27  ;;  %v4418_v55 = vmax.f32 %v6455_v5, 0.0  ;;  %v4417_v34 = vmax.f32 %v6424_v40, 0.0  ;;  %v7487_v1 = vld [vmem:[%s9442_s5 + $0x160] ss:$8 sps:$4 sm:$0xff]  }
 0x304   : > { %v4420_v50 = vmax.f32 %v6425_v45, 0.0  ;;  %v6458_v51 = vadd.f32 %v4345_v23, %v9035_v59  ;;  %5015 = vmatprep.subr.bf16.mxu0 %v7474_v18  ;;  %v4419_v62 = vmax.f32 %v6456_v43, 0.0  ;;  %v7529_v45 = vld [vmem:[%s9444_s7 + $0x70] sm:$0xff]   ;;  %6254 = vmatpush3.bf16.msra.mxu1 %v7528_v42 }
 0x305   : > { %v4422_v35 = vmax.f32 %v6457_v48, 0.0  ;;  %v4421_v60 = vmax.f32 %v6426_v39, 0.0  ;;  %v7481_v48 = vld [vmem:[%s9442_s5 + $0x140] ss:$8 sps:$4 sm:$0xff]   ;;  %6255 = vmatprep.subr.bf16.mxu1 %v7529_v45  ;;  %v7490_v45 = vld [vmem:[%s9442_s5 + $0x170] ss:$8 sps:$4 sm:$0xff]  }
 0x306   : > { %v4476_v36 = vpack.c.bf16 %v4420_v50, %v4416_v21  ;;  %v4423_v37 = vmax.f32 %v6458_v51, 0.0  ;;  %v7486_v50 = vld [vmem:[%s9442_s5 + $0x154] ss:$8 sps:$4 sm:$0xff]  }
 0x307   : > { %v9096_v30 = vpack.c.bf16 %v4422_v35, %v4418_v55  ;;  %v4477_v2 = vpack.c.bf16 %v4421_v60, %v4417_v34  ;;  %v4123_v4 = vpop.f32.mrb[40].mxu0  ;;  %5016 = vmatpush1.bf16.msra.mxu0 %v7472_v49  ;;  %v7530_v35 = vld [vmem:[%s9444_s7 + $0x30] sm:$0xff]  }
 0x308   : > { %v9101_v28 = vpack.c.bf16 %v4423_v37, %v4419_v62  ;;  %v6427_v33 = vadd.f32 %v4123_v4, %v9024_v56  ;;  %v4349_v7 = vpop.f32.mrb[40].mxu1  ;;  %v4125_v8 = vpop.f32.mrb[41].mxu0  ;;  %5017 = vmatprep.subr.bf16.mxu0 %v7477_v53  ;;  %v7484_v4 = vld [vmem:[%s9442_s5 + $0x150] ss:$8 sps:$4 sm:$0xff]   ;;  %6256 = vmatpush3.bf16.msra.mxu1 %v7530_v35 }
 0x309   : > { %v6459_v10 = vadd.f32 %v4349_v7, %v9028_v57  ;;  %v6428_v11 = vadd.f32 %v4125_v8, %v9031_v58  ;;  %v4351_v12 = vpop.f32.mrb[41].mxu1  ;;  %v4127_v13 = vpop.f32.mrb[42].mxu0  ;;  %4942 = vmatprep.mubr.bf16.mxu0 %v4477_v2  ;;  %v7489_v8 = vld [vmem:[%s9442_s5 + $0x164] ss:$8 sps:$4 sm:$0xff]  }
 0x30a   : > { %v6460_v15 = vadd.f32 %v4351_v12, %v9035_v59  ;;  %v6429_v16 = vadd.f32 %v4127_v13, %v9024_v56  ;;  %v4353_v17 = vpop.f32.mrb[42].mxu1  ;;  %v4129_v19 = vpop.f32.mrb[43].mxu0  ;;  %4943 = vmatmul.mubr.bf16.gmra.mrb[68].mxu0 %v4476_v36  ;;  %v4424_v26 = vmax.f32 %v6427_v33, 0.0 }
 0x30b   : > { %v6461_v22 = vadd.f32 %v4353_v17, %v9028_v57  ;;  %v6430_v24 = vadd.f32 %v4129_v19, %v9031_v58  ;;  %v4355_v25 = vpop.f32.mrb[43].mxu1  ;;  %5018 = vmatpush1.bf16.msra.mxu0 %v7475_v6  ;;  %v4426_v38 = vmax.f32 %v6459_v10, 0.0  ;;  %v4425_v18 = vmax.f32 %v6428_v11, 0.0 }
 0x30c   : > { %v4428_v27 = vmax.f32 %v6429_v16, 0.0  ;;  %v6462_v20 = vadd.f32 %v4355_v25, %v9035_v59  ;;  %5019 = vmatprep.subr.bf16.mxu0 %v7480_v9  ;;  %v4427_v3 = vmax.f32 %v6460_v15, 0.0 }
 0x30d   : > { %v4430_v5 = vmax.f32 %v6461_v22, 0.0  ;;  %v4429_v40 = vmax.f32 %v6430_v24, 0.0 }
 0x30e   : > { %v4480_v54 = vpack.c.bf16 %v4428_v27, %v4424_v26  ;;  %v4431_v43 = vmax.f32 %v6462_v20, 0.0  ;;  %v7492_v26 = vld [vmem:[%s9442_s5 + $0x174] ss:$8 sps:$4 sm:$0xff]  }
 0x30f   : > { %v9132_v52 = vpack.c.bf16 %v4430_v5, %v4426_v38  ;;  %v4481_v41 = vpack.c.bf16 %v4429_v40, %v4425_v18  ;;  %v4133_v47 = vpop.f32.mrb[44].mxu0  ;;  %5020 = vmatpush1.bf16.msra.mxu0 %v7478_v46 }
 0x310   : > { %v9137_v39 = vpack.c.bf16 %v4431_v43, %v4427_v3  ;;  %v6431_v23 = vadd.f32 %v4133_v47, %v9024_v56  ;;  %v4359_v49 = vpop.f32.mrb[44].mxu1  ;;  %v4135_v21 = vpop.f32.mrb[45].mxu0  ;;  %5021 = vmatprep.subr.bf16.mxu0 %v7483_v31 }
 0x311   : > { %v6463_v51 = vadd.f32 %v4359_v49, %v9028_v57  ;;  %v6432_v53 = vadd.f32 %v4135_v21, %v9031_v58  ;;  %v4361_v55 = vpop.f32.mrb[45].mxu1  ;;  %v4137_v34 = vpop.f32.mrb[46].mxu0  ;;  %4952 = vmatprep.mubr.bf16.mxu0 %v4481_v41 }
 0x312   : > { %v6464_v60 = vadd.f32 %v4361_v55, %v9035_v59  ;;  %v6433_v61 = vadd.f32 %v4137_v34, %v9024_v56  ;;  %v4363_v62 = vpop.f32.mrb[46].mxu1  ;;  %v4139_v36 = vpop.f32.mrb[47].mxu0  ;;  %4953 = vmatmul.mubr.bf16.gmra.mrb[72].mxu0 %v4480_v54  ;;  %v4432_v6 = vmax.f32 %v6431_v23, 0.0  ;;  %v7495_v23 = vld [vmem:[%s9442_s5 + $0x184] ss:$8 sps:$4 sm:$0xff]  }
 0x313   : > { %v6465_v37 = vadd.f32 %v4363_v62, %v9028_v57  ;;  %v6434_v0 = vadd.f32 %v4139_v36, %v9031_v58  ;;  %v4365_v2 = vpop.f32.mrb[47].mxu1  ;;  %5022 = vmatpush1.bf16.msra.mxu0 %v7481_v48  ;;  %v4434_v9 = vmax.f32 %v6463_v51, 0.0  ;;  %v4433_v10 = vmax.f32 %v6432_v53, 0.0  ;;  %v7493_v62 = vld [vmem:[%s9442_s5 + $0x180] ss:$8 sps:$4 sm:$0xff]  }
 0x314   : > { %v4436_v33 = vmax.f32 %v6433_v61, 0.0  ;;  %v6466_v7 = vadd.f32 %v4365_v2, %v9035_v59  ;;  %5023 = vmatprep.subr.bf16.mxu0 %v7486_v50  ;;  %v4435_v13 = vmax.f32 %v6464_v60, 0.0 }
 0x315   : > { %v4438_v11 = vmax.f32 %v6465_v37, 0.0  ;;  %v4437_v12 = vmax.f32 %v6434_v0, 0.0 }
 0x316   : > { %v4484_v14 = vpack.c.bf16 %v4436_v33, %v4432_v6  ;;  %v4439_v15 = vmax.f32 %v6466_v7, 0.0 }
 0x317   : > { %v9159_v16 = vpack.c.bf16 %v4438_v11, %v4434_v9  ;;  %v4485_v17 = vpack.c.bf16 %v4437_v12, %v4433_v10  ;;  %v4143_v19 = vpop.f32.mrb[48].mxu0  ;;  %5024 = vmatpush1.bf16.msra.mxu0 %v7484_v4  ;;  %v7498_v4 = vld [vmem:[%s9442_s5 + $0x194] ss:$8 sps:$4 sm:$0xff]  }
 0x318   : > { %v9164_v22 = vpack.c.bf16 %v4439_v15, %v4435_v13  ;;  %v6435_v24 = vadd.f32 %v4143_v19, %v9024_v56  ;;  %v4369_v25 = vpop.f32.mrb[48].mxu1  ;;  %v4145_v46 = vpop.f32.mrb[49].mxu0  ;;  %5025 = vmatprep.subr.bf16.mxu0 %v7489_v8 }
 0x319   : > { %v6467_v27 = vadd.f32 %v4369_v25, %v9028_v57  ;;  %v6436_v20 = vadd.f32 %v4145_v46, %v9031_v58  ;;  %v4371_v31 = vpop.f32.mrb[49].mxu1  ;;  %v4147_v38 = vpop.f32.mrb[50].mxu0  ;;  %4962 = vmatprep.mubr.bf16.mxu0 %v4485_v17  ;;  %v7496_v17 = vld [vmem:[%s9442_s5 + $0x190] ss:$8 sps:$4 sm:$0xff]   ;;  %v7501_v25 = vld [vmem:[%s9442_s5 + $0x1a4] ss:$8 sps:$4 sm:$0xff]  }
 0x31a   : > { %v6468_v18 = vadd.f32 %v4371_v31, %v9035_v59  ;;  %v6437_v5 = vadd.f32 %v4147_v38, %v9024_v56  ;;  %v4373_v40 = vpop.f32.mrb[50].mxu1  ;;  %v4149_v42 = vpop.f32.mrb[51].mxu0  ;;  %4963 = vmatmul.mubr.bf16.gmra.mrb[76].mxu0 %v4484_v14  ;;  %v4440_v41 = vmax.f32 %v6435_v24, 0.0 }
 0x31b   : > { %v6469_v3 = vadd.f32 %v4373_v40, %v9028_v57  ;;  %v6438_v54 = vadd.f32 %v4149_v42, %v9031_v58  ;;  %v4375_v43 = vpop.f32.mrb[51].mxu1  ;;  %5026 = vmatpush1.bf16.msra.mxu0 %v7487_v1  ;;  %v4442_v49 = vmax.f32 %v6467_v27, 0.0  ;;  %v4441_v21 = vmax.f32 %v6436_v20, 0.0 }
 0x31c   : > { %v4444_v47 = vmax.f32 %v6437_v5, 0.0  ;;  %v6470_v48 = vadd.f32 %v4375_v43, %v9035_v59  ;;  %5027 = vmatprep.subr.bf16.mxu0 %v7492_v26  ;;  %v4443_v53 = vmax.f32 %v6468_v18, 0.0 }
 0x31d   : > { %v4446_v50 = vmax.f32 %v6469_v3, 0.0  ;;  %v4445_v51 = vmax.f32 %v6438_v54, 0.0  ;;  %v7499_v3 = vld [vmem:[%s9442_s5 + $0x1a0] ss:$8 sps:$4 sm:$0xff]  }
 0x31e   : > { %v4488_v55 = vpack.c.bf16 %v4444_v47, %v4440_v41  ;;  %v4447_v34 = vmax.f32 %v6470_v48, 0.0  ;;  %v7504_v47 = vld [vmem:[%s9442_s5 + $0x1b4] ss:$8 sps:$4 sm:$0xff]  }
 0x31f   : > { %v9183_v35 = vpack.c.bf16 %v4446_v50, %v4442_v49  ;;  %v4489_v60 = vpack.c.bf16 %v4445_v51, %v4441_v21  ;;  %v4153_v61 = vpop.f32.mrb[52].mxu0  ;;  %5028 = vmatpush1.bf16.msra.mxu0 %v7490_v45 }
 0x320   : > { %v9188_v36 = vpack.c.bf16 %v4447_v34, %v4443_v53  ;;  %v6439_v37 = vadd.f32 %v4153_v61, %v9024_v56  ;;  %v4379_v0 = vpop.f32.mrb[52].mxu1  ;;  %v4155_v2 = vpop.f32.mrb[53].mxu0  ;;  %5029 = vmatprep.subr.bf16.mxu0 %v7495_v23 }
 0x321   : > { %v6471_v6 = vadd.f32 %v4379_v0, %v9028_v57  ;;  %v6440_v33 = vadd.f32 %v4155_v2, %v9031_v58  ;;  %v4381_v7 = vpop.f32.mrb[53].mxu1  ;;  %v4157_v8 = vpop.f32.mrb[54].mxu0  ;;  %4972 = vmatprep.mubr.bf16.mxu0 %v4489_v60 }
 0x322   : > { %v6472_v9 = vadd.f32 %v4381_v7, %v9035_v59  ;;  %v6441_v10 = vadd.f32 %v4157_v8, %v9024_v56  ;;  %v4383_v11 = vpop.f32.mrb[54].mxu1  ;;  %v4159_v12 = vpop.f32.mrb[55].mxu0  ;;  %4973 = vmatmul.mubr.bf16.gmra.mrb[80].mxu0 %v4488_v55  ;;  %v4448_v19 = vmax.f32 %v6439_v37, 0.0 }
 0x323   : > { %v6473_v13 = vadd.f32 %v4383_v11, %v9028_v57  ;;  %v6442_v14 = vadd.f32 %v4159_v12, %v9031_v58  ;;  %v4385_v15 = vpop.f32.mrb[55].mxu1  ;;  %5030 = vmatpush1.bf16.msra.mxu0 %v7493_v62  ;;  %v4450_v46 = vmax.f32 %v6471_v6, 0.0  ;;  %v4449_v26 = vmax.f32 %v6440_v33, 0.0  ;;  %v7502_v62 = vld [vmem:[%s9442_s5 + $0x1b0] ss:$8 sps:$4 sm:$0xff]  }
 0x324   : > { %v4452_v1 = vmax.f32 %v6441_v10, 0.0  ;;  %v6474_v24 = vadd.f32 %v4385_v15, %v9035_v59  ;;  %5031 = vmatprep.subr.bf16.mxu0 %v7498_v4  ;;  %v4451_v31 = vmax.f32 %v6472_v9, 0.0  ;;  %v7507_v4 = vld [vmem:[%s9442_s5 + $0x1c4] ss:$8 sps:$4 sm:$0xff]   ;;  %v7505_v15 = vld [vmem:[%s9442_s5 + $0x1c0] ss:$8 sps:$4 sm:$0xff]  }
 0x325   : > { %v4454_v27 = vmax.f32 %v6473_v13, 0.0  ;;  %v4453_v20 = vmax.f32 %v6442_v14, 0.0 }
 0x326   : > { %v4492_v38 = vpack.c.bf16 %v4452_v1, %v4448_v19  ;;  %v4455_v18 = vmax.f32 %v6474_v24, 0.0 }
 0x327   : > { %v9207_v5 = vpack.c.bf16 %v4454_v27, %v4450_v46  ;;  %v4493_v40 = vpack.c.bf16 %v4453_v20, %v4449_v26  ;;  %v4163_v42 = vpop.f32.mrb[56].mxu0  ;;  %5032 = vmatpush1.bf16.msra.mxu0 %v7496_v17 }
 0x328   : > { %v9212_v54 = vpack.c.bf16 %v4455_v18, %v4451_v31  ;;  %v6443_v43 = vadd.f32 %v4163_v42, %v9024_v56  ;;  %v4389_v45 = vpop.f32.mrb[56].mxu1  ;;  %v4165_v41 = vpop.f32.mrb[57].mxu0  ;;  %5033 = vmatprep.subr.bf16.mxu0 %v7501_v25  ;;  %v7510_v25 = vld [vmem:[%s9442_s5 + $0x1d4] ss:$8 sps:$4 sm:$0xff]  }
 0x329   : > { %v6475_v48 = vadd.f32 %v4389_v45, %v9028_v57  ;;  %v6444_v23 = vadd.f32 %v4165_v41, %v9031_v58  ;;  %v4391_v49 = vpop.f32.mrb[57].mxu1  ;;  %v4167_v21 = vpop.f32.mrb[58].mxu0  ;;  %4982 = vmatprep.mubr.bf16.mxu0 %v4493_v40  ;;  %v7508_v45 = vld [vmem:[%s9442_s5 + $0x1d0] ss:$8 sps:$4 sm:$0xff]  }
 0x32a   : > { %v6476_v50 = vadd.f32 %v4391_v49, %v9035_v59  ;;  %v6445_v51 = vadd.f32 %v4167_v21, %v9024_v56  ;;  %v4393_v53 = vpop.f32.mrb[58].mxu1  ;;  %v4169_v55 = vpop.f32.mrb[59].mxu0  ;;  %4983 = vmatmul.mubr.bf16.gmra.mrb[84].mxu0 %v4492_v38  ;;  %v4456_v37 = vmax.f32 %v6443_v43, 0.0 }
 0x32b   : > { %v6477_v34 = vadd.f32 %v4393_v53, %v9028_v57  ;;  %v6446_v60 = vadd.f32 %v4169_v55, %v9031_v58  ;;  %v4395_v61 = vpop.f32.mrb[59].mxu1  ;;  %5034 = vmatpush1.bf16.msra.mxu0 %v7499_v3  ;;  %v4458_v6 = vmax.f32 %v6475_v48, 0.0  ;;  %v4457_v33 = vmax.f32 %v6444_v23, 0.0 }
 0x32c   : > { %v4460_v0 = vmax.f32 %v6445_v51, 0.0  ;;  %v6478_v2 = vadd.f32 %v4395_v61, %v9035_v59  ;;  %5035 = vmatprep.subr.bf16.mxu0 %v7504_v47  ;;  %v4459_v9 = vmax.f32 %v6476_v50, 0.0  ;;  %v7514_v61 = vld [vmem:[%s9442_s5 + $0x1f0] ss:$8 sps:$4 sm:$0xff]  }
 0x32d   : > { %v4462_v7 = vmax.f32 %v6477_v34, 0.0  ;;  %v4461_v8 = vmax.f32 %v6446_v60, 0.0  ;;  %v7511_v34 = vld [vmem:[%s9442_s5 + $0x1e0] ss:$8 sps:$4 sm:$0xff]   ;;  %v7516_v60 = vld [vmem:[%s9442_s5 + $0x1f4] ss:$8 sps:$4 sm:$0xff]  }
 0x32e   : > { %v4496_v10 = vpack.c.bf16 %v4460_v0, %v4456_v37  ;;  %v4463_v11 = vmax.f32 %v6478_v2, 0.0 }
 0x32f   : > { %v9231_v12 = vpack.c.bf16 %v4462_v7, %v4458_v6  ;;  %v4497_v13 = vpack.c.bf16 %v4461_v8, %v4457_v33  ;;  %v4173_v14 = vpop.f32.mrb[60].mxu0  ;;  %5036 = vmatpush1.bf16.msra.mxu0 %v7502_v62 }
 0x330   : > { %v4499_v17 = vpack.c.bf16 %v4463_v11, %v4459_v9  ;;  %v6447_v19 = vadd.f32 %v4173_v14, %v9024_v56  ;;  %v4399_v1 = vpop.f32.mrb[60].mxu1  ;;  %v4175_v24 = vpop.f32.mrb[61].mxu0  ;;  %5037 = vmatprep.subr.bf16.mxu0 %v7507_v4  ;;  %v7534_v9 = vld [vmem:[%s9446_s9 + $0x8] sm:$0xff]  }
 0x331   : > { %v6479_v46 = vadd.f32 %v4399_v1, %v9028_v57  ;;  %v6448_v26 = vadd.f32 %v4175_v24, %v9031_v58  ;;  %v4401_v27 = vpop.f32.mrb[61].mxu1  ;;  %v4177_v20 = vpop.f32.mrb[62].mxu0  ;;  %4992 = vmatprep.mubr.bf16.mxu0 %v4497_v13 }
 0x332   : > { %v6480_v31 = vadd.f32 %v4401_v27, %v9035_v59  ;;  %v6449_v38 = vadd.f32 %v4177_v20, %v9024_v56  ;;  %v4403_v18 = vpop.f32.mrb[62].mxu1  ;;  %v4179_v40 = vpop.f32.mrb[63].mxu0  ;;  %4993 = vmatmul.mubr.bf16.gmra.mrb[88].mxu0 %v4496_v10  ;;  %v4464_v41 = vmax.f32 %v6447_v19, 0.0  ;;  %v7513_v56 = vld [vmem:[%s9442_s5 + $0x1e4] ss:$8 sps:$4 sm:$0xff]  }
 0x333   : > { %v6481_v42 = vadd.f32 %v4403_v18, %v9028_v57  ;;  %v6450_v3 = vadd.f32 %v4179_v40, %v9031_v58  ;;  %v4405_v43 = vpop.f32.mrb[63].mxu1  ;;  %5038 = vmatpush1.bf16.msra.mxu0 %v7505_v15  ;;  %v4466_v23 = vmax.f32 %v6479_v46, 0.0  ;;  %v4465_v49 = vmax.f32 %v6448_v26, 0.0 }
 0x334   : > { %v4468_v47 = vmax.f32 %v6449_v38, 0.0  ;;  %v6482_v48 = vadd.f32 %v4405_v43, %v9035_v59  ;;  %5039 = vmatprep.subr.bf16.mxu0 %v7510_v25  ;;  %v4467_v58 = vmax.f32 %v6480_v31, 0.0 }
 0x335   : > { %v4470_v57 = vmax.f32 %v6481_v42, 0.0  ;;  %v4469_v21 = vmax.f32 %v6450_v3, 0.0 }
 0x336   : > { %v4500_v50 = vpack.c.bf16 %v4468_v47, %v4464_v41  ;;  %v4471_v51 = vmax.f32 %v6482_v48, 0.0 }
 0x337   : > { %v4502_v53 = vpack.c.bf16 %v4470_v57, %v4466_v23  ;;  %v4501_v55 = vpack.c.bf16 %v4469_v21, %v4465_v49  ;;  %5040 = vmatpush1.bf16.msra.mxu0 %v7508_v45 }
 0x338   : > { %v4503_v59 = vpack.c.bf16 %v4471_v51, %v4467_v58  ;;  %5041 = vmatprep.subr.bf16.mxu0 %v7513_v56 }
 0x339   : > { %5002 = vmatprep.mubr.bf16.mxu0 %v4501_v55 }
 0x33a   : > { %5003 = vmatmul.mubr.bf16.gmra.mrb[92].mxu0 %v4500_v50 }
 0x33b   : > { %5042 = vmatpush1.bf16.msra.mxu0 %v7511_v34  ;;  %5045 = vmatprep.mubr.bf16.mxu0 %v9065_v44  ;;  %v7532_v44 = vld [vmem:[%s9444_s7 + $0x38] sm:$0xff]  }
 0x33c   : > { %5043 = vmatprep.subr.bf16.mxu0 %v7516_v60 }
 0x33f   : > { %5044 = vmatpush1.bf16.msra.mxu0 %v7514_v61 }
 0x342   : > { %5046 = vmatmul.mubr.bf16.vlgmr.msra.gmra.mrb[64].mxu0 %v9060_v63  ;;  %v7531_v63 = vld [vmem:[%s9444_s7 + $0x78] sm:$0xff]  }
 0x343   : > { %5055 = vmatprep.mubr.bf16.mxu0 %v9101_v28  ;;  %6257 = vmatprep.subr.bf16.mxu1 %v7531_v63  ;;  %v4568_v28 = vld [vmem:[%s9443_s6] sm:$0x3] }
 0x344   : > { %6258 = vmatpush3.bf16.msra.mxu1 %v7532_v44 }
 0x34a   : > { %5056 = vmatmul.mubr.bf16.gmra.mrb[68].mxu0 %v9096_v30  ;;  %v7533_v30 = vld [vmem:[%s9446_s9] sm:$0xff]  }
 0x34b   : > { %5065 = vmatprep.mubr.bf16.mxu0 %v9137_v39  ;;  %6323 = vmatprep.subr.bf16.mxu1 %v7533_v30  ;;  %v9291_v39 = vrot.slane %v4568_v28, %v8590_v32 }
 0x352   : > { %5066 = vmatmul.mubr.bf16.gmra.mrb[72].mxu0 %v9132_v52  ;;  %v9288_v52 = vrot.slane %v4568_v28, %v8583_v29 }
 0x353   : > { %5075 = vmatprep.mubr.bf16.mxu0 %v9164_v22 }
 0x35a   : > { %5076 = vmatmul.mubr.bf16.gmra.mrb[76].mxu0 %v9159_v16 }
 0x35b   : > { %5085 = vmatprep.mubr.bf16.mxu0 %v9188_v36 }
 0x362   : > { %5086 = vmatmul.mubr.bf16.gmra.mrb[80].mxu0 %v9183_v35 }
 0x363   : > { %5095 = vmatprep.mubr.bf16.mxu0 %v9212_v54 }
 0x36a   : > { %5096 = vmatmul.mubr.bf16.gmra.mrb[84].mxu0 %v9207_v5 }
 0x36b   : > { %5105 = vmatprep.mubr.bf16.mxu0 %v4499_v17 }
 0x372   : > { %5106 = vmatmul.mubr.bf16.gmra.mrb[88].mxu0 %v9231_v12 }
 0x373   : > { %5115 = vmatprep.mubr.bf16.mxu0 %v4503_v59 }
 0x37a   : > { %5116 = vmatmul.mubr.bf16.gmra.mrb[92].mxu0 %v4502_v53 }
 0x415   : > { %v5047_v16 = vpop.f32.mrb[64].mxu0 }
 0x416   : > { %v6483_v22 = vadd.f32 %v5047_v16, %v9288_v52  ;;  %v5049_v35 = vpop.f32.mrb[65].mxu0 }
 0x417   : > { %v6484_v36 = vadd.f32 %v5049_v35, %v9291_v39  ;;  %v5051_v5 = vpop.f32.mrb[66].mxu0 }
 0x418   : > { %v6485_v54 = vadd.f32 %v5051_v5, %v9288_v52  ;;  %v5053_v62 = vpop.f32.mrb[67].mxu0  ;;  %v5126_v0 = vmax.f32 %v6483_v22, 0.0 }
 0x419   : > { %v6486_v37 = vadd.f32 %v5053_v62, %v9291_v39  ;;  %v5127_v4 = vmax.f32 %v6484_v36, 0.0 }
 0x41a   : > { %v5128_v2 = vmax.f32 %v6485_v54, 0.0 }
 0x41b   : > { %v5129_v29 = vmax.f32 %v6486_v37, 0.0 }
 0x41c   : > { %v5158_v6 = vpack.c.bf16 %v5128_v2, %v5126_v0 }
 0x41d   : > { %v5159_v33 = vpack.c.bf16 %v5129_v29, %v5127_v4  ;;  %v5057_v32 = vpop.f32.mrb[68].mxu0 }
 0x41e   : > { %v6487_v7 = vadd.f32 %v5057_v32, %v9288_v52  ;;  %v5059_v8 = vpop.f32.mrb[69].mxu0 }
 0x41f   : > { %v6488_v10 = vadd.f32 %v5059_v8, %v9291_v39  ;;  %v5061_v11 = vpop.f32.mrb[70].mxu0  ;;  %5341 = vmatprep.mubr.bf16.mxu1 %v5159_v33 }
 0x420   : > { %v6489_v12 = vadd.f32 %v5061_v11, %v9288_v52  ;;  %v5063_v13 = vpop.f32.mrb[71].mxu0  ;;  %5342 = vmatmul.mubr.bf16.vlgmr.msra.gmra.mrb[64].mxu1 %v5158_v6  ;;  %v5130_v15 = vmax.f32 %v6487_v7, 0.0 }
 0x421   : > { %v6490_v14 = vadd.f32 %v5063_v13, %v9291_v39  ;;  %6324 = vmatpush3.bf16.msra.mxu1 %v7533_v30  ;;  %v5131_v19 = vmax.f32 %v6488_v10, 0.0 }
 0x422   : > { %v5132_v17 = vmax.f32 %v6489_v12, 0.0  ;;  %6325 = vmatprep.subr.bf16.mxu1 %v7534_v9 }
 0x423   : > { %v5133_v1 = vmax.f32 %v6490_v14, 0.0 }
 0x424   : > { %v5160_v24 = vpack.c.bf16 %v5132_v17, %v5130_v15 }
 0x425   : > { %v5161_v25 = vpack.c.bf16 %v5133_v1, %v5131_v19  ;;  %v5067_v46 = vpop.f32.mrb[72].mxu0  ;;  %6326 = vmatpush3.bf16.msra.mxu1 %v7534_v9 }
 0x426   : > { %v6491_v26 = vadd.f32 %v5067_v46, %v9288_v52  ;;  %v5069_v27 = vpop.f32.mrb[73].mxu0 }
 0x427   : > { %v6492_v20 = vadd.f32 %v5069_v27, %v9291_v39  ;;  %v5071_v31 = vpop.f32.mrb[74].mxu0  ;;  %5349 = vmatprep.mubr.bf16.mxu1 %v5161_v25 }
 0x428   : > { %v6493_v38 = vadd.f32 %v5071_v31, %v9288_v52  ;;  %v5073_v18 = vpop.f32.mrb[75].mxu0  ;;  %5350 = vmatmul.mubr.bf16.gmra.mrb[68].mxu1 %v5160_v24  ;;  %v5134_v42 = vmax.f32 %v6491_v26, 0.0 }
 0x429   : > { %v6494_v40 = vadd.f32 %v5073_v18, %v9291_v39  ;;  %v5135_v43 = vmax.f32 %v6492_v20, 0.0 }
 0x42a   : > { %v5136_v3 = vmax.f32 %v6493_v38, 0.0 }
 0x42b   : > { %v5137_v45 = vmax.f32 %v6494_v40, 0.0 }
 0x42c   : > { %v5162_v41 = vpack.c.bf16 %v5136_v3, %v5134_v42 }
 0x42d   : > { %v5163_v47 = vpack.c.bf16 %v5137_v45, %v5135_v43  ;;  %v5077_v48 = vpop.f32.mrb[76].mxu0 }
 0x42e   : > { %v6495_v56 = vadd.f32 %v5077_v48, %v9288_v52  ;;  %v5079_v23 = vpop.f32.mrb[77].mxu0 }
 0x42f   : > { %v6496_v49 = vadd.f32 %v5079_v23, %v9291_v39  ;;  %v5081_v57 = vpop.f32.mrb[78].mxu0  ;;  %5357 = vmatprep.mubr.bf16.mxu1 %v5163_v47 }
 0x430   : > { %v6497_v21 = vadd.f32 %v5081_v57, %v9288_v52  ;;  %v5083_v58 = vpop.f32.mrb[79].mxu0  ;;  %5358 = vmatmul.mubr.bf16.gmra.mrb[72].mxu1 %v5162_v41  ;;  %v5138_v51 = vmax.f32 %v6495_v56, 0.0 }
 0x431   : > { %v6498_v50 = vadd.f32 %v5083_v58, %v9291_v39  ;;  %v5139_v55 = vmax.f32 %v6496_v49, 0.0 }
 0x432   : > { %v5140_v53 = vmax.f32 %v6497_v21, 0.0 }
 0x433   : > { %v5141_v34 = vmax.f32 %v6498_v50, 0.0 }
 0x434   : > { %v5164_v59 = vpack.c.bf16 %v5140_v53, %v5138_v51  ;;  %v7535_v51 = vld [vmem:[%s9446_s9 + $0x10] sm:$0xff]   ;;  %v7538_v53 = vld [vmem:[%s9446_s9 + $0x28] sm:$0xff]  }
 0x435   : > { %v5165_v60 = vpack.c.bf16 %v5141_v34, %v5139_v55  ;;  %v5087_v61 = vpop.f32.mrb[80].mxu0  ;;  %6327 = vmatprep.subr.bf16.mxu1 %v7535_v51  ;;  %v7539_v55 = vld [vmem:[%s9446_s9 + $0x30] sm:$0xff]   ;;  %v7540_v34 = vld [vmem:[%s9446_s9 + $0x38] sm:$0xff]  }
 0x436   : > { %v6499_v63 = vadd.f32 %v5087_v61, %v9288_v52  ;;  %v5089_v44 = vpop.f32.mrb[81].mxu0  ;;  %6328 = vmatpush3.bf16.msra.mxu1 %v7535_v51 }
 0x437   : > { %v6500_v30 = vadd.f32 %v5089_v44, %v9291_v39  ;;  %v5091_v28 = vpop.f32.mrb[82].mxu0  ;;  %5365 = vmatprep.mubr.bf16.mxu1 %v5165_v60  ;;  %v9349_v60 = vld [vmem:[%s9445_s8] ss:$0 sm:$0xff] }
 0x438   : > { %v6501_v16 = vadd.f32 %v5091_v28, %v9288_v52  ;;  %v5093_v22 = vpop.f32.mrb[83].mxu0  ;;  %5366 = vmatmul.mubr.bf16.gmra.mrb[76].mxu1 %v5164_v59  ;;  %v5142_v36 = vmax.f32 %v6499_v63, 0.0 }
 0x439   : > { %v6502_v35 = vadd.f32 %v5093_v22, %v9291_v39  ;;  %v5143_v54 = vmax.f32 %v6500_v30, 0.0  ;;  %v9354_v30 = vld [vmem:[%s9448_s11] ss:$0 sm:$0xff] }
 0x43a   : > { %v5144_v5 = vmax.f32 %v6501_v16, 0.0 }
 0x43b   : > { %v5145_v62 = vmax.f32 %v6502_v35, 0.0  ;;  %v9360_v35 = vld [vmem:[%s9449_s12] ss:$0 sm:$0xff] }
 0x43c   : > { %v5166_v37 = vpack.c.bf16 %v5144_v5, %v5142_v36 }
 0x43d   : > { %v5167_v0 = vpack.c.bf16 %v5145_v62, %v5143_v54  ;;  %v5097_v2 = vpop.f32.mrb[84].mxu0 }
 0x43e   : > { %v6503_v4 = vadd.f32 %v5097_v2, %v9288_v52  ;;  %v5099_v29 = vpop.f32.mrb[85].mxu0 }
 0x43f   : > { %v6504_v6 = vadd.f32 %v5099_v29, %v9291_v39  ;;  %v5101_v33 = vpop.f32.mrb[86].mxu0  ;;  %5373 = vmatprep.mubr.bf16.mxu1 %v5167_v0 }
 0x440   : > { %v6505_v32 = vadd.f32 %v5101_v33, %v9288_v52  ;;  %v5103_v7 = vpop.f32.mrb[87].mxu0  ;;  %5374 = vmatmul.mubr.bf16.gmra.mrb[80].mxu1 %v5166_v37  ;;  %v5146_v9 = vmax.f32 %v6503_v4, 0.0 }
 0x441   : > { %v6506_v8 = vadd.f32 %v5103_v7, %v9291_v39  ;;  %v5147_v11 = vmax.f32 %v6504_v6, 0.0 }
 0x442   : > { %v5148_v10 = vmax.f32 %v6505_v32, 0.0 }
 0x443   : > { %v5149_v12 = vmax.f32 %v6506_v8, 0.0 }
 0x444   : > { %v5168_v13 = vpack.c.bf16 %v5148_v10, %v5146_v9 }
 0x445   : > { %v5169_v14 = vpack.c.bf16 %v5149_v12, %v5147_v11  ;;  %v5107_v15 = vpop.f32.mrb[88].mxu0 }
 0x446   : > { %v6507_v17 = vadd.f32 %v5107_v15, %v9288_v52  ;;  %v5109_v19 = vpop.f32.mrb[89].mxu0 }
 0x447   : > { %v6508_v1 = vadd.f32 %v5109_v19, %v9291_v39  ;;  %v5111_v24 = vpop.f32.mrb[90].mxu0  ;;  %5381 = vmatprep.mubr.bf16.mxu1 %v5169_v14 }
 0x448   : > { %v6509_v25 = vadd.f32 %v5111_v24, %v9288_v52  ;;  %v5113_v46 = vpop.f32.mrb[91].mxu0  ;;  %5382 = vmatmul.mubr.bf16.gmra.mrb[84].mxu1 %v5168_v13  ;;  %v5150_v27 = vmax.f32 %v6507_v17, 0.0 }
 0x449   : > { %v6510_v26 = vadd.f32 %v5113_v46, %v9291_v39  ;;  %v5151_v31 = vmax.f32 %v6508_v1, 0.0 }
 0x44a   : > { %v5152_v20 = vmax.f32 %v6509_v25, 0.0 }
 0x44b   : > { %v5153_v38 = vmax.f32 %v6510_v26, 0.0 }
 0x44c   : > { %v5170_v18 = vpack.c.bf16 %v5152_v20, %v5150_v27 }
 0x44d   : > { %v5171_v40 = vpack.c.bf16 %v5153_v38, %v5151_v31  ;;  %v5117_v42 = vpop.f32.mrb[92].mxu0 }
 0x44e   : > { %v6511_v3 = vadd.f32 %v5117_v42, %v9288_v52  ;;  %v5119_v43 = vpop.f32.mrb[93].mxu0 }
 0x44f   : > { %v6512_v45 = vadd.f32 %v5119_v43, %v9291_v39  ;;  %v5121_v41 = vpop.f32.mrb[94].mxu0  ;;  %5389 = vmatprep.mubr.bf16.mxu1 %v5171_v40 }
 0x450   : > { %v6513_v47 = vadd.f32 %v5121_v41, %v9288_v52  ;;  %v5123_v48 = vpop.f32.mrb[95].mxu0  ;;  %5390 = vmatmul.mubr.bf16.gmra.mrb[88].mxu1 %v5170_v18  ;;  %v5154_v23 = vmax.f32 %v6511_v3, 0.0  ;;  %v7536_v52 = vld [vmem:[%s9446_s9 + $0x18] sm:$0xff]  }
 0x451   : > { %v6514_v56 = vadd.f32 %v5123_v48, %v9291_v39  ;;  %v5155_v57 = vmax.f32 %v6512_v45, 0.0  ;;  %6329 = vmatprep.subr.bf16.mxu1 %v7536_v52  ;;  %v7537_v39 = vld [vmem:[%s9446_s9 + $0x20] sm:$0xff]  }
 0x452   : > { %v5156_v49 = vmax.f32 %v6513_v47, 0.0  ;;  %6330 = vmatpush3.bf16.msra.mxu1 %v7536_v52 }
 0x453   : > { %v5157_v21 = vmax.f32 %v6514_v56, 0.0  ;;  %6331 = vmatprep.subr.bf16.mxu1 %v7537_v39 }
 0x454   : > { %v5172_v58 = vpack.c.bf16 %v5156_v49, %v5154_v23 }
 0x455   : > { %v5173_v50 = vpack.c.bf16 %v5157_v21, %v5155_v57 }
 0x456   : > { %6332 = vmatpush3.bf16.msra.mxu1 %v7537_v39 }
 0x457   : > { %5397 = vmatprep.mubr.bf16.mxu1 %v5173_v50  ;;  %6333 = vmatprep.subr.bf16.mxu1 %v7538_v53 }
 0x458   : > { %5398 = vmatmul.mubr.bf16.gmra.mrb[92].mxu1 %v5172_v58 }
 0x45a   : > { %6334 = vmatpush3.bf16.msra.mxu1 %v7538_v53 }
 0x45b   : > { %6335 = vmatprep.subr.bf16.mxu1 %v7539_v55 }
 0x45e   : > { %6336 = vmatpush3.bf16.msra.mxu1 %v7539_v55 }
 0x45f   : > { %6337 = vmatprep.subr.bf16.mxu1 %v7540_v34 }
 0x462   : > { %6338 = vmatpush3.bf16.msra.mxu1 %v7540_v34 }
 0x4f3   : > { %v6259_v59 = vpop.f32.mrb[64].mxu1 }
 0x4f4   : > { %v6260_v61 = vpop.f32.mrb[65].mxu1 }
 0x4f5   : > { %v6261_v63 = vadd.f32 %v6260_v61, %v6259_v59  ;;  %v6262_v44 = vpop.f32.mrb[66].mxu1 }
 0x4f6   : > { %v6263_v28 = vpop.f32.mrb[67].mxu1 }
 0x4f7   : > { %v5344_v16 = vadd.f32 %v6261_v63, %v9349_v60  ;;  %v6264_v22 = vadd.f32 %v6263_v28, %v6262_v44 }
 0x4f9   : > { %v5413_v36 = vmul.f32 %v9354_v30, %v5344_v16  ;;  %v5347_v5 = vadd.f32 %v6264_v22, %v9349_v60 }
 0x4fb   : > { %v5414_v54 = vmul.f32 %v9354_v30, %v5347_v5  ;;  %v6265_v62 = vpop.f32.mrb[68].mxu1  ;;  %v5436_v37 = vadd.f32 %v9360_v35, %v5413_v36 }
 0x4fc   : > { %v6266_v0 = vpop.f32.mrb[69].mxu1 }
 0x4fd   : > { %v6267_v2 = vadd.f32 %v6266_v0, %v6265_v62  ;;  %v6268_v4 = vpop.f32.mrb[70].mxu1  ;;  %v5437_v29 = vadd.f32 %v9360_v35, %v5414_v54  ;;  %v5452_v7 = vmax.f32 %v5436_v37, 0.0 }
 0x4fe   : > { %v6269_v6 = vpop.f32.mrb[71].mxu1 }
 0x4ff   : > { %v5352_v33 = vadd.f32 %v6267_v2, %v9349_v60  ;;  %v6270_v32 = vadd.f32 %v6269_v6, %v6268_v4  ;;  %v5453_v8 = vmax.f32 %v5437_v29, 0.0 }
 0x501   : > { %v5415_v9 = vmul.f32 %v9354_v30, %v5352_v33  ;;  %v5355_v10 = vadd.f32 %v6270_v32, %v9349_v60  ;;  %v5468_v11 = vpack.c.bf16 %v5453_v8, %v5452_v7 }
 0x503   : > { %v5438_v12 = vadd.f32 %v9360_v35, %v5415_v9  ;;  %v5416_v13 = vmul.f32 %v9354_v30, %v5355_v10  ;;  %v6271_v14 = vpop.f32.mrb[72].mxu1  ;;  %6339 = vmatprep.mubr.bf16.mxu1 %v5468_v11 }
 0x504   : > { %v6272_v15 = vpop.f32.mrb[73].mxu1 }
 0x505   : > { %v5439_v17 = vadd.f32 %v9360_v35, %v5416_v13  ;;  %v6273_v19 = vadd.f32 %v6272_v15, %v6271_v14  ;;  %v6274_v1 = vpop.f32.mrb[74].mxu1  ;;  %v5454_v25 = vmax.f32 %v5438_v12, 0.0 }
 0x506   : > { %v6275_v24 = vpop.f32.mrb[75].mxu1 }
 0x507   : > { %v5455_v46 = vmax.f32 %v5439_v17, 0.0  ;;  %v5360_v26 = vadd.f32 %v6273_v19, %v9349_v60  ;;  %v6276_v27 = vadd.f32 %v6275_v24, %v6274_v1 }
 0x509   : > { %v5469_v20 = vpack.c.bf16 %v5455_v46, %v5454_v25  ;;  %v5417_v31 = vmul.f32 %v9354_v30, %v5360_v26  ;;  %v5363_v38 = vadd.f32 %v6276_v27, %v9349_v60 }
 0x50b   : > { %v5418_v18 = vmul.f32 %v9354_v30, %v5363_v38  ;;  %v6277_v40 = vpop.f32.mrb[76].mxu1  ;;  %6340 = vmatmul.mubr.bf16.vlgmr.msra.gmra.mrb[96].mxu1 %v5469_v20  ;;  %v5440_v42 = vadd.f32 %v9360_v35, %v5417_v31 }
 0x50c   : > { %v6278_v3 = vpop.f32.mrb[77].mxu1 }
 0x50d   : > { %v6279_v43 = vadd.f32 %v6278_v3, %v6277_v40  ;;  %v6280_v45 = vpop.f32.mrb[78].mxu1  ;;  %v5441_v41 = vadd.f32 %v9360_v35, %v5418_v18  ;;  %v5456_v23 = vmax.f32 %v5440_v42, 0.0 }
 0x50e   : > { %v6281_v47 = vpop.f32.mrb[79].mxu1 }
 0x50f   : > { %v5368_v48 = vadd.f32 %v6279_v43, %v9349_v60  ;;  %v6282_v56 = vadd.f32 %v6281_v47, %v6280_v45  ;;  %v5457_v49 = vmax.f32 %v5441_v41, 0.0 }
 0x511   : > { %v5419_v57 = vmul.f32 %v9354_v30, %v5368_v48  ;;  %v5371_v21 = vadd.f32 %v6282_v56, %v9349_v60  ;;  %v5470_v58 = vpack.c.bf16 %v5457_v49, %v5456_v23 }
 0x513   : > { %v5420_v50 = vmul.f32 %v9354_v30, %v5371_v21  ;;  %v6283_v51 = vpop.f32.mrb[80].mxu1  ;;  %6343 = vmatprep.mubr.bf16.mxu1 %v5470_v58  ;;  %v5442_v52 = vadd.f32 %v9360_v35, %v5419_v57 }
 0x514   : > { %v6284_v39 = vpop.f32.mrb[81].mxu1 }
 0x515   : > { %v6285_v53 = vadd.f32 %v6284_v39, %v6283_v51  ;;  %v6286_v55 = vpop.f32.mrb[82].mxu1  ;;  %v5443_v34 = vadd.f32 %v9360_v35, %v5420_v50  ;;  %v5458_v44 = vmax.f32 %v5442_v52, 0.0 }
 0x516   : > { %v6287_v59 = vpop.f32.mrb[83].mxu1 }
 0x517   : > { %v5376_v61 = vadd.f32 %v6285_v53, %v9349_v60  ;;  %v6288_v63 = vadd.f32 %v6287_v59, %v6286_v55  ;;  %v5459_v28 = vmax.f32 %v5443_v34, 0.0  ;;  %v6232_v55 = vld [vmem:[%s9447_s10] ss:$0 sm:$0xff] }
 0x519   : > { %v5421_v16 = vmul.f32 %v9354_v30, %v5376_v61  ;;  %v5379_v22 = vadd.f32 %v6288_v63, %v9349_v60  ;;  %v5471_v36 = vpack.c.bf16 %v5459_v28, %v5458_v44 }
 0x51b   : > { %v5422_v5 = vmul.f32 %v9354_v30, %v5379_v22  ;;  %v6289_v54 = vpop.f32.mrb[84].mxu1  ;;  %6344 = vmatmul.mubr.bf16.gmra.mrb[100].mxu1 %v5471_v36  ;;  %v5444_v62 = vadd.f32 %v9360_v35, %v5421_v16 }
 0x51c   : > { %v6290_v37 = vpop.f32.mrb[85].mxu1 }
 0x51d   : > { %v6291_v0 = vadd.f32 %v6290_v37, %v6289_v54  ;;  %v6292_v2 = vpop.f32.mrb[86].mxu1  ;;  %v5445_v4 = vadd.f32 %v9360_v35, %v5422_v5  ;;  %v5460_v32 = vmax.f32 %v5444_v62, 0.0 }
 0x51e   : > { %v6293_v29 = vpop.f32.mrb[87].mxu1 }
 0x51f   : > { %v5384_v6 = vadd.f32 %v6291_v0, %v9349_v60  ;;  %v6294_v33 = vadd.f32 %v6293_v29, %v6292_v2  ;;  %v5461_v7 = vmax.f32 %v5445_v4, 0.0 }
 0x521   : > { %v5423_v8 = vmul.f32 %v9354_v30, %v5384_v6  ;;  %v5387_v9 = vadd.f32 %v6294_v33, %v9349_v60  ;;  %v5472_v10 = vpack.c.bf16 %v5461_v7, %v5460_v32 }
 0x523   : > { %v5424_v11 = vmul.f32 %v9354_v30, %v5387_v9  ;;  %v6295_v12 = vpop.f32.mrb[88].mxu1  ;;  %6347 = vmatprep.mubr.bf16.mxu1 %v5472_v10  ;;  %v5446_v13 = vadd.f32 %v9360_v35, %v5423_v8 }
 0x524   : > { %v6296_v14 = vpop.f32.mrb[89].mxu1 }
 0x525   : > { %v6297_v15 = vadd.f32 %v6296_v14, %v6295_v12  ;;  %v6298_v17 = vpop.f32.mrb[90].mxu1  ;;  %v5447_v19 = vadd.f32 %v9360_v35, %v5424_v11  ;;  %v5462_v46 = vmax.f32 %v5446_v13, 0.0 }
 0x526   : > { %v6299_v1 = vpop.f32.mrb[91].mxu1 }
 0x527   : > { %v5392_v24 = vadd.f32 %v6297_v15, %v9349_v60  ;;  %v6300_v25 = vadd.f32 %v6299_v1, %v6298_v17  ;;  %v5463_v26 = vmax.f32 %v5447_v19, 0.0 }
 0x529   : > { %v5425_v27 = vmul.f32 %v9354_v30, %v5392_v24  ;;  %v5395_v20 = vadd.f32 %v6300_v25, %v9349_v60  ;;  %v5473_v31 = vpack.c.bf16 %v5463_v26, %v5462_v46 }
 0x52b   : > { %v5426_v38 = vmul.f32 %v9354_v30, %v5395_v20  ;;  %v6301_v18 = vpop.f32.mrb[92].mxu1  ;;  %6348 = vmatmul.mubr.bf16.gmra.mrb[104].mxu1 %v5473_v31  ;;  %v5448_v40 = vadd.f32 %v9360_v35, %v5425_v27 }
 0x52c   : > { %v6302_v42 = vpop.f32.mrb[93].mxu1 }
 0x52d   : > { %v6303_v3 = vadd.f32 %v6302_v42, %v6301_v18  ;;  %v6304_v43 = vpop.f32.mrb[94].mxu1  ;;  %v5449_v45 = vadd.f32 %v9360_v35, %v5426_v38  ;;  %v5464_v56 = vmax.f32 %v5448_v40, 0.0 }
 0x52e   : > { %v6305_v41 = vpop.f32.mrb[95].mxu1 }
 0x52f   : > { %v5400_v47 = vadd.f32 %v6303_v3, %v9349_v60  ;;  %v6306_v48 = vadd.f32 %v6305_v41, %v6304_v43  ;;  %v5465_v23 = vmax.f32 %v5449_v45, 0.0 }
 0x531   : > { %v5427_v49 = vmul.f32 %v9354_v30, %v5400_v47  ;;  %v5403_v57 = vadd.f32 %v6306_v48, %v9349_v60  ;;  %v5474_v21 = vpack.c.bf16 %v5465_v23, %v5464_v56 }
 0x533   : > { %v5428_v58 = vmul.f32 %v9354_v30, %v5403_v57  ;;  %6351 = vmatprep.mubr.bf16.mxu1 %v5474_v21  ;;  %v5450_v50 = vadd.f32 %v9360_v35, %v5427_v49 }
 0x535   : > { %v5451_v51 = vadd.f32 %v9360_v35, %v5428_v58  ;;  %v5466_v52 = vmax.f32 %v5450_v50, 0.0 }
 0x537   : > { %v5467_v39 = vmax.f32 %v5451_v51, 0.0 }
 0x539   : > { %v5475_v53 = vpack.c.bf16 %v5467_v39, %v5466_v52 }
 0x53b   : > { %6352 = vmatmul.mubr.bf16.gmra.mrb[108].mxu1 %v5475_v53 }
 0x5de   : > { %v6341_v34 = vpop.f32.mrb[96].mxu1 }
 0x5df   : > { %v5590_v59 = vadd.f32 %v6341_v34, %v6232_v55  ;;  %v5581_v60 = vpop.f32.mrb[97].mxu1 }
 0x5e0   : > { %v5582_v30 = vadd.f32 %v6232_v55, %v5581_v60  ;;  %v6342_v35 = vpop.f32.mrb[98].mxu1 }
 0x5e1   : > { %v5646_v61 = vmax.f32 %v5590_v59, 0.0  ;;  %v5593_v63 = vadd.f32 %v6342_v35, %v6232_v55  ;;  %v5584_v44 = vpop.f32.mrb[99].mxu1 }
 0x5e2   : > { %v5644_v28 = vmax.f32 %v5582_v30, 0.0  ;;  %v5585_v16 = vadd.f32 %v6232_v55, %v5584_v44 }
 0x5e3   : > { %5662 = vst [vmem:[%s9416_s16 + $0x10] sm:$0xff] %v5646_v61  ;;  %v5647_v22 = vmax.f32 %v5593_v63, 0.0 }
 0x5e4   : > { %5660 = vst [vmem:[%s9416_s16] sm:$0xff] %v5644_v28  ;;  %v5645_v36 = vmax.f32 %v5585_v16, 0.0 }
 0x5e5   : > { %5663 = vst [vmem:[%s9416_s16 + $0x18] sm:$0xff] %v5647_v22 }
 0x5e6   : > { %5661 = vst [vmem:[%s9416_s16 + $0x8] sm:$0xff] %v5645_v36 }
 0x5ee   : > { %v6345_v5 = vpop.f32.mrb[100].mxu1 }
 0x5ef   : > { %v5606_v54 = vadd.f32 %v6345_v5, %v6232_v55  ;;  %v5597_v62 = vpop.f32.mrb[101].mxu1 }
 0x5f0   : > { %v5598_v37 = vadd.f32 %v6232_v55, %v5597_v62  ;;  %v6346_v0 = vpop.f32.mrb[102].mxu1 }
 0x5f1   : > { %v5650_v2 = vmax.f32 %v5606_v54, 0.0  ;;  %v5609_v4 = vadd.f32 %v6346_v0, %v6232_v55  ;;  %v5600_v29 = vpop.f32.mrb[103].mxu1 }
 0x5f2   : > { %v5648_v6 = vmax.f32 %v5598_v37, 0.0  ;;  %v5601_v33 = vadd.f32 %v6232_v55, %v5600_v29 }
 0x5f3   : > { %5666 = vst [vmem:[%s9416_s16 + $0x30] sm:$0xff] %v5650_v2  ;;  %v5651_v32 = vmax.f32 %v5609_v4, 0.0 }
 0x5f4   : > { %5664 = vst [vmem:[%s9416_s16 + $0x20] sm:$0xff] %v5648_v6  ;;  %v5649_v7 = vmax.f32 %v5601_v33, 0.0 }
 0x5f5   : > { %5667 = vst [vmem:[%s9416_s16 + $0x38] sm:$0xff] %v5651_v32 }
 0x5f6   : > { %5665 = vst [vmem:[%s9416_s16 + $0x28] sm:$0xff] %v5649_v7 }
 0x5fe   : > { %v6349_v8 = vpop.f32.mrb[104].mxu1 }
 0x5ff   : > { %v5622_v9 = vadd.f32 %v6349_v8, %v6232_v55  ;;  %v5613_v10 = vpop.f32.mrb[105].mxu1 }
 0x600   : > { %v5614_v11 = vadd.f32 %v6232_v55, %v5613_v10  ;;  %v6350_v12 = vpop.f32.mrb[106].mxu1 }
 0x601   : > { %v5654_v13 = vmax.f32 %v5622_v9, 0.0  ;;  %v5625_v14 = vadd.f32 %v6350_v12, %v6232_v55  ;;  %v5616_v15 = vpop.f32.mrb[107].mxu1 }
 0x602   : > { %v5652_v17 = vmax.f32 %v5614_v11, 0.0  ;;  %v5617_v19 = vadd.f32 %v6232_v55, %v5616_v15 }
 0x603   : > { %5670 = vst [vmem:[%s9416_s16 + $0x50] sm:$0xff] %v5654_v13  ;;  %v5655_v1 = vmax.f32 %v5625_v14, 0.0 }
 0x604   : > { %5668 = vst [vmem:[%s9416_s16 + $0x40] sm:$0xff] %v5652_v17  ;;  %v5653_v24 = vmax.f32 %v5617_v19, 0.0 }
 0x605   : > { %5671 = vst [vmem:[%s9416_s16 + $0x58] sm:$0xff] %v5655_v1 }
 0x606   : > { %5669 = vst [vmem:[%s9416_s16 + $0x48] sm:$0xff] %v5653_v24 }
 0x60e   : > { %v6353_v25 = vpop.f32.mrb[108].mxu1 }
 0x60f   : > { %v5638_v46 = vadd.f32 %v6353_v25, %v6232_v55  ;;  %v5629_v26 = vpop.f32.mrb[109].mxu1 }
 0x610   : > { %v5630_v27 = vadd.f32 %v6232_v55, %v5629_v26  ;;  %v6354_v20 = vpop.f32.mrb[110].mxu1 }
 0x611   : > { %v5658_v31 = vmax.f32 %v5638_v46, 0.0  ;;  %v5641_v38 = vadd.f32 %v6354_v20, %v6232_v55  ;;  %v5632_v18 = vpop.f32.mrb[111].mxu1 }
 0x612   : > { %v5656_v40 = vmax.f32 %v5630_v27, 0.0  ;;  %v5633_v42 = vadd.f32 %v6232_v55, %v5632_v18 }
 0x613   : > { %5674 = vst [vmem:[%s9416_s16 + $0x70] sm:$0xff] %v5658_v31  ;;  %v5659_v3 = vmax.f32 %v5641_v38, 0.0 }
 0x614   : > { %5672 = vst [vmem:[%s9416_s16 + $0x60] sm:$0xff] %v5656_v40  ;;  %v5657_v43 = vmax.f32 %v5633_v42, 0.0 }
 0x615   : > { %5675 = vst [vmem:[%s9416_s16 + $0x78] sm:$0xff] %v5659_v3 }
 0x616   : > { %5673 = vst [vmem:[%s9416_s16 + $0x68] sm:$0xff] %v5657_v43 }
 0x617 PF: > { %s23_s25 = sadd.s32 1, %s7547_s25  }
 0x618   : > { %p20_p4 = scmp.ge.s32.totalorder %s23_s25, 4  }
 0x61a   :  { %22 = sbr.rel (!%p20_p4) target bundleno = 1 (0x1), region = 102 }

</bundles_post_ra>
